<compile_context>
chip_gen: v7x
topology: tpu7x:2x2x1
jax: 0.10.0
libtpu: 0.0.40
codegen_flags: <defaults>
</compile_context>

<pallas_src>
import jax
import jax.numpy as jnp
from jax.experimental import pallas as pl
from jax.experimental.pallas import tpu as pltpu

EPS = 1e-8  # torch.cosine_similarity eps


# ----------------------------------------------------------------------------
# Pallas kernel 1: full BiMPM matching block (one batch element per grid step)
# ----------------------------------------------------------------------------
def _matching_kernel(v1f_ref, v1b_ref, v2f_ref, v2b_ref,
                     v1f0_ref, v1b0_ref, v2f0_ref, v2b0_ref,
                     wsq_cols_ref, pq_ref, qp_ref):
    f32 = jnp.float32
    v1f = v1f_ref[0].astype(f32)              # (L1, H)
    v1b = v1b_ref[0].astype(f32)
    v2f = v2f_ref[0].astype(f32)              # (L2, H)
    v2b = v2b_ref[0].astype(f32)
    v1f0 = v1f0_ref[0].astype(f32)            # batch-0 streams (.view(-1) bug)
    v1b0 = v1b0_ref[0].astype(f32)
    v2f0 = v2f0_ref[0].astype(f32)
    v2b0 = v2b0_ref[0].astype(f32)
    wsq_cols = wsq_cols_ref[...].astype(f32)  # (H, 5*128): [W2|W3|W4|W5|W6]^2

    L1, H = v1f.shape
    L2 = v2f.shape[0]
    GRP = 128
    C_W2, C_W3, C_W4, C_W5, C_W6 = 0, 1, 2, 3, 4

    def dot_tn(a, b):   # a @ b.T  (contract last dims; MXU trans_b path)
        return jax.lax.dot_general(a, b, (((1,), (1,)), ((), ())),
                                   preferred_element_type=f32)

    def rcp(x):         # divide work moved to the otherwise-idle EUP slot
        return pl.reciprocal(jnp.maximum(x, EPS), approx=True)

    # ---- pairwise cosine matrices (exact divide: feeds argmax) --------------
    def cos_matrix(a, b):
        num = dot_tn(a, b)                                     # (La, Lb)
        na = jnp.sqrt(jnp.sum(a * a, axis=1, keepdims=True))   # (La, 1)
        nb = jnp.sqrt(jnp.sum(b * b, axis=1, keepdims=True))   # (Lb, 1)
        return num / jnp.maximum(na * jnp.swapaxes(nb, 0, 1), EPS)

    align_fw = cos_matrix(v1f, v2f)                            # (L1, L2)
    align_bw = cos_matrix(v1b, v2b)
    align_fw_t = jnp.swapaxes(align_fw, 0, 1)                  # shared, one per dir
    align_bw_t = jnp.swapaxes(align_bw, 0, 1)

    # ---- attentive mean vectors ---------------------------------------------
    def h_means(align, align_t, a, b):
        s_pq = jnp.sum(align, axis=1, keepdims=True) + 1e-8
        h_pq = jnp.dot(align, b, preferred_element_type=f32) / s_pq
        s_qp = jnp.sum(align_t, axis=1, keepdims=True) + 1e-8
        h_qp = jnp.dot(align_t, a, preferred_element_type=f32) / s_qp
        return h_pq, h_qp

    h_mean_pq_fw, h_mean_qp_fw = h_means(align_fw, align_fw_t, v1f, v2f)
    h_mean_pq_bw, h_mean_qp_bw = h_means(align_bw, align_bw_t, v1b, v2b)

    # ---- max-attentive gather from batch element 0 (reference .view(-1) bug)
    #      via first-argmax one-hot matmuls -----------------------------------
    def onehot_cols(mat):            # one-hot of first argmax over last axis
        n = mat.shape[1]
        iota = jax.lax.broadcasted_iota(jnp.int32, mat.shape, 1)
        mx = jnp.max(mat, axis=1, keepdims=True)
        idx = jnp.min(jnp.where(mat == mx, iota, n), axis=1, keepdims=True)
        return (iota == idx).astype(f32)

    def h_maxes(align, align_t, a0, b0):
        h_pq = jnp.dot(onehot_cols(align), b0, preferred_element_type=f32)    # (L1,H)
        h_qp = jnp.dot(onehot_cols(align_t), a0, preferred_element_type=f32)  # (L2,H)
        return h_pq, h_qp

    h_max_pq_fw, h_max_qp_fw = h_maxes(align_fw, align_fw_t, v1f0, v2f0)
    h_max_pq_bw, h_max_qp_bw = h_maxes(align_bw, align_bw_t, v1b0, v2b0)

    # ---- ONE fused MXU matmul: every multi-perspective cosine numerator and
    #      every per-perspective norm, against the lane-aligned squared weights
    blocks = [
        v1b * v2b[L2 - 1:L2, :],          # 0  full  pq  num    (W2)
        v2b * v1b[L1 - 1:L1, :],          # 1  full  qp  num    (W2)
        v1f * h_mean_pq_fw,               # 2  attn  pq  fw     (W5)
        v2f * h_mean_qp_fw,               # 3  attn  qp  fw     (W5)
        v1b * h_mean_pq_bw,               # 4  attn  pq  bw     (W6)
        v2b * h_mean_qp_bw,               # 5  attn  qp  bw     (W6)
        v1f * h_max_pq_fw,                # 6  maxat pq  fw     (W5)
        v2f * h_max_qp_fw,                # 7  maxat qp  fw     (W5)
        v1b * h_max_pq_bw,                # 8  maxat pq  bw     (W6)
        v2b * h_max_qp_bw,                # 9  maxat qp  bw     (W6)
        v1f * v1f,                        # 10 norms v1f        (W3, W5)
        v2f * v2f,                        # 11 norms v2f        (W3, W5)
        v1b * v1b,                        # 12 norms v1b        (W2, W4, W6)
        v2b * v2b,                        # 13 norms v2b        (W2, W4, W6)
        h_mean_pq_fw * h_mean_pq_fw,      # 14                  (W5)
        h_mean_qp_fw * h_mean_qp_fw,      # 15                  (W5)
        h_mean_pq_bw * h_mean_pq_bw,      # 16                  (W6)
        h_mean_qp_bw * h_mean_qp_bw,      # 17                  (W6)
        h_max_pq_fw * h_max_pq_fw,        # 18                  (W5)
        h_max_qp_fw * h_max_qp_fw,        # 19                  (W5)
        h_max_pq_bw * h_max_pq_bw,        # 20                  (W6)
        h_max_qp_bw * h_max_qp_bw,        # 21                  (W6)
    ]
    offs, o = [], 0
    for blk in blocks:
        offs.append(o)
        o += blk.shape[0]
    big = jnp.dot(jnp.concatenate(blocks, axis=0), wsq_cols,
                  preferred_element_type=f32)                  # (rows, 5*128)

    def take(i, c):   # 128-lane-aligned slice; lanes >= P are exact zeros
        return big[offs[i]:offs[i] + blocks[i].shape[0], c * GRP:(c + 1) * GRP]

    def nrm(i, c):
        return jnp.sqrt(take(i, c))

    # per-perspective norms of the context streams (computed once, reused)
    n_v1f_w3 = nrm(10, C_W3); n_v2f_w3 = nrm(11, C_W3)
    n_v1b_w4 = nrm(12, C_W4); n_v2b_w4 = nrm(13, C_W4)
    n_v1b_w2 = nrm(12, C_W2); n_v2b_w2 = nrm(13, C_W2)
    n_v1f_w5 = nrm(10, C_W5); n_v2f_w5 = nrm(11, C_W5)
    n_v1b_w6 = nrm(12, C_W6); n_v2b_w6 = nrm(13, C_W6)

    # full matching (reference quirk: backward states with W_2, used twice).
    # TODO(synk): the reference compares against the last *time step* (may be a
    # padded all-zero row for short sequences) -- kept as-is for parity.
    full_pq = take(0, C_W2) * rcp(n_v1b_w2 * n_v2b_w2[L2 - 1:L2, :])
    full_qp = take(1, C_W2) * rcp(n_v2b_w2 * n_v1b_w2[L1 - 1:L1, :])

    # attentive matching
    at_pq_fw = take(2, C_W5) * rcp(n_v1f_w5 * nrm(14, C_W5))
    at_qp_fw = take(3, C_W5) * rcp(n_v2f_w5 * nrm(15, C_W5))
    at_pq_bw = take(4, C_W6) * rcp(n_v1b_w6 * nrm(16, C_W6))
    at_qp_bw = take(5, C_W6) * rcp(n_v2b_w6 * nrm(17, C_W6))

    # max-attentive matching
    ma_pq_fw = take(6, C_W5) * rcp(n_v1f_w5 * nrm(18, C_W5))
    ma_qp_fw = take(7, C_W5) * rcp(n_v2f_w5 * nrm(19, C_W5))
    ma_pq_bw = take(8, C_W6) * rcp(n_v1b_w6 * nrm(20, C_W6))
    ma_qp_bw = take(9, C_W6) * rcp(n_v2b_w6 * nrm(21, C_W6))

    # max-pooling matching: one (L1*L2, H) @ (H, 128) matmul per direction,
    # reusing the lane-aligned squared-weight column group (full lane fill).
    def maxpool(v1, v2, c, n1, n2):
        La, Lb = v1.shape[0], v2.shape[0]
        outer = (v1[:, None, :] * v2[None, :, :]).reshape(La * Lb, H)
        num = jnp.dot(outer, wsq_cols[:, c * GRP:(c + 1) * GRP],
                      preferred_element_type=f32).reshape(La, Lb, GRP)
        cos3 = num * rcp(n1[:, None, :] * n2[None, :, :])
        return jnp.max(cos3, axis=1), jnp.max(cos3, axis=0)   # (La,GRP), (Lb,GRP)

    mp_pq_fw, mp_qp_fw = maxpool(v1f, v2f, C_W3, n_v1f_w3, n_v2f_w3)
    mp_pq_bw, mp_qp_bw = maxpool(v1b, v2b, C_W4, n_v1b_w4, n_v2b_w4)

    # lane-dense (1, 8, L, 128) output store: every part is already a full
    # 128-lane slab (lanes >= P are exact zeros) -> unmasked stores only.
    pq_parts = [full_pq, full_pq, mp_pq_fw, mp_pq_bw,
                at_pq_fw, at_pq_bw, ma_pq_fw, ma_pq_bw]
    qp_parts = [full_qp, full_qp, mp_qp_fw, mp_qp_bw,
                at_qp_fw, at_qp_bw, ma_qp_fw, ma_qp_bw]
    pq_ref[...] = jnp.stack(pq_parts, axis=0)[None].astype(pq_ref.dtype)
    qp_ref[...] = jnp.stack(qp_parts, axis=0)[None].astype(qp_ref.dtype)


def _matching_vmem_bytes(B, L1, L2, H, P):
    GRP = 128
    Lm = max(L1, L2)
    rows = 11 * (L1 + L2)
    est = 4 * (
        2 * (2 * 2 * (L1 + L2) * H + 2 * 8 * (L1 + L2) * GRP)   # pipelined bufs
        + H * 5 * GRP                                           # packed weights
        + rows * H + rows * 5 * GRP                             # fused matmul in/out
        + 2 * (L1 * L2 * H + 2 * L1 * L2 * GRP)                 # maxpool outer/cos
        + 48 * Lm * GRP + 24 * Lm * H + 8 * Lm * Lm             # misc temporaries
    )
    return int(min(max(2 * est, 16 * 1024 * 1024), 64 * 1024 * 1024))


def bimpm_matching(v1f, v1b, v2f, v2b, w_stack):
    B, L1, H = v1f.shape
    L2 = v2f.shape[1]
    P = w_stack.shape[1]
    GRP = 128

    # wrapper-side layout plumbing (free): square, transpose and lane-pack the
    # perspective weights, each group padded to a full 128-lane slot.  Only
    # W_2..W_6 are used by the reference forward pass.
    wsq = w_stack.astype(jnp.float32) ** 2                        # (8, P, H)
    wsq_cols = jnp.concatenate(
        [jnp.pad(wsq[k].T, ((0, 0), (0, GRP - P))) for k in (1, 2, 3, 4, 5)],
        axis=1)                                                   # (H, 5*128)

    spec_b1 = pl.BlockSpec((1, L1, H), lambda b: (b, 0, 0))
    spec_b2 = pl.BlockSpec((1, L2, H), lambda b: (b, 0, 0))
    spec_01 = pl.BlockSpec((1, L1, H), lambda b: (0, 0, 0))       # batch-0 view
    spec_02 = pl.BlockSpec((1, L2, H), lambda b: (0, 0, 0))

    fn = pl.pallas_call(
        _matching_kernel,
        out_shape=(jax.ShapeDtypeStruct((B, 8, L1, GRP), jnp.float32),
                   jax.ShapeDtypeStruct((B, 8, L2, GRP), jnp.float32)),
        grid_spec=pltpu.PrefetchScalarGridSpec(
            num_scalar_prefetch=0,
            grid=(B,),
            in_specs=[spec_b1, spec_b1, spec_b2, spec_b2,
                      spec_01, spec_01, spec_02, spec_02,
                      pl.BlockSpec((H, 5 * GRP), lambda b: (0, 0))],
            out_specs=(pl.BlockSpec((1, 8, L1, GRP), lambda b: (b, 0, 0, 0)),
                       pl.BlockSpec((1, 8, L2, GRP), lambda b: (b, 0, 0, 0))),
        ),
        compiler_params=pltpu.CompilerParams(
            dimension_semantics=("parallel",),
            vmem_limit_bytes=_matching_vmem_bytes(B, L1, L2, H, P)),
    )
    pq_pad, qp_pad = fn(v1f, v1b, v2f, v2b, v1f, v1b, v2f, v2b, wsq_cols)
    # back to the reference 8*P-wide concat layout (XLA-side slice/reshape).
    pq_cat = jnp.transpose(pq_pad[:, :, :, :P], (0, 2, 1, 3)).reshape(B, L1, 8 * P)
    qp_cat = jnp.transpose(qp_pad[:, :, :, :P], (0, 2, 1, 3)).reshape(B, L2, 8 * P)
    return pq_cat, qp_cat


# ----------------------------------------------------------------------------
# Pallas kernel 2: prediction head  tanh(fc1(x)) -> sigmoid(fc2(.))
# (weights pre-transposed to (in, out); fc2 output padded to 128 lanes)
# ----------------------------------------------------------------------------
def _head_kernel(x_ref, w1_ref, b1_ref, w2_ref, b2_ref, o_ref):
    x = x_ref[...].astype(jnp.float32)
    h = jnp.tanh(jnp.dot(x, w1_ref[...], preferred_element_type=jnp.float32)
                 + b1_ref[...])
    logit = (jnp.dot(h, w2_ref[...], preferred_element_type=jnp.float32)
             + b2_ref[...])
    o_ref[...] = jax.nn.sigmoid(logit).astype(o_ref.dtype)


def bimpm_head(x, w1_t, b1, w2_t, b2):
    B = x.shape[0]
    GRP = 128
    n_out = w2_t.shape[1]
    w2p = jnp.pad(w2_t, ((0, 0), (0, GRP - n_out)))   # lane-dense fc2 output
    b2p = jnp.pad(b2, ((0, 0), (0, GRP - n_out)))
    fn = pl.pallas_call(
        _head_kernel,
        out_shape=jax.ShapeDtypeStruct((B, GRP), jnp.float32),
        grid_spec=pltpu.PrefetchScalarGridSpec(
            num_scalar_prefetch=0,
            grid=(1,),
            in_specs=[pl.BlockSpec(x.shape, lambda i: (0, 0)),
                      pl.BlockSpec(w1_t.shape, lambda i: (0, 0)),
                      pl.BlockSpec(b1.shape, lambda i: (0, 0)),
                      pl.BlockSpec(w2p.shape, lambda i: (0, 0)),
                      pl.BlockSpec(b2p.shape, lambda i: (0, 0))],
            out_specs=pl.BlockSpec((B, GRP), lambda i: (0, 0)),
        ),
        compiler_params=pltpu.CompilerParams(dimension_semantics=("arbitrary",)),
    )
    return fn(x, w1_t, b1, w2p, b2p)[:, :n_out]


# ----------------------------------------------------------------------------
# JAX glue: embedding + masked bidirectional GRU (pack_padded semantics)
# ----------------------------------------------------------------------------
# TODO(synk): the GRU recurrence stays in lax.scan (strict sequential dependence
# across time steps; no clean Pallas grid fit for tiny hidden sizes).
def _gru_cell(x, h, p):
    gi = x @ p["w_ih"].T + p["b_ih"]
    gh = h @ p["w_hh"].T + p["b_hh"]
    i_r, i_z, i_n = jnp.split(gi, 3, axis=-1)
    h_r, h_z, h_n = jnp.split(gh, 3, axis=-1)
    r = jax.nn.sigmoid(i_r + h_r)
    z = jax.nn.sigmoid(i_z + h_z)
    n = jnp.tanh(i_n + r * h_n)
    return (1.0 - z) * n + z * h


def _gru_scan(x, lengths, p):
    B, T, _ = x.shape
    H = p["w_hh"].shape[1]

    def step(h, inp):
        x_t, t = inp
        h_new = _gru_cell(x_t, h, p)
        mask = (t < lengths)[:, None]
        h = jnp.where(mask, h_new, h)
        out = jnp.where(mask, h_new, 0.0)
        return h, out

    h_last, outs = jax.lax.scan(step, jnp.zeros((B, H), jnp.float32),
                                (jnp.swapaxes(x, 0, 1), jnp.arange(T)))
    return jnp.swapaxes(outs, 0, 1), h_last


def _bigru(x, lengths, p_fw, p_bw):
    B, T, _ = x.shape
    out_fw, h_fw = _gru_scan(x, lengths, p_fw)
    rev_idx = jnp.clip(lengths[:, None] - 1 - jnp.arange(T)[None, :], 0, T - 1)
    x_rev = jnp.take_along_axis(x, rev_idx[:, :, None], axis=1)
    out_rev, h_bw = _gru_scan(x_rev, lengths, p_bw)
    out_bw = jnp.take_along_axis(out_rev, rev_idx[:, :, None], axis=1)
    valid = (jnp.arange(T)[None, :] < lengths[:, None])[:, :, None]
    out_bw = jnp.where(valid, out_bw, 0.0)
    return jnp.concatenate([out_fw, out_bw], axis=-1), h_fw, h_bw


# ----------------------------------------------------------------------------
# Parameters & forward
# ----------------------------------------------------------------------------
def init_params(key, vocab_size, input_size, rnn_size, num_perspective):
    keys = iter(jax.random.split(key, 32))

    def nrm(shape, scale):
        return (scale * jax.random.normal(next(keys), shape)).astype(jnp.float32)

    def gru(in_dim):
        s = 1.0 / float(rnn_size) ** 0.5
        return {"w_ih": nrm((3 * rnn_size, in_dim), s),
                "w_hh": nrm((3 * rnn_size, rnn_size), s),
                "b_ih": nrm((3 * rnn_size,), s),
                "b_hh": nrm((3 * rnn_size,), s)}

    embed = nrm((vocab_size, input_size), 1.0).at[0].set(0.0)  # padding_idx=0
    return {
        "embed": embed,
        "ctx_fw": gru(input_size), "ctx_bw": gru(input_size),
        "agg_fw": gru(8 * num_perspective), "agg_bw": gru(8 * num_perspective),
        "W": nrm((8, num_perspective, rnn_size), 1.0),  # W_1 .. W_8 (torch.randn)
        "fc1_w": nrm((2 * rnn_size, 4 * rnn_size), 0.05),
        "fc1_b": nrm((2 * rnn_size,), 0.05),
        "fc2_w": nrm((1, 2 * rnn_size), 0.05),
        "fc2_b": nrm((1,), 0.05),
    }


def bimpm_forward(params, sen1, len1, sen2, len2):
    rnn_size = params["ctx_fw"]["w_hh"].shape[1]

    # _context_representation (dropout == identity at inference)
    emb1 = jnp.take(params["embed"], sen1, axis=0)
    emb2 = jnp.take(params["embed"], sen2, axis=0)
    out1, _, _ = _bigru(emb1, len1, params["ctx_fw"], params["ctx_bw"])
    out2, _, _ = _bigru(emb2, len2, params["ctx_fw"], params["ctx_bw"])
    v1f, v1b = out1[:, :, :rnn_size], out1[:, :, rnn_size:]
    v2f, v2b = out2[:, :, :rnn_size], out2[:, :, rnn_size:]

    # _matching — Pallas kernel (hot path)
    pq_cat, qp_cat = bimpm_matching(v1f, v1b, v2f, v2b, params["W"])

    # _aggrigation — final hidden states of the bidirectional agg GRU
    _, h_fw_pq, h_bw_pq = _bigru(pq_cat, len1, params["agg_fw"], params["agg_bw"])
    _, h_fw_qp, h_bw_qp = _bigru(qp_cat, len2, params["agg_fw"], params["agg_bw"])
    pq_hidden = jnp.concatenate([h_fw_pq, h_bw_pq], axis=-1)
    qp_hidden = jnp.concatenate([h_fw_qp, h_bw_qp], axis=-1)
    final_cat = jnp.concatenate([pq_hidden, qp_hidden], axis=-1)   # (B, 4*rnn)

    # prediction head — Pallas kernel (pre-transposed weights, padded output)
    prob = bimpm_head(final_cat,
                      params["fc1_w"].T, params["fc1_b"][None, :],
                      params["fc2_w"].T, params["fc2_b"][None, :])
    return jnp.squeeze(prob)


# ----------------------------------------------------------------------------
if __name__ == "__main__":
    VOCAB, INPUT, RNN, PERSP = 50, 16, 32, 20     # small-shape version of the module
    B, T1, T2 = 2, 8, 8

    params = init_params(jax.random.PRNGKey(42), VOCAB, INPUT, RNN, PERSP)

    key = jax.random.PRNGKey(0)
    k1, k2 = jax.random.split(key)
    len1 = jnp.array([T1, 5], dtype=jnp.int32)
    len2 = jnp.array([T2, 6], dtype=jnp.int32)
    sen1 = jax.random.randint(k1, (B, T1), 1, VOCAB).astype(jnp.int32)
    sen2 = jax.random.randint(k2, (B, T2), 1, VOCAB).astype(jnp.int32)
    # zero-pad beyond lengths (padding_idx = 0)
    sen1 = jnp.where(jnp.arange(T1)[None, :] < len1[:, None], sen1, 0)
    sen2 = jnp.where(jnp.arange(T2)[None, :] < len2[:, None], sen2, 0)

    prob = jax.jit(bimpm_forward)(params, sen1, len1, sen2, len2)
    prob = jax.block_until_ready(prob)

    assert prob.shape == (B,), prob.shape
    assert bool(jnp.all(jnp.isfinite(prob)))
    assert bool(jnp.all((prob >= 0.0) & (prob <= 1.0)))
    print("KERNEL_OK")
</pallas_src>

<mosaic_0001>
module attributes {stable_mosaic.version = 11 : i64} {
  func.func @_matching_kernel(%arg0: i32, %arg1: memref<1x8x32xf32, #tpu.memory_space<vmem>>, %arg2: memref<1x8x32xf32, #tpu.memory_space<vmem>>, %arg3: memref<1x8x32xf32, #tpu.memory_space<vmem>>, %arg4: memref<1x8x32xf32, #tpu.memory_space<vmem>>, %arg5: memref<1x8x32xf32, #tpu.memory_space<vmem>>, %arg6: memref<1x8x32xf32, #tpu.memory_space<vmem>>, %arg7: memref<1x8x32xf32, #tpu.memory_space<vmem>>, %arg8: memref<1x8x32xf32, #tpu.memory_space<vmem>>, %arg9: memref<32x640xf32, #tpu.memory_space<vmem>>, %arg10: memref<1x8x8x128xf32, #tpu.memory_space<vmem>>, %arg11: memref<1x8x8x128xf32, #tpu.memory_space<vmem>>) attributes {dimension_semantics = [#tpu.dimension_semantics<parallel>], iteration_bounds = array<i64: 2>, scalar_prefetch = 0 : i64, scratch_operands = 0 : i64, tpu.core_type = #tpu.core_type<tc>, window_params = [{transform_indices = @transform_0, window_bounds = array<i64: 1, 8, 32>}, {transform_indices = @transform_1, window_bounds = array<i64: 1, 8, 32>}, {transform_indices = @transform_2, window_bounds = array<i64: 1, 8, 32>}, {transform_indices = @transform_3, window_bounds = array<i64: 1, 8, 32>}, {transform_indices = @transform_4, window_bounds = array<i64: 1, 8, 32>}, {transform_indices = @transform_5, window_bounds = array<i64: 1, 8, 32>}, {transform_indices = @transform_6, window_bounds = array<i64: 1, 8, 32>}, {transform_indices = @transform_7, window_bounds = array<i64: 1, 8, 32>}, {pipeline_mode = #tpu.pipeline_mode<synchronous>, transform_indices = @transform_8, window_bounds = array<i64: 32, 640>}, {transform_indices = @transform_9, window_bounds = array<i64: 1, 8, 8, 128>}, {transform_indices = @transform_10, window_bounds = array<i64: 1, 8, 8, 128>}]} {
    %c0 = arith.constant 0 : index
    %c0_0 = arith.constant 0 : index
    %c0_1 = arith.constant 0 : index
    %0 = vector.load %arg1[%c0, %c0_0, %c0_1] : memref<1x8x32xf32, #tpu.memory_space<vmem>>, vector<1x8x32xf32>
    %1 = vector.shape_cast %0 : vector<1x8x32xf32> to vector<8x32xf32>
    %c0_2 = arith.constant 0 : index
    %c0_3 = arith.constant 0 : index
    %c0_4 = arith.constant 0 : index
    %2 = vector.load %arg2[%c0_2, %c0_3, %c0_4] : memref<1x8x32xf32, #tpu.memory_space<vmem>>, vector<1x8x32xf32>
    %3 = vector.shape_cast %2 : vector<1x8x32xf32> to vector<8x32xf32>
    %c0_5 = arith.constant 0 : index
    %c0_6 = arith.constant 0 : index
    %c0_7 = arith.constant 0 : index
    %4 = vector.load %arg3[%c0_5, %c0_6, %c0_7] : memref<1x8x32xf32, #tpu.memory_space<vmem>>, vector<1x8x32xf32>
    %5 = vector.shape_cast %4 : vector<1x8x32xf32> to vector<8x32xf32>
    %c0_8 = arith.constant 0 : index
    %c0_9 = arith.constant 0 : index
    %c0_10 = arith.constant 0 : index
    %6 = vector.load %arg4[%c0_8, %c0_9, %c0_10] : memref<1x8x32xf32, #tpu.memory_space<vmem>>, vector<1x8x32xf32>
    %7 = vector.shape_cast %6 : vector<1x8x32xf32> to vector<8x32xf32>
    %c0_11 = arith.constant 0 : index
    %c0_12 = arith.constant 0 : index
    %c0_13 = arith.constant 0 : index
    %8 = vector.load %arg5[%c0_11, %c0_12, %c0_13] : memref<1x8x32xf32, #tpu.memory_space<vmem>>, vector<1x8x32xf32>
    %9 = vector.shape_cast %8 : vector<1x8x32xf32> to vector<8x32xf32>
    %c0_14 = arith.constant 0 : index
    %c0_15 = arith.constant 0 : index
    %c0_16 = arith.constant 0 : index
    %10 = vector.load %arg6[%c0_14, %c0_15, %c0_16] : memref<1x8x32xf32, #tpu.memory_space<vmem>>, vector<1x8x32xf32>
    %11 = vector.shape_cast %10 : vector<1x8x32xf32> to vector<8x32xf32>
    %c0_17 = arith.constant 0 : index
    %c0_18 = arith.constant 0 : index
    %c0_19 = arith.constant 0 : index
    %12 = vector.load %arg7[%c0_17, %c0_18, %c0_19] : memref<1x8x32xf32, #tpu.memory_space<vmem>>, vector<1x8x32xf32>
    %13 = vector.shape_cast %12 : vector<1x8x32xf32> to vector<8x32xf32>
    %c0_20 = arith.constant 0 : index
    %c0_21 = arith.constant 0 : index
    %c0_22 = arith.constant 0 : index
    %14 = vector.load %arg8[%c0_20, %c0_21, %c0_22] : memref<1x8x32xf32, #tpu.memory_space<vmem>>, vector<1x8x32xf32>
    %15 = vector.shape_cast %14 : vector<1x8x32xf32> to vector<8x32xf32>
    %c0_23 = arith.constant 0 : index
    %c0_24 = arith.constant 0 : index
    %16 = vector.load %arg9[%c0_23, %c0_24] : memref<32x640xf32, #tpu.memory_space<vmem>>, vector<32x640xf32>
    %cst = arith.constant dense<0.000000e+00> : vector<8x8xf32>
    %17 = tpu.matmul %1, %5, %cst {dimension_numbers = #tpu.dot_dimension_numbers<[1], [1], [0], [0], [0, 0, 1, 0], [], []>} : vector<8x32xf32>, vector<8x32xf32>, vector<8x8xf32> -> vector<8x8xf32>
    %18 = arith.mulf %1, %1 : vector<8x32xf32>
    %cst_25 = arith.constant dense<0.000000e+00> : vector<8xf32>
    %19 = vector.multi_reduction <add>, %18, %cst_25 [1] : vector<8x32xf32> to vector<8xf32>
    %20 = vector.shape_cast %19 : vector<8xf32> to vector<8x1xf32>
    %21 = math.sqrt %20 : vector<8x1xf32>
    %22 = arith.mulf %5, %5 : vector<8x32xf32>
    %cst_26 = arith.constant dense<0.000000e+00> : vector<8xf32>
    %23 = vector.multi_reduction <add>, %22, %cst_26 [1] : vector<8x32xf32> to vector<8xf32>
    %24 = vector.shape_cast %23 : vector<8xf32> to vector<8x1xf32>
    %25 = math.sqrt %24 : vector<8x1xf32>
    %26 = tpu.transpose %25, [1, 0] : vector<8x1xf32> -> vector<1x8xf32>
    %27 = vector.broadcast %21 : vector<8x1xf32> to vector<8x8xf32>
    %28 = vector.broadcast %26 : vector<1x8xf32> to vector<8x8xf32>
    %29 = arith.mulf %27, %28 : vector<8x8xf32>
    %cst_27 = arith.constant 9.99999993E-9 : f32
    %30 = vector.broadcast %cst_27 : f32 to vector<8x8xf32>
    %31 = arith.maximumf %29, %30 : vector<8x8xf32>
    %32 = arith.divf %17, %31 : vector<8x8xf32>
    %cst_28 = arith.constant dense<0.000000e+00> : vector<8x8xf32>
    %33 = tpu.matmul %3, %7, %cst_28 {dimension_numbers = #tpu.dot_dimension_numbers<[1], [1], [0], [0], [0, 0, 1, 0], [], []>} : vector<8x32xf32>, vector<8x32xf32>, vector<8x8xf32> -> vector<8x8xf32>
    %34 = arith.mulf %3, %3 : vector<8x32xf32>
    %cst_29 = arith.constant dense<0.000000e+00> : vector<8xf32>
    %35 = vector.multi_reduction <add>, %34, %cst_29 [1] : vector<8x32xf32> to vector<8xf32>
    %36 = vector.shape_cast %35 : vector<8xf32> to vector<8x1xf32>
    %37 = math.sqrt %36 : vector<8x1xf32>
    %38 = arith.mulf %7, %7 : vector<8x32xf32>
    %cst_30 = arith.constant dense<0.000000e+00> : vector<8xf32>
    %39 = vector.multi_reduction <add>, %38, %cst_30 [1] : vector<8x32xf32> to vector<8xf32>
    %40 = vector.shape_cast %39 : vector<8xf32> to vector<8x1xf32>
    %41 = math.sqrt %40 : vector<8x1xf32>
    %42 = tpu.transpose %41, [1, 0] : vector<8x1xf32> -> vector<1x8xf32>
    %43 = vector.broadcast %37 : vector<8x1xf32> to vector<8x8xf32>
    %44 = vector.broadcast %42 : vector<1x8xf32> to vector<8x8xf32>
    %45 = arith.mulf %43, %44 : vector<8x8xf32>
    %cst_31 = arith.constant 9.99999993E-9 : f32
    %46 = vector.broadcast %cst_31 : f32 to vector<8x8xf32>
    %47 = arith.maximumf %45, %46 : vector<8x8xf32>
    %48 = arith.divf %33, %47 : vector<8x8xf32>
    %49 = tpu.transpose %32, [1, 0] : vector<8x8xf32> -> vector<8x8xf32>
    %50 = tpu.transpose %48, [1, 0] : vector<8x8xf32> -> vector<8x8xf32>
    %cst_32 = arith.constant dense<0.000000e+00> : vector<8xf32>
    %51 = vector.multi_reduction <add>, %32, %cst_32 [1] : vector<8x8xf32> to vector<8xf32>
    %52 = vector.shape_cast %51 : vector<8xf32> to vector<8x1xf32>
    %cst_33 = arith.constant 9.99999993E-9 : f32
    %53 = vector.broadcast %cst_33 : f32 to vector<8x1xf32>
    %54 = arith.addf %52, %53 : vector<8x1xf32>
    %cst_34 = arith.constant dense<0.000000e+00> : vector<8x32xf32>
    %55 = tpu.matmul %32, %5, %cst_34 {dimension_numbers = #tpu.dot_dimension_numbers<[1], [0], [0], [1], [0, 0, 1, 1], [], []>} : vector<8x8xf32>, vector<8x32xf32>, vector<8x32xf32> -> vector<8x32xf32>
    %56 = vector.broadcast %54 : vector<8x1xf32> to vector<8x32xf32>
    %57 = arith.divf %55, %56 : vector<8x32xf32>
    %cst_35 = arith.constant dense<0.000000e+00> : vector<8xf32>
    %58 = vector.multi_reduction <add>, %49, %cst_35 [1] : vector<8x8xf32> to vector<8xf32>
    %59 = vector.shape_cast %58 : vector<8xf32> to vector<8x1xf32>
    %cst_36 = arith.constant 9.99999993E-9 : f32
    %60 = vector.broadcast %cst_36 : f32 to vector<8x1xf32>
    %61 = arith.addf %59, %60 : vector<8x1xf32>
    %cst_37 = arith.constant dense<0.000000e+00> : vector<8x32xf32>
    %62 = tpu.matmul %49, %1, %cst_37 {dimension_numbers = #tpu.dot_dimension_numbers<[1], [0], [0], [1], [0, 0, 1, 1], [], []>} : vector<8x8xf32>, vector<8x32xf32>, vector<8x32xf32> -> vector<8x32xf32>
    %63 = vector.broadcast %61 : vector<8x1xf32> to vector<8x32xf32>
    %64 = arith.divf %62, %63 : vector<8x32xf32>
    %cst_38 = arith.constant dense<0.000000e+00> : vector<8xf32>
    %65 = vector.multi_reduction <add>, %48, %cst_38 [1] : vector<8x8xf32> to vector<8xf32>
    %66 = vector.shape_cast %65 : vector<8xf32> to vector<8x1xf32>
    %cst_39 = arith.constant 9.99999993E-9 : f32
    %67 = vector.broadcast %cst_39 : f32 to vector<8x1xf32>
    %68 = arith.addf %66, %67 : vector<8x1xf32>
    %cst_40 = arith.constant dense<0.000000e+00> : vector<8x32xf32>
    %69 = tpu.matmul %48, %7, %cst_40 {dimension_numbers = #tpu.dot_dimension_numbers<[1], [0], [0], [1], [0, 0, 1, 1], [], []>} : vector<8x8xf32>, vector<8x32xf32>, vector<8x32xf32> -> vector<8x32xf32>
    %70 = vector.broadcast %68 : vector<8x1xf32> to vector<8x32xf32>
    %71 = arith.divf %69, %70 : vector<8x32xf32>
    %cst_41 = arith.constant dense<0.000000e+00> : vector<8xf32>
    %72 = vector.multi_reduction <add>, %50, %cst_41 [1] : vector<8x8xf32> to vector<8xf32>
    %73 = vector.shape_cast %72 : vector<8xf32> to vector<8x1xf32>
    %cst_42 = arith.constant 9.99999993E-9 : f32
    %74 = vector.broadcast %cst_42 : f32 to vector<8x1xf32>
    %75 = arith.addf %73, %74 : vector<8x1xf32>
    %cst_43 = arith.constant dense<0.000000e+00> : vector<8x32xf32>
    %76 = tpu.matmul %50, %3, %cst_43 {dimension_numbers = #tpu.dot_dimension_numbers<[1], [0], [0], [1], [0, 0, 1, 1], [], []>} : vector<8x8xf32>, vector<8x32xf32>, vector<8x32xf32> -> vector<8x32xf32>
    %77 = vector.broadcast %75 : vector<8x1xf32> to vector<8x32xf32>
    %78 = arith.divf %76, %77 : vector<8x32xf32>
    %79 = tpu.iota {dimensions = array<i32: 1>} : vector<8x8xi32>
    %cst_44 = arith.constant dense<0xFF800000> : vector<8xf32>
    %80 = vector.multi_reduction <maximumf>, %32, %cst_44 [1] : vector<8x8xf32> to vector<8xf32>
    %81 = vector.shape_cast %80 : vector<8xf32> to vector<8x1xf32>
    %82 = vector.broadcast %81 : vector<8x1xf32> to vector<8x8xf32>
    %83 = arith.cmpf oeq, %32, %82 : vector<8x8xf32>
    %c8_i32 = arith.constant 8 : i32
    %84 = vector.broadcast %c8_i32 : i32 to vector<8x8xi32>
    %85 = arith.select %83, %79, %84 : vector<8x8xi1>, vector<8x8xi32>
    %cst_45 = arith.constant dense<2147483647> : vector<8xi32>
    %86 = vector.multi_reduction <minsi>, %85, %cst_45 [1] : vector<8x8xi32> to vector<8xi32>
    %87 = vector.shape_cast %86 : vector<8xi32> to vector<8x1xi32>
    %88 = vector.broadcast %87 : vector<8x1xi32> to vector<8x8xi32>
    %89 = arith.cmpi eq, %79, %88 : vector<8x8xi32>
    %90 = arith.extui %89 : vector<8x8xi1> to vector<8x8xi32>
    %91 = arith.sitofp %90 : vector<8x8xi32> to vector<8x8xf32>
    %cst_46 = arith.constant dense<0.000000e+00> : vector<8x32xf32>
    %92 = tpu.matmul %91, %13, %cst_46 {dimension_numbers = #tpu.dot_dimension_numbers<[1], [0], [0], [1], [0, 0, 1, 1], [], []>} : vector<8x8xf32>, vector<8x32xf32>, vector<8x32xf32> -> vector<8x32xf32>
    %93 = tpu.iota {dimensions = array<i32: 1>} : vector<8x8xi32>
    %cst_47 = arith.constant dense<0xFF800000> : vector<8xf32>
    %94 = vector.multi_reduction <maximumf>, %49, %cst_47 [1] : vector<8x8xf32> to vector<8xf32>
    %95 = vector.shape_cast %94 : vector<8xf32> to vector<8x1xf32>
    %96 = vector.broadcast %95 : vector<8x1xf32> to vector<8x8xf32>
    %97 = arith.cmpf oeq, %49, %96 : vector<8x8xf32>
    %c8_i32_48 = arith.constant 8 : i32
    %98 = vector.broadcast %c8_i32_48 : i32 to vector<8x8xi32>
    %99 = arith.select %97, %93, %98 : vector<8x8xi1>, vector<8x8xi32>
    %cst_49 = arith.constant dense<2147483647> : vector<8xi32>
    %100 = vector.multi_reduction <minsi>, %99, %cst_49 [1] : vector<8x8xi32> to vector<8xi32>
    %101 = vector.shape_cast %100 : vector<8xi32> to vector<8x1xi32>
    %102 = vector.broadcast %101 : vector<8x1xi32> to vector<8x8xi32>
    %103 = arith.cmpi eq, %93, %102 : vector<8x8xi32>
    %104 = arith.extui %103 : vector<8x8xi1> to vector<8x8xi32>
    %105 = arith.sitofp %104 : vector<8x8xi32> to vector<8x8xf32>
    %cst_50 = arith.constant dense<0.000000e+00> : vector<8x32xf32>
    %106 = tpu.matmul %105, %9, %cst_50 {dimension_numbers = #tpu.dot_dimension_numbers<[1], [0], [0], [1], [0, 0, 1, 1], [], []>} : vector<8x8xf32>, vector<8x32xf32>, vector<8x32xf32> -> vector<8x32xf32>
    %107 = tpu.iota {dimensions = array<i32: 1>} : vector<8x8xi32>
    %cst_51 = arith.constant dense<0xFF800000> : vector<8xf32>
    %108 = vector.multi_reduction <maximumf>, %48, %cst_51 [1] : vector<8x8xf32> to vector<8xf32>
    %109 = vector.shape_cast %108 : vector<8xf32> to vector<8x1xf32>
    %110 = vector.broadcast %109 : vector<8x1xf32> to vector<8x8xf32>
    %111 = arith.cmpf oeq, %48, %110 : vector<8x8xf32>
    %c8_i32_52 = arith.constant 8 : i32
    %112 = vector.broadcast %c8_i32_52 : i32 to vector<8x8xi32>
    %113 = arith.select %111, %107, %112 : vector<8x8xi1>, vector<8x8xi32>
    %cst_53 = arith.constant dense<2147483647> : vector<8xi32>
    %114 = vector.multi_reduction <minsi>, %113, %cst_53 [1] : vector<8x8xi32> to vector<8xi32>
    %115 = vector.shape_cast %114 : vector<8xi32> to vector<8x1xi32>
    %116 = vector.broadcast %115 : vector<8x1xi32> to vector<8x8xi32>
    %117 = arith.cmpi eq, %107, %116 : vector<8x8xi32>
    %118 = arith.extui %117 : vector<8x8xi1> to vector<8x8xi32>
    %119 = arith.sitofp %118 : vector<8x8xi32> to vector<8x8xf32>
    %cst_54 = arith.constant dense<0.000000e+00> : vector<8x32xf32>
    %120 = tpu.matmul %119, %15, %cst_54 {dimension_numbers = #tpu.dot_dimension_numbers<[1], [0], [0], [1], [0, 0, 1, 1], [], []>} : vector<8x8xf32>, vector<8x32xf32>, vector<8x32xf32> -> vector<8x32xf32>
    %121 = tpu.iota {dimensions = array<i32: 1>} : vector<8x8xi32>
    %cst_55 = arith.constant dense<0xFF800000> : vector<8xf32>
    %122 = vector.multi_reduction <maximumf>, %50, %cst_55 [1] : vector<8x8xf32> to vector<8xf32>
    %123 = vector.shape_cast %122 : vector<8xf32> to vector<8x1xf32>
    %124 = vector.broadcast %123 : vector<8x1xf32> to vector<8x8xf32>
    %125 = arith.cmpf oeq, %50, %124 : vector<8x8xf32>
    %c8_i32_56 = arith.constant 8 : i32
    %126 = vector.broadcast %c8_i32_56 : i32 to vector<8x8xi32>
    %127 = arith.select %125, %121, %126 : vector<8x8xi1>, vector<8x8xi32>
    %cst_57 = arith.constant dense<2147483647> : vector<8xi32>
    %128 = vector.multi_reduction <minsi>, %127, %cst_57 [1] : vector<8x8xi32> to vector<8xi32>
    %129 = vector.shape_cast %128 : vector<8xi32> to vector<8x1xi32>
    %130 = vector.broadcast %129 : vector<8x1xi32> to vector<8x8xi32>
    %131 = arith.cmpi eq, %121, %130 : vector<8x8xi32>
    %132 = arith.extui %131 : vector<8x8xi1> to vector<8x8xi32>
    %133 = arith.sitofp %132 : vector<8x8xi32> to vector<8x8xf32>
    %cst_58 = arith.constant dense<0.000000e+00> : vector<8x32xf32>
    %134 = tpu.matmul %133, %11, %cst_58 {dimension_numbers = #tpu.dot_dimension_numbers<[1], [0], [0], [1], [0, 0, 1, 1], [], []>} : vector<8x8xf32>, vector<8x32xf32>, vector<8x32xf32> -> vector<8x32xf32>
    %135 = vector.extract_strided_slice %7 {offsets = [7, 0], sizes = [1, 32], strides = [1, 1]} : vector<8x32xf32> to vector<1x32xf32>
    %136 = vector.broadcast %135 : vector<1x32xf32> to vector<8x32xf32>
    %137 = arith.mulf %3, %136 : vector<8x32xf32>
    %138 = vector.extract_strided_slice %3 {offsets = [7, 0], sizes = [1, 32], strides = [1, 1]} : vector<8x32xf32> to vector<1x32xf32>
    %139 = vector.broadcast %138 : vector<1x32xf32> to vector<8x32xf32>
    %140 = arith.mulf %7, %139 : vector<8x32xf32>
    %141 = arith.mulf %1, %57 : vector<8x32xf32>
    %142 = arith.mulf %5, %64 : vector<8x32xf32>
    %143 = arith.mulf %3, %71 : vector<8x32xf32>
    %144 = arith.mulf %7, %78 : vector<8x32xf32>
    %145 = arith.mulf %1, %92 : vector<8x32xf32>
    %146 = arith.mulf %5, %106 : vector<8x32xf32>
    %147 = arith.mulf %3, %120 : vector<8x32xf32>
    %148 = arith.mulf %7, %134 : vector<8x32xf32>
    %149 = arith.mulf %1, %1 : vector<8x32xf32>
    %150 = arith.mulf %5, %5 : vector<8x32xf32>
    %151 = arith.mulf %3, %3 : vector<8x32xf32>
    %152 = arith.mulf %7, %7 : vector<8x32xf32>
    %153 = arith.mulf %57, %57 : vector<8x32xf32>
    %154 = arith.mulf %64, %64 : vector<8x32xf32>
    %155 = arith.mulf %71, %71 : vector<8x32xf32>
    %156 = arith.mulf %78, %78 : vector<8x32xf32>
    %157 = arith.mulf %92, %92 : vector<8x32xf32>
    %158 = arith.mulf %106, %106 : vector<8x32xf32>
    %159 = arith.mulf %120, %120 : vector<8x32xf32>
    %160 = arith.mulf %134, %134 : vector<8x32xf32>
    %161 = tpu.concatenate %137, %140, %141, %142, %143, %144, %145, %146, %147, %148, %149, %150, %151, %152, %153, %154 in 0 : vector<8x32xf32>, vector<8x32xf32>, vector<8x32xf32>, vector<8x32xf32>, vector<8x32xf32>, vector<8x32xf32>, vector<8x32xf32>, vector<8x32xf32>, vector<8x32xf32>, vector<8x32xf32>, vector<8x32xf32>, vector<8x32xf32>, vector<8x32xf32>, vector<8x32xf32>, vector<8x32xf32>, vector<8x32xf32> -> vector<128x32xf32>
    %162 = tpu.concatenate %155, %156, %157, %158, %159, %160 in 0 : vector<8x32xf32>, vector<8x32xf32>, vector<8x32xf32>, vector<8x32xf32>, vector<8x32xf32>, vector<8x32xf32> -> vector<48x32xf32>
    %163 = tpu.concatenate %161, %162 in 0 : vector<128x32xf32>, vector<48x32xf32> -> vector<176x32xf32>
    %cst_59 = arith.constant dense<0.000000e+00> : vector<176x640xf32>
    %164 = tpu.matmul %163, %16, %cst_59 {dimension_numbers = #tpu.dot_dimension_numbers<[1], [0], [0], [1], [0, 0, 1, 1], [], []>} : vector<176x32xf32>, vector<32x640xf32>, vector<176x640xf32> -> vector<176x640xf32>
    %165 = vector.extract_strided_slice %164 {offsets = [80, 128], sizes = [8, 128], strides = [1, 1]} : vector<176x640xf32> to vector<8x128xf32>
    %166 = math.sqrt %165 : vector<8x128xf32>
    %167 = vector.extract_strided_slice %164 {offsets = [88, 128], sizes = [8, 128], strides = [1, 1]} : vector<176x640xf32> to vector<8x128xf32>
    %168 = math.sqrt %167 : vector<8x128xf32>
    %169 = vector.extract_strided_slice %164 {offsets = [96, 256], sizes = [8, 128], strides = [1, 1]} : vector<176x640xf32> to vector<8x128xf32>
    %170 = math.sqrt %169 : vector<8x128xf32>
    %171 = vector.extract_strided_slice %164 {offsets = [104, 256], sizes = [8, 128], strides = [1, 1]} : vector<176x640xf32> to vector<8x128xf32>
    %172 = math.sqrt %171 : vector<8x128xf32>
    %173 = vector.extract_strided_slice %164 {offsets = [96, 0], sizes = [8, 128], strides = [1, 1]} : vector<176x640xf32> to vector<8x128xf32>
    %174 = math.sqrt %173 : vector<8x128xf32>
    %175 = vector.extract_strided_slice %164 {offsets = [104, 0], sizes = [8, 128], strides = [1, 1]} : vector<176x640xf32> to vector<8x128xf32>
    %176 = math.sqrt %175 : vector<8x128xf32>
    %177 = vector.extract_strided_slice %164 {offsets = [80, 384], sizes = [8, 128], strides = [1, 1]} : vector<176x640xf32> to vector<8x128xf32>
    %178 = math.sqrt %177 : vector<8x128xf32>
    %179 = vector.extract_strided_slice %164 {offsets = [88, 384], sizes = [8, 128], strides = [1, 1]} : vector<176x640xf32> to vector<8x128xf32>
    %180 = math.sqrt %179 : vector<8x128xf32>
    %181 = vector.extract_strided_slice %164 {offsets = [96, 512], sizes = [8, 128], strides = [1, 1]} : vector<176x640xf32> to vector<8x128xf32>
    %182 = math.sqrt %181 : vector<8x128xf32>
    %183 = vector.extract_strided_slice %164 {offsets = [104, 512], sizes = [8, 128], strides = [1, 1]} : vector<176x640xf32> to vector<8x128xf32>
    %184 = math.sqrt %183 : vector<8x128xf32>
    %185 = vector.extract_strided_slice %164 {offsets = [0, 0], sizes = [8, 128], strides = [1, 1]} : vector<176x640xf32> to vector<8x128xf32>
    %186 = vector.extract_strided_slice %176 {offsets = [7, 0], sizes = [1, 128], strides = [1, 1]} : vector<8x128xf32> to vector<1x128xf32>
    %187 = vector.broadcast %186 : vector<1x128xf32> to vector<8x128xf32>
    %188 = arith.mulf %174, %187 : vector<8x128xf32>
    %cst_60 = arith.constant 9.99999993E-9 : f32
    %189 = vector.broadcast %cst_60 : f32 to vector<8x128xf32>
    %190 = arith.maximumf %188, %189 : vector<8x128xf32>
    %191 = tpu.reciprocal %190 {approx = true} : vector<8x128xf32> -> vector<8x128xf32>
    %192 = arith.mulf %185, %191 : vector<8x128xf32>
    %193 = vector.extract_strided_slice %164 {offsets = [8, 0], sizes = [8, 128], strides = [1, 1]} : vector<176x640xf32> to vector<8x128xf32>
    %194 = vector.extract_strided_slice %174 {offsets = [7, 0], sizes = [1, 128], strides = [1, 1]} : vector<8x128xf32> to vector<1x128xf32>
    %195 = vector.broadcast %194 : vector<1x128xf32> to vector<8x128xf32>
    %196 = arith.mulf %176, %195 : vector<8x128xf32>
    %cst_61 = arith.constant 9.99999993E-9 : f32
    %197 = vector.broadcast %cst_61 : f32 to vector<8x128xf32>
    %198 = arith.maximumf %196, %197 : vector<8x128xf32>
    %199 = tpu.reciprocal %198 {approx = true} : vector<8x128xf32> -> vector<8x128xf32>
    %200 = arith.mulf %193, %199 : vector<8x128xf32>
    %201 = vector.extract_strided_slice %164 {offsets = [16, 384], sizes = [8, 128], strides = [1, 1]} : vector<176x640xf32> to vector<8x128xf32>
    %202 = vector.extract_strided_slice %164 {offsets = [112, 384], sizes = [8, 128], strides = [1, 1]} : vector<176x640xf32> to vector<8x128xf32>
    %203 = math.sqrt %202 : vector<8x128xf32>
    %204 = arith.mulf %178, %203 : vector<8x128xf32>
    %cst_62 = arith.constant 9.99999993E-9 : f32
    %205 = vector.broadcast %cst_62 : f32 to vector<8x128xf32>
    %206 = arith.maximumf %204, %205 : vector<8x128xf32>
    %207 = tpu.reciprocal %206 {approx = true} : vector<8x128xf32> -> vector<8x128xf32>
    %208 = arith.mulf %201, %207 : vector<8x128xf32>
    %209 = vector.extract_strided_slice %164 {offsets = [24, 384], sizes = [8, 128], strides = [1, 1]} : vector<176x640xf32> to vector<8x128xf32>
    %210 = vector.extract_strided_slice %164 {offsets = [120, 384], sizes = [8, 128], strides = [1, 1]} : vector<176x640xf32> to vector<8x128xf32>
    %211 = math.sqrt %210 : vector<8x128xf32>
    %212 = arith.mulf %180, %211 : vector<8x128xf32>
    %cst_63 = arith.constant 9.99999993E-9 : f32
    %213 = vector.broadcast %cst_63 : f32 to vector<8x128xf32>
    %214 = arith.maximumf %212, %213 : vector<8x128xf32>
    %215 = tpu.reciprocal %214 {approx = true} : vector<8x128xf32> -> vector<8x128xf32>
    %216 = arith.mulf %209, %215 : vector<8x128xf32>
    %217 = vector.extract_strided_slice %164 {offsets = [32, 512], sizes = [8, 128], strides = [1, 1]} : vector<176x640xf32> to vector<8x128xf32>
    %218 = vector.extract_strided_slice %164 {offsets = [128, 512], sizes = [8, 128], strides = [1, 1]} : vector<176x640xf32> to vector<8x128xf32>
    %219 = math.sqrt %218 : vector<8x128xf32>
    %220 = arith.mulf %182, %219 : vector<8x128xf32>
    %cst_64 = arith.constant 9.99999993E-9 : f32
    %221 = vector.broadcast %cst_64 : f32 to vector<8x128xf32>
    %222 = arith.maximumf %220, %221 : vector<8x128xf32>
    %223 = tpu.reciprocal %222 {approx = true} : vector<8x128xf32> -> vector<8x128xf32>
    %224 = arith.mulf %217, %223 : vector<8x128xf32>
    %225 = vector.extract_strided_slice %164 {offsets = [40, 512], sizes = [8, 128], strides = [1, 1]} : vector<176x640xf32> to vector<8x128xf32>
    %226 = vector.extract_strided_slice %164 {offsets = [136, 512], sizes = [8, 128], strides = [1, 1]} : vector<176x640xf32> to vector<8x128xf32>
    %227 = math.sqrt %226 : vector<8x128xf32>
    %228 = arith.mulf %184, %227 : vector<8x128xf32>
    %cst_65 = arith.constant 9.99999993E-9 : f32
    %229 = vector.broadcast %cst_65 : f32 to vector<8x128xf32>
    %230 = arith.maximumf %228, %229 : vector<8x128xf32>
    %231 = tpu.reciprocal %230 {approx = true} : vector<8x128xf32> -> vector<8x128xf32>
    %232 = arith.mulf %225, %231 : vector<8x128xf32>
    %233 = vector.extract_strided_slice %164 {offsets = [48, 384], sizes = [8, 128], strides = [1, 1]} : vector<176x640xf32> to vector<8x128xf32>
    %234 = vector.extract_strided_slice %164 {offsets = [144, 384], sizes = [8, 128], strides = [1, 1]} : vector<176x640xf32> to vector<8x128xf32>
    %235 = math.sqrt %234 : vector<8x128xf32>
    %236 = arith.mulf %178, %235 : vector<8x128xf32>
    %cst_66 = arith.constant 9.99999993E-9 : f32
    %237 = vector.broadcast %cst_66 : f32 to vector<8x128xf32>
    %238 = arith.maximumf %236, %237 : vector<8x128xf32>
    %239 = tpu.reciprocal %238 {approx = true} : vector<8x128xf32> -> vector<8x128xf32>
    %240 = arith.mulf %233, %239 : vector<8x128xf32>
    %241 = vector.extract_strided_slice %164 {offsets = [56, 384], sizes = [8, 128], strides = [1, 1]} : vector<176x640xf32> to vector<8x128xf32>
    %242 = vector.extract_strided_slice %164 {offsets = [152, 384], sizes = [8, 128], strides = [1, 1]} : vector<176x640xf32> to vector<8x128xf32>
    %243 = math.sqrt %242 : vector<8x128xf32>
    %244 = arith.mulf %180, %243 : vector<8x128xf32>
    %cst_67 = arith.constant 9.99999993E-9 : f32
    %245 = vector.broadcast %cst_67 : f32 to vector<8x128xf32>
    %246 = arith.maximumf %244, %245 : vector<8x128xf32>
    %247 = tpu.reciprocal %246 {approx = true} : vector<8x128xf32> -> vector<8x128xf32>
    %248 = arith.mulf %241, %247 : vector<8x128xf32>
    %249 = vector.extract_strided_slice %164 {offsets = [64, 512], sizes = [8, 128], strides = [1, 1]} : vector<176x640xf32> to vector<8x128xf32>
    %250 = vector.extract_strided_slice %164 {offsets = [160, 512], sizes = [8, 128], strides = [1, 1]} : vector<176x640xf32> to vector<8x128xf32>
    %251 = math.sqrt %250 : vector<8x128xf32>
    %252 = arith.mulf %182, %251 : vector<8x128xf32>
    %cst_68 = arith.constant 9.99999993E-9 : f32
    %253 = vector.broadcast %cst_68 : f32 to vector<8x128xf32>
    %254 = arith.maximumf %252, %253 : vector<8x128xf32>
    %255 = tpu.reciprocal %254 {approx = true} : vector<8x128xf32> -> vector<8x128xf32>
    %256 = arith.mulf %249, %255 : vector<8x128xf32>
    %257 = vector.extract_strided_slice %164 {offsets = [72, 512], sizes = [8, 128], strides = [1, 1]} : vector<176x640xf32> to vector<8x128xf32>
    %258 = vector.extract_strided_slice %164 {offsets = [168, 512], sizes = [8, 128], strides = [1, 1]} : vector<176x640xf32> to vector<8x128xf32>
    %259 = math.sqrt %258 : vector<8x128xf32>
    %260 = arith.mulf %184, %259 : vector<8x128xf32>
    %cst_69 = arith.constant 9.99999993E-9 : f32
    %261 = vector.broadcast %cst_69 : f32 to vector<8x128xf32>
    %262 = arith.maximumf %260, %261 : vector<8x128xf32>
    %263 = tpu.reciprocal %262 {approx = true} : vector<8x128xf32> -> vector<8x128xf32>
    %264 = arith.mulf %257, %263 : vector<8x128xf32>
    %265 = vector.shape_cast %1 : vector<8x32xf32> to vector<8x1x32xf32>
    %266 = vector.shape_cast %5 : vector<8x32xf32> to vector<1x8x32xf32>
    %267 = vector.broadcast %265 : vector<8x1x32xf32> to vector<8x8x32xf32>
    %268 = vector.broadcast %266 : vector<1x8x32xf32> to vector<8x8x32xf32>
    %269 = arith.mulf %267, %268 : vector<8x8x32xf32>
    %270 = vector.shape_cast %269 : vector<8x8x32xf32> to vector<64x32xf32>
    %271 = vector.extract_strided_slice %16 {offsets = [0, 128], sizes = [32, 128], strides = [1, 1]} : vector<32x640xf32> to vector<32x128xf32>
    %cst_70 = arith.constant dense<0.000000e+00> : vector<64x128xf32>
    %272 = tpu.matmul %270, %271, %cst_70 {dimension_numbers = #tpu.dot_dimension_numbers<[1], [0], [0], [1], [0, 0, 1, 1], [], []>} : vector<64x32xf32>, vector<32x128xf32>, vector<64x128xf32> -> vector<64x128xf32>
    %273 = vector.shape_cast %272 : vector<64x128xf32> to vector<8x8x128xf32>
    %274 = vector.shape_cast %166 : vector<8x128xf32> to vector<8x1x128xf32>
    %275 = vector.shape_cast %168 : vector<8x128xf32> to vector<1x8x128xf32>
    %276 = vector.broadcast %274 : vector<8x1x128xf32> to vector<8x8x128xf32>
    %277 = vector.broadcast %275 : vector<1x8x128xf32> to vector<8x8x128xf32>
    %278 = arith.mulf %276, %277 : vector<8x8x128xf32>
    %cst_71 = arith.constant 9.99999993E-9 : f32
    %279 = vector.broadcast %cst_71 : f32 to vector<8x8x128xf32>
    %280 = arith.maximumf %278, %279 : vector<8x8x128xf32>
    %281 = tpu.reciprocal %280 {approx = true} : vector<8x8x128xf32> -> vector<8x8x128xf32>
    %282 = arith.mulf %273, %281 : vector<8x8x128xf32>
    %cst_72 = arith.constant dense<0xFF800000> : vector<8x128xf32>
    %283 = vector.multi_reduction <maximumf>, %282, %cst_72 [1] : vector<8x8x128xf32> to vector<8x128xf32>
    %cst_73 = arith.constant dense<0xFF800000> : vector<8x128xf32>
    %284 = vector.multi_reduction <maximumf>, %282, %cst_73 [0] : vector<8x8x128xf32> to vector<8x128xf32>
    %285 = vector.shape_cast %3 : vector<8x32xf32> to vector<8x1x32xf32>
    %286 = vector.shape_cast %7 : vector<8x32xf32> to vector<1x8x32xf32>
    %287 = vector.broadcast %285 : vector<8x1x32xf32> to vector<8x8x32xf32>
    %288 = vector.broadcast %286 : vector<1x8x32xf32> to vector<8x8x32xf32>
    %289 = arith.mulf %287, %288 : vector<8x8x32xf32>
    %290 = vector.shape_cast %289 : vector<8x8x32xf32> to vector<64x32xf32>
    %291 = vector.extract_strided_slice %16 {offsets = [0, 256], sizes = [32, 128], strides = [1, 1]} : vector<32x640xf32> to vector<32x128xf32>
    %cst_74 = arith.constant dense<0.000000e+00> : vector<64x128xf32>
    %292 = tpu.matmul %290, %291, %cst_74 {dimension_numbers = #tpu.dot_dimension_numbers<[1], [0], [0], [1], [0, 0, 1, 1], [], []>} : vector<64x32xf32>, vector<32x128xf32>, vector<64x128xf32> -> vector<64x128xf32>
    %293 = vector.shape_cast %292 : vector<64x128xf32> to vector<8x8x128xf32>
    %294 = vector.shape_cast %170 : vector<8x128xf32> to vector<8x1x128xf32>
    %295 = vector.shape_cast %172 : vector<8x128xf32> to vector<1x8x128xf32>
    %296 = vector.broadcast %294 : vector<8x1x128xf32> to vector<8x8x128xf32>
    %297 = vector.broadcast %295 : vector<1x8x128xf32> to vector<8x8x128xf32>
    %298 = arith.mulf %296, %297 : vector<8x8x128xf32>
    %cst_75 = arith.constant 9.99999993E-9 : f32
    %299 = vector.broadcast %cst_75 : f32 to vector<8x8x128xf32>
    %300 = arith.maximumf %298, %299 : vector<8x8x128xf32>
    %301 = tpu.reciprocal %300 {approx = true} : vector<8x8x128xf32> -> vector<8x8x128xf32>
    %302 = arith.mulf %293, %301 : vector<8x8x128xf32>
    %cst_76 = arith.constant dense<0xFF800000> : vector<8x128xf32>
    %303 = vector.multi_reduction <maximumf>, %302, %cst_76 [1] : vector<8x8x128xf32> to vector<8x128xf32>
    %cst_77 = arith.constant dense<0xFF800000> : vector<8x128xf32>
    %304 = vector.multi_reduction <maximumf>, %302, %cst_77 [0] : vector<8x8x128xf32> to vector<8x128xf32>
    %305 = vector.shape_cast %192 : vector<8x128xf32> to vector<1x8x128xf32>
    %306 = vector.shape_cast %192 : vector<8x128xf32> to vector<1x8x128xf32>
    %307 = vector.shape_cast %283 : vector<8x128xf32> to vector<1x8x128xf32>
    %308 = vector.shape_cast %303 : vector<8x128xf32> to vector<1x8x128xf32>
    %309 = vector.shape_cast %208 : vector<8x128xf32> to vector<1x8x128xf32>
    %310 = vector.shape_cast %224 : vector<8x128xf32> to vector<1x8x128xf32>
    %311 = vector.shape_cast %240 : vector<8x128xf32> to vector<1x8x128xf32>
    %312 = vector.shape_cast %256 : vector<8x128xf32> to vector<1x8x128xf32>
    %313 = tpu.concatenate %305, %306, %307, %308, %309, %310, %311, %312 in 0 : vector<1x8x128xf32>, vector<1x8x128xf32>, vector<1x8x128xf32>, vector<1x8x128xf32>, vector<1x8x128xf32>, vector<1x8x128xf32>, vector<1x8x128xf32>, vector<1x8x128xf32> -> vector<8x8x128xf32>
    %314 = vector.shape_cast %313 : vector<8x8x128xf32> to vector<1x8x8x128xf32>
    %c0_78 = arith.constant 0 : index
    %c0_79 = arith.constant 0 : index
    %c0_80 = arith.constant 0 : index
    %c0_81 = arith.constant 0 : index
    %315 = vector.load %arg10[%c0_78, %c0_79, %c0_80, %c0_81] : memref<1x8x8x128xf32, #tpu.memory_space<vmem>>, vector<1x8x8x128xf32>
    tpu.vector_store %arg10[%c0_78, %c0_79, %c0_80, %c0_81], %314 {strides = array<i32>} : memref<1x8x8x128xf32, #tpu.memory_space<vmem>>, vector<1x8x8x128xf32>,
    %316 = vector.shape_cast %200 : vector<8x128xf32> to vector<1x8x128xf32>
    %317 = vector.shape_cast %200 : vector<8x128xf32> to vector<1x8x128xf32>
    %318 = vector.shape_cast %284 : vector<8x128xf32> to vector<1x8x128xf32>
    %319 = vector.shape_cast %304 : vector<8x128xf32> to vector<1x8x128xf32>
    %320 = vector.shape_cast %216 : vector<8x128xf32> to vector<1x8x128xf32>
    %321 = vector.shape_cast %232 : vector<8x128xf32> to vector<1x8x128xf32>
    %322 = vector.shape_cast %248 : vector<8x128xf32> to vector<1x8x128xf32>
    %323 = vector.shape_cast %264 : vector<8x128xf32> to vector<1x8x128xf32>
    %324 = tpu.concatenate %316, %317, %318, %319, %320, %321, %322, %323 in 0 : vector<1x8x128xf32>, vector<1x8x128xf32>, vector<1x8x128xf32>, vector<1x8x128xf32>, vector<1x8x128xf32>, vector<1x8x128xf32>, vector<1x8x128xf32>, vector<1x8x128xf32> -> vector<8x8x128xf32>
    %325 = vector.shape_cast %324 : vector<8x8x128xf32> to vector<1x8x8x128xf32>
    %c0_82 = arith.constant 0 : index
    %c0_83 = arith.constant 0 : index
    %c0_84 = arith.constant 0 : index
    %c0_85 = arith.constant 0 : index
    %326 = vector.load %arg11[%c0_82, %c0_83, %c0_84, %c0_85] : memref<1x8x8x128xf32, #tpu.memory_space<vmem>>, vector<1x8x8x128xf32>
    tpu.vector_store %arg11[%c0_82, %c0_83, %c0_84, %c0_85], %325 {strides = array<i32>} : memref<1x8x8x128xf32, #tpu.memory_space<vmem>>, vector<1x8x8x128xf32>,
    return
  }
  func.func @transform_0(%arg0: i32) -> (i32, i32, i32) {
    %c0_i32 = arith.constant 0 : i32
    %c0_i32_0 = arith.constant 0 : i32
    %c0_i32_1 = arith.constant 0 : i32
    return %arg0, %c0_i32, %c0_i32_0 : i32, i32, i32
  }
  func.func @transform_1(%arg0: i32) -> (i32, i32, i32) {
    %c0_i32 = arith.constant 0 : i32
    %c0_i32_0 = arith.constant 0 : i32
    %c0_i32_1 = arith.constant 0 : i32
    return %arg0, %c0_i32, %c0_i32_0 : i32, i32, i32
  }
  func.func @transform_2(%arg0: i32) -> (i32, i32, i32) {
    %c0_i32 = arith.constant 0 : i32
    %c0_i32_0 = arith.constant 0 : i32
    %c0_i32_1 = arith.constant 0 : i32
    return %arg0, %c0_i32, %c0_i32_0 : i32, i32, i32
  }
  func.func @transform_3(%arg0: i32) -> (i32, i32, i32) {
    %c0_i32 = arith.constant 0 : i32
    %c0_i32_0 = arith.constant 0 : i32
    %c0_i32_1 = arith.constant 0 : i32
    return %arg0, %c0_i32, %c0_i32_0 : i32, i32, i32
  }
  func.func @transform_4(%arg0: i32) -> (i32, i32, i32) {
    %c0_i32 = arith.constant 0 : i32
    %c0_i32_0 = arith.constant 0 : i32
    %c0_i32_1 = arith.constant 0 : i32
    %c0_i32_2 = arith.constant 0 : i32
    return %c0_i32, %c0_i32_0, %c0_i32_1 : i32, i32, i32
  }
  func.func @transform_5(%arg0: i32) -> (i32, i32, i32) {
    %c0_i32 = arith.constant 0 : i32
    %c0_i32_0 = arith.constant 0 : i32
    %c0_i32_1 = arith.constant 0 : i32
    %c0_i32_2 = arith.constant 0 : i32
    return %c0_i32, %c0_i32_0, %c0_i32_1 : i32, i32, i32
  }
  func.func @transform_6(%arg0: i32) -> (i32, i32, i32) {
    %c0_i32 = arith.constant 0 : i32
    %c0_i32_0 = arith.constant 0 : i32
    %c0_i32_1 = arith.constant 0 : i32
    %c0_i32_2 = arith.constant 0 : i32
    return %c0_i32, %c0_i32_0, %c0_i32_1 : i32, i32, i32
  }
  func.func @transform_7(%arg0: i32) -> (i32, i32, i32) {
    %c0_i32 = arith.constant 0 : i32
    %c0_i32_0 = arith.constant 0 : i32
    %c0_i32_1 = arith.constant 0 : i32
    %c0_i32_2 = arith.constant 0 : i32
    return %c0_i32, %c0_i32_0, %c0_i32_1 : i32, i32, i32
  }
  func.func @transform_8(%arg0: i32) -> (i32, i32) {
    %c0_i32 = arith.constant 0 : i32
    %c0_i32_0 = arith.constant 0 : i32
    %c0_i32_1 = arith.constant 0 : i32
    return %c0_i32, %c0_i32_0 : i32, i32
  }
  func.func @transform_9(%arg0: i32) -> (i32, i32, i32, i32) {
    %c0_i32 = arith.constant 0 : i32
    %c0_i32_0 = arith.constant 0 : i32
    %c0_i32_1 = arith.constant 0 : i32
    %c0_i32_2 = arith.constant 0 : i32
    return %arg0, %c0_i32, %c0_i32_0, %c0_i32_1 : i32, i32, i32, i32
  }
  func.func @transform_10(%arg0: i32) -> (i32, i32, i32, i32) {
    %c0_i32 = arith.constant 0 : i32
    %c0_i32_0 = arith.constant 0 : i32
    %c0_i32_1 = arith.constant 0 : i32
    %c0_i32_2 = arith.constant 0 : i32
    return %arg0, %c0_i32, %c0_i32_0, %c0_i32_1 : i32, i32, i32, i32
  }
}

module attributes {stable_mosaic.version = 11 : i64} {
  func.func @_head_kernel(%arg0: i32, %arg1: memref<2x128xf32, #tpu.memory_space<vmem>>, %arg2: memref<128x64xf32, #tpu.memory_space<vmem>>, %arg3: memref<1x64xf32, #tpu.memory_space<vmem>>, %arg4: memref<64x128xf32, #tpu.memory_space<vmem>>, %arg5: memref<1x128xf32, #tpu.memory_space<vmem>>, %arg6: memref<2x128xf32, #tpu.memory_space<vmem>>) attributes {dimension_semantics = [#tpu.dimension_semantics<arbitrary>], iteration_bounds = array<i64: 1>, scalar_prefetch = 0 : i64, scratch_operands = 0 : i64, tpu.core_type = #tpu.core_type<tc>, window_params = [{pipeline_mode = #tpu.pipeline_mode<synchronous>, transform_indices = @transform_0, window_bounds = array<i64: 2, 128>}, {pipeline_mode = #tpu.pipeline_mode<synchronous>, transform_indices = @transform_1, window_bounds = array<i64: 128, 64>}, {pipeline_mode = #tpu.pipeline_mode<synchronous>, transform_indices = @transform_2, window_bounds = array<i64: 1, 64>}, {pipeline_mode = #tpu.pipeline_mode<synchronous>, transform_indices = @transform_3, window_bounds = array<i64: 64, 128>}, {pipeline_mode = #tpu.pipeline_mode<synchronous>, transform_indices = @transform_4, window_bounds = array<i64: 1, 128>}, {pipeline_mode = #tpu.pipeline_mode<synchronous>, transform_indices = @transform_5, window_bounds = array<i64: 2, 128>}]} {
    %c0 = arith.constant 0 : index
    %c0_0 = arith.constant 0 : index
    %0 = vector.load %arg1[%c0, %c0_0] : memref<2x128xf32, #tpu.memory_space<vmem>>, vector<2x128xf32>
    %c0_1 = arith.constant 0 : index
    %c0_2 = arith.constant 0 : index
    %1 = vector.load %arg2[%c0_1, %c0_2] : memref<128x64xf32, #tpu.memory_space<vmem>>, vector<128x64xf32>
    %cst = arith.constant dense<0.000000e+00> : vector<2x64xf32>
    %2 = tpu.matmul %0, %1, %cst {dimension_numbers = #tpu.dot_dimension_numbers<[1], [0], [0], [1], [0, 0, 1, 1], [], []>} : vector<2x128xf32>, vector<128x64xf32>, vector<2x64xf32> -> vector<2x64xf32>
    %c0_3 = arith.constant 0 : index
    %c0_4 = arith.constant 0 : index
    %3 = vector.load %arg3[%c0_3, %c0_4] : memref<1x64xf32, #tpu.memory_space<vmem>>, vector<1x64xf32>
    %4 = vector.broadcast %3 : vector<1x64xf32> to vector<2x64xf32>
    %5 = arith.addf %2, %4 : vector<2x64xf32>
    %6 = math.tanh %5 : vector<2x64xf32>
    %c0_5 = arith.constant 0 : index
    %c0_6 = arith.constant 0 : index
    %7 = vector.load %arg4[%c0_5, %c0_6] : memref<64x128xf32, #tpu.memory_space<vmem>>, vector<64x128xf32>
    %cst_7 = arith.constant dense<0.000000e+00> : vector<2x128xf32>
    %8 = tpu.matmul %6, %7, %cst_7 {dimension_numbers = #tpu.dot_dimension_numbers<[1], [0], [0], [1], [0, 0, 1, 1], [], []>} : vector<2x64xf32>, vector<64x128xf32>, vector<2x128xf32> -> vector<2x128xf32>
    %c0_8 = arith.constant 0 : index
    %c0_9 = arith.constant 0 : index
    %9 = vector.load %arg5[%c0_8, %c0_9] : memref<1x128xf32, #tpu.memory_space<vmem>>, vector<1x128xf32>
    %10 = vector.broadcast %9 : vector<1x128xf32> to vector<2x128xf32>
    %11 = arith.addf %8, %10 : vector<2x128xf32>
    %12 = arith.negf %11 : vector<2x128xf32>
    %13 = math.exp %12 : vector<2x128xf32>
    %cst_10 = arith.constant 1.000000e+00 : f32
    %14 = vector.broadcast %cst_10 : f32 to vector<2x128xf32>
    %15 = arith.addf %14, %13 : vector<2x128xf32>
    %16 = arith.divf %14, %15 : vector<2x128xf32>
    %c0_11 = arith.constant 0 : index
    %c0_12 = arith.constant 0 : index
    %17 = vector.load %arg6[%c0_11, %c0_12] : memref<2x128xf32, #tpu.memory_space<vmem>>, vector<2x128xf32>
    tpu.vector_store %arg6[%c0_11, %c0_12], %16 {strides = array<i32>} : memref<2x128xf32, #tpu.memory_space<vmem>>, vector<2x128xf32>,
    return
  }
  func.func @transform_0(%arg0: i32) -> (i32, i32) {
    %c0_i32 = arith.constant 0 : i32
    %c0_i32_0 = arith.constant 0 : i32
    %c0_i32_1 = arith.constant 0 : i32
    return %c0_i32, %c0_i32_0 : i32, i32
  }
  func.func @transform_1(%arg0: i32) -> (i32, i32) {
    %c0_i32 = arith.constant 0 : i32
    %c0_i32_0 = arith.constant 0 : i32
    %c0_i32_1 = arith.constant 0 : i32
    return %c0_i32, %c0_i32_0 : i32, i32
  }
  func.func @transform_2(%arg0: i32) -> (i32, i32) {
    %c0_i32 = arith.constant 0 : i32
    %c0_i32_0 = arith.constant 0 : i32
    %c0_i32_1 = arith.constant 0 : i32
    return %c0_i32, %c0_i32_0 : i32, i32
  }
  func.func @transform_3(%arg0: i32) -> (i32, i32) {
    %c0_i32 = arith.constant 0 : i32
    %c0_i32_0 = arith.constant 0 : i32
    %c0_i32_1 = arith.constant 0 : i32
    return %c0_i32, %c0_i32_0 : i32, i32
  }
  func.func @transform_4(%arg0: i32) -> (i32, i32) {
    %c0_i32 = arith.constant 0 : i32
    %c0_i32_0 = arith.constant 0 : i32
    %c0_i32_1 = arith.constant 0 : i32
    return %c0_i32, %c0_i32_0 : i32, i32
  }
  func.func @transform_5(%arg0: i32) -> (i32, i32) {
    %c0_i32 = arith.constant 0 : i32
    %c0_i32_0 = arith.constant 0 : i32
    %c0_i32_1 = arith.constant 0 : i32
    return %c0_i32, %c0_i32_0 : i32, i32
  }
}

</mosaic_0001>

<bundles_post_ra>
// kernel: integer_pow.1
= control target key start
LH: loop header
LB: loop body
LE: loop exit
PB: predicated region body
PF: predicated region fallthrough
CT: control target
= control target key end

     0   :  { %s716_s0 = inlined_call_operand.vmem [shape: f32[8,20,32], index: 0, kind: input, shape index: {}, may-alias: {0,1}]   ;;  %s717_s1 = inlined_call_operand.vmem [shape: f32[8,20,32], index: 1, kind: input, shape index: {}, may-alias: {0,1}]   ;;  %s718_s2 = inlined_call_operand.vmem [shape: f32[8,20,32], index: 2, kind: output, shape index: {}]  }
   0x1   :  { %v3_v0 = vld [vmem:[%s716_s0] sm:$0xff]  ;;  %v341_v23 = vld [vmem:[%s716_s0 + $0x8] sm:$0xff]  ;;  %v365_v47 = vld [vmem:[%s716_s0 + $0x10] sm:$0xff] }
   0x2   :  { %v4_v1 = vld [vmem:[%s717_s1] sm:$0xff]  ;;  %v342_v24 = vld [vmem:[%s717_s1 + $0x8] sm:$0xff]  ;;  %v366_v49 = vld [vmem:[%s717_s1 + $0x10] sm:$0xff] }
   0x3   :  { %v320_v2 = vld [vmem:[%s716_s0 + $0x20] sm:$0xff]  ;;  %v7_v3 = vmul.f32 %v4_v1, %v3_v0  ;;  %v86_v26 = vmul.f32 %v342_v24, %v341_v23  ;;  %v344_v27 = vld [vmem:[%s716_s0 + $0x28] sm:$0xff]  ;;  %v368_v50 = vld [vmem:[%s716_s0 + $0x30] sm:$0xff]  ;;  %v166_v52 = vmul.f32 %v366_v49, %v365_v47 }
   0x4   :  { %v321_v4 = vld [vmem:[%s717_s1 + $0x20] sm:$0xff]  ;;  %v345_v28 = vld [vmem:[%s717_s1 + $0x28] sm:$0xff]  ;;  %v369_v51 = vld [vmem:[%s717_s1 + $0x30] sm:$0xff] }
   0x5   :  { %v323_v5 = vld [vmem:[%s716_s0 + $0x40] sm:$0xff]  ;;  %v16_v7 = vmul.f32 %v321_v4, %v320_v2  ;;  %9 = vst [vmem:[%s718_s2] sm:$0xff] %v7_v3  ;;  %v347_v29 = vld [vmem:[%s716_s0 + $0x48] sm:$0xff]  ;;  %v96_v30 = vmul.f32 %v345_v28, %v344_v27  ;;  %343 = vst [vmem:[%s718_s2 + $0x8] sm:$0xff] %v86_v26  ;;  %v176_v53 = vmul.f32 %v369_v51, %v368_v50 }
   0x6   :  { %v324_v6 = vld [vmem:[%s717_s1 + $0x40] sm:$0xff]  ;;  %v348_v31 = vld [vmem:[%s717_s1 + $0x48] sm:$0xff]  ;;  %v371_v54 = vld [vmem:[%s716_s0 + $0x50] sm:$0xff]  ;;  %367 = vst [vmem:[%s718_s2 + $0x10] sm:$0xff] %v166_v52 }
   0x7   :  { %v26_v8 = vmul.f32 %v324_v6, %v323_v5  ;;  %v326_v9 = vld [vmem:[%s716_s0 + $0x60] sm:$0xff]  ;;  %322 = vst [vmem:[%s718_s2 + $0x20] sm:$0xff] %v16_v7  ;;  %v350_v32 = vld [vmem:[%s716_s0 + $0x68] sm:$0xff]  ;;  %v106_v34 = vmul.f32 %v348_v31, %v347_v29  ;;  %346 = vst [vmem:[%s718_s2 + $0x28] sm:$0xff] %v96_v30 }
   0x8   :  { %v327_v10 = vld [vmem:[%s717_s1 + $0x60] sm:$0xff]  ;;  %v351_v33 = vld [vmem:[%s717_s1 + $0x68] sm:$0xff]  ;;  %v372_v55 = vld [vmem:[%s717_s1 + $0x50] sm:$0xff]  ;;  %370 = vst [vmem:[%s718_s2 + $0x30] sm:$0xff] %v176_v53 }
   0x9   :  { %v329_v11 = vld [vmem:[%s716_s0 + $0x80] sm:$0xff]  ;;  %v36_v12 = vmul.f32 %v327_v10, %v326_v9  ;;  %325 = vst [vmem:[%s718_s2 + $0x40] sm:$0xff] %v26_v8  ;;  %v116_v35 = vmul.f32 %v351_v33, %v350_v32  ;;  %v353_v36 = vld [vmem:[%s716_s0 + $0x88] sm:$0xff]  ;;  %349 = vst [vmem:[%s718_s2 + $0x48] sm:$0xff] %v106_v34  ;;  %v186_v57 = vmul.f32 %v372_v55, %v371_v54 }
   0xa   :  { %v330_v13 = vld [vmem:[%s717_s1 + $0x80] sm:$0xff]  ;;  %v354_v37 = vld [vmem:[%s717_s1 + $0x88] sm:$0xff]  ;;  %v374_v56 = vld [vmem:[%s716_s0 + $0x70] sm:$0xff] }
   0xb   :  { %v332_v14 = vld [vmem:[%s716_s0 + $0xa0] sm:$0xff]  ;;  %v46_v16 = vmul.f32 %v330_v13, %v329_v11  ;;  %328 = vst [vmem:[%s718_s2 + $0x60] sm:$0xff] %v36_v12  ;;  %v356_v38 = vld [vmem:[%s716_s0 + $0xa8] sm:$0xff]  ;;  %v126_v39 = vmul.f32 %v354_v37, %v353_v36  ;;  %352 = vst [vmem:[%s718_s2 + $0x68] sm:$0xff] %v116_v35 }
   0xc   :  { %v333_v15 = vld [vmem:[%s717_s1 + $0xa0] sm:$0xff]  ;;  %v357_v40 = vld [vmem:[%s717_s1 + $0xa8] sm:$0xff]  ;;  %v375_v58 = vld [vmem:[%s717_s1 + $0x70] sm:$0xff]  ;;  %373 = vst [vmem:[%s718_s2 + $0x50] sm:$0xff] %v186_v57 }
   0xd   :  { %v56_v17 = vmul.f32 %v333_v15, %v332_v14  ;;  %v335_v18 = vld [vmem:[%s716_s0 + $0xc0] sm:$0xff]  ;;  %331 = vst [vmem:[%s718_s2 + $0x80] sm:$0xff] %v46_v16  ;;  %v359_v41 = vld [vmem:[%s716_s0 + $0xc8] sm:$0xff]  ;;  %v136_v43 = vmul.f32 %v357_v40, %v356_v38  ;;  %355 = vst [vmem:[%s718_s2 + $0x88] sm:$0xff] %v126_v39  ;;  %v196_v61 = vmul.f32 %v375_v58, %v374_v56 }
   0xe   :  { %v336_v19 = vld [vmem:[%s717_s1 + $0xc0] sm:$0xff]  ;;  %v360_v42 = vld [vmem:[%s717_s1 + $0xc8] sm:$0xff]  ;;  %v377_v59 = vld [vmem:[%s716_s0 + $0x90] sm:$0xff] }
   0xf   :  { %v338_v20 = vld [vmem:[%s716_s0 + $0xe0] sm:$0xff]  ;;  %v66_v21 = vmul.f32 %v336_v19, %v335_v18  ;;  %334 = vst [vmem:[%s718_s2 + $0xa0] sm:$0xff] %v56_v17  ;;  %v146_v44 = vmul.f32 %v360_v42, %v359_v41  ;;  %v362_v45 = vld [vmem:[%s716_s0 + $0xe8] sm:$0xff]  ;;  %358 = vst [vmem:[%s718_s2 + $0xa8] sm:$0xff] %v136_v43 }
  0x10   :  { %v339_v22 = vld [vmem:[%s717_s1 + $0xe0] sm:$0xff]  ;;  %v363_v46 = vld [vmem:[%s717_s1 + $0xe8] sm:$0xff]  ;;  %v378_v60 = vld [vmem:[%s717_s1 + $0x90] sm:$0xff]  ;;  %376 = vst [vmem:[%s718_s2 + $0x70] sm:$0xff] %v196_v61 }
  0x11   :  { %v76_v25 = vmul.f32 %v339_v22, %v338_v20  ;;  %337 = vst [vmem:[%s718_s2 + $0xc0] sm:$0xff] %v66_v21  ;;  %v156_v48 = vmul.f32 %v363_v46, %v362_v45  ;;  %361 = vst [vmem:[%s718_s2 + $0xc8] sm:$0xff] %v146_v44  ;;  %v206_v62 = vmul.f32 %v378_v60, %v377_v59  ;;  %v380_v63 = vld [vmem:[%s716_s0 + $0xb0] sm:$0xff]  ;;  %v389_v8 = vld [vmem:[%s716_s0 + $0x18] sm:$0xff] }
  0x12   :  { %v381_v0 = vld [vmem:[%s717_s1 + $0xb0] sm:$0xff]  ;;  %v390_v9 = vld [vmem:[%s717_s1 + $0x18] sm:$0xff] }
  0x13   :  { %340 = vst [vmem:[%s718_s2 + $0xe0] sm:$0xff] %v76_v25  ;;  %364 = vst [vmem:[%s718_s2 + $0xe8] sm:$0xff] %v156_v48  ;;  %v383_v1 = vld [vmem:[%s716_s0 + $0xd0] sm:$0xff]  ;;  %v216_v2 = vmul.f32 %v381_v0, %v380_v63  ;;  %v392_v10 = vld [vmem:[%s716_s0 + $0x38] sm:$0xff]  ;;  %v246_v11 = vmul.f32 %v390_v9, %v389_v8 }
  0x14   :  { %v384_v3 = vld [vmem:[%s717_s1 + $0xd0] sm:$0xff]  ;;  %379 = vst [vmem:[%s718_s2 + $0x90] sm:$0xff] %v206_v62  ;;  %v393_v12 = vld [vmem:[%s717_s1 + $0x38] sm:$0xff] }
  0x15   :  { %v386_v4 = vld [vmem:[%s716_s0 + $0xf0] sm:$0xff]  ;;  %v226_v6 = vmul.f32 %v384_v3, %v383_v1  ;;  %382 = vst [vmem:[%s718_s2 + $0xb0] sm:$0xff] %v216_v2  ;;  %v395_v13 = vld [vmem:[%s716_s0 + $0x58] sm:$0xff]  ;;  %v256_v15 = vmul.f32 %v393_v12, %v392_v10  ;;  %391 = vst [vmem:[%s718_s2 + $0x18] sm:$0xff] %v246_v11 }
  0x16   :  { %v387_v5 = vld [vmem:[%s717_s1 + $0xf0] sm:$0xff]  ;;  %v396_v14 = vld [vmem:[%s717_s1 + $0x58] sm:$0xff] }
  0x17   :  { %v236_v7 = vmul.f32 %v387_v5, %v386_v4  ;;  %385 = vst [vmem:[%s718_s2 + $0xd0] sm:$0xff] %v226_v6  ;;  %v266_v16 = vmul.f32 %v396_v14, %v395_v13  ;;  %v398_v17 = vld [vmem:[%s716_s0 + $0x78] sm:$0xff]  ;;  %394 = vst [vmem:[%s718_s2 + $0x38] sm:$0xff] %v256_v15 }
  0x18   :  { %v399_v18 = vld [vmem:[%s717_s1 + $0x78] sm:$0xff] }
  0x19   :  { %388 = vst [vmem:[%s718_s2 + $0xf0] sm:$0xff] %v236_v7  ;;  %v401_v19 = vld [vmem:[%s716_s0 + $0x98] sm:$0xff]  ;;  %v276_v20 = vmul.f32 %v399_v18, %v398_v17  ;;  %397 = vst [vmem:[%s718_s2 + $0x58] sm:$0xff] %v266_v16 }
  0x1a   :  { %v402_v21 = vld [vmem:[%s717_s1 + $0x98] sm:$0xff] }
  0x1b   :  { %v404_v22 = vld [vmem:[%s716_s0 + $0xb8] sm:$0xff]  ;;  %v286_v24 = vmul.f32 %v402_v21, %v401_v19  ;;  %400 = vst [vmem:[%s718_s2 + $0x78] sm:$0xff] %v276_v20 }
  0x1c   :  { %v405_v23 = vld [vmem:[%s717_s1 + $0xb8] sm:$0xff] }
  0x1d   :  { %v296_v25 = vmul.f32 %v405_v23, %v404_v22  ;;  %v407_v26 = vld [vmem:[%s716_s0 + $0xd8] sm:$0xff]  ;;  %403 = vst [vmem:[%s718_s2 + $0x98] sm:$0xff] %v286_v24 }
  0x1e   :  { %v408_v27 = vld [vmem:[%s717_s1 + $0xd8] sm:$0xff] }
  0x1f   :  { %v410_v28 = vld [vmem:[%s716_s0 + $0xf8] sm:$0xff]  ;;  %v306_v29 = vmul.f32 %v408_v27, %v407_v26  ;;  %406 = vst [vmem:[%s718_s2 + $0xb8] sm:$0xff] %v296_v25 }
  0x20   :  { %v411_v30 = vld [vmem:[%s717_s1 + $0xf8] sm:$0xff] }
  0x21   :  { %v316_v31 = vmul.f32 %v411_v30, %v410_v28  ;;  %409 = vst [vmem:[%s718_s2 + $0xd8] sm:$0xff] %v306_v29 }
  0x23   :  { %412 = vst [vmem:[%s718_s2 + $0xf8] sm:$0xff] %v316_v31 }

// kernel: custom-call.15
= control target key start
LH: loop header
LB: loop body
LE: loop exit
PB: predicated region body
PF: predicated region fallthrough
CT: control target
= control target key end

     0   :  { %s6_s0 = inlined_call_operand.vmem [shape: f32[2,32], index: 0, kind: output, shape index: {}]  }

// kernel: bimpm_forward.3
= control target key start
LH: loop header
LB: loop body
LE: loop exit
PB: predicated region body
PF: predicated region fallthrough
CT: control target
= control target key end

     0   :  { %v344_v0 = vmov 0.0|0.0   ;;  %vm345_vm0 = vmmov 0   ;;  %v346_v4 = vmov 0.0   ;;  %vm130_vm1 = vcmask 523264   ;;  %s473_s1 = inlined_call_operand.vmem [shape: f32[128,64], index: 1, kind: input, shape index: {}]   ;;  %s474_s3 = inlined_call_operand.vmem [shape: f32[64,128], index: 3, kind: input, shape index: {}]   ;;  %s475_s0 = inlined_call_operand.vmem [shape: f32[2,128], index: 0, kind: input, shape index: {}]   ;;  %s476_s2 = inlined_call_operand.vmem [shape: f32[1,64], index: 2, kind: input, shape index: {}]   ;;  %s477_s4 = inlined_call_operand.vmem [shape: f32[1,128], index: 4, kind: input, shape index: {}]   ;;  %s478_s5 = inlined_call_operand.vmem [shape: f32[2,128], index: 5, kind: output, shape index: {}]  }
   0x1   :  { %299 = vmatprep.subr.bf16.mxu0 %v344_v0  ;;  %v21_v1 = vld [vmem:[%s473_s1] sm:$0xff]  ;;  %v22_v2 = vld [vmem:[%s473_s1 + $0x8] sm:$0xff]  ;;  %v23_v3 = vld [vmem:[%s473_s1 + $0x10] sm:$0xff]  ;;  %277 = vmatprep.mubr.msk.f32.mxu0 %vm345_vm0, %v346_v4 }
   0x2   :  { %v300_v5 = vpack.c.bf16 %v22_v2, %v21_v1  ;;  %v24_v6 = vld [vmem:[%s473_s1 + $0x18] sm:$0xff]  ;;  %323 = vmatprep.subr.bf16.mxu1 %v344_v0  ;;  %296 = vmatprep.mubr.msk.f32.mxu1 %vm345_vm0, %v346_v4  ;;  %v25_v8 = vld [vmem:[%s473_s1 + $0x20] sm:$0xff]  ;;  %v26_v9 = vld [vmem:[%s473_s1 + $0x28] sm:$0xff] }
   0x3   :  { %v303_v7 = vpack.c.bf16 %v24_v6, %v23_v3  ;;  %v115_v10 = vld [vmem:[%s474_s3] sm:$0xff]  ;;  %v116_v11 = vld [vmem:[%s474_s3 + $0x8] sm:$0xff]  ;;  %v306_v12 = vpack.c.bf16 %v26_v9, %v25_v8  ;;  %v27_v14 = vld [vmem:[%s473_s1 + $0x30] sm:$0xff] }
   0x4   :  { %301 = vmatpush3.bf16.msra.mxu0 %v300_v5  ;;  %v324_v13 = vpack.c.bf16 %v116_v11, %v115_v10  ;;  %v28_v15 = vld [vmem:[%s473_s1 + $0x38] sm:$0xff]  ;;  %v29_v17 = vld [vmem:[%s473_s1 + $0x40] sm:$0xff]  ;;  %v30_v18 = vld [vmem:[%s473_s1 + $0x48] sm:$0xff] }
   0x5   :  { %302 = vmatprep.subr.bf16.mxu0 %v344_v0  ;;  %v309_v16 = vpack.c.bf16 %v28_v15, %v27_v14  ;;  %v312_v19 = vpack.c.bf16 %v30_v18, %v29_v17  ;;  %v31_v20 = vld [vmem:[%s473_s1 + $0x50] sm:$0xff]  ;;  %v32_v21 = vld [vmem:[%s473_s1 + $0x58] sm:$0xff]  ;;  %v33_v23 = vld [vmem:[%s473_s1 + $0x60] sm:$0xff] }
   0x6   :  { %325 = vmatpush3.bf16.msra.mxu1 %v324_v13  ;;  %v315_v22 = vpack.c.bf16 %v32_v21, %v31_v20  ;;  %v34_v24 = vld [vmem:[%s473_s1 + $0x68] sm:$0xff]  ;;  %v35_v26 = vld [vmem:[%s473_s1 + $0x70] sm:$0xff]  ;;  %v36_v27 = vld [vmem:[%s473_s1 + $0x78] sm:$0xff] }
   0x7   :  { %326 = vmatprep.subr.bf16.mxu1 %v344_v0  ;;  %v318_v25 = vpack.c.bf16 %v34_v24, %v33_v23  ;;  %v321_v28 = vpack.c.bf16 %v36_v27, %v35_v26  ;;  %v20_v29 = vld [vmem:[%s475_s0] sm:$0x3]  ;;  %v117_v30 = vld [vmem:[%s474_s3 + $0x10] sm:$0xff]  ;;  %v118_v31 = vld [vmem:[%s474_s3 + $0x18] sm:$0xff] }
   0x8   :  { %304 = vmatpush3.bf16.msra.mxu0 %v303_v7  ;;  %v327_v32 = vpack.c.bf16 %v118_v31, %v117_v30  ;;  %v119_v33 = vld [vmem:[%s474_s3 + $0x20] sm:$0xff]  ;;  %v120_v34 = vld [vmem:[%s474_s3 + $0x28] sm:$0xff]  ;;  %v121_v36 = vld [vmem:[%s474_s3 + $0x30] sm:$0xff] }
   0x9   :  { %305 = vmatprep.subr.bf16.mxu0 %v344_v0  ;;  %v330_v35 = vpack.c.bf16 %v120_v34, %v119_v33  ;;  %v122_v37 = vld [vmem:[%s474_s3 + $0x38] sm:$0xff]  ;;  %v215_v39 = vld [vmem:[%s476_s2] ss:$0 sm:$0xff] }
   0xa   :  { %328 = vmatpush3.bf16.msra.mxu1 %v327_v32  ;;  %v333_v38 = vpack.c.bf16 %v122_v37, %v121_v36  ;;  %v216_v44 = vld [vmem:[%s477_s4] ss:$0 sm:$0xff] }
   0xb   :  { %329 = vmatprep.subr.bf16.mxu1 %v344_v0 }
   0xc   :  { %307 = vmatpush3.bf16.msra.mxu0 %v306_v12 }
   0xd   :  { %308 = vmatprep.subr.bf16.mxu0 %v344_v0 }
   0xe   :  { %331 = vmatpush3.bf16.msra.mxu1 %v330_v35 }
   0xf   :  { %332 = vmatprep.subr.bf16.mxu1 %v344_v0 }
  0x10   :  { %310 = vmatpush3.bf16.msra.mxu0 %v309_v16 }
  0x11   :  { %311 = vmatprep.subr.bf16.mxu0 %v344_v0 }
  0x12   :  { %334 = vmatpush3.bf16.msra.mxu1 %v333_v38 }
  0x14   :  { %313 = vmatpush3.bf16.msra.mxu0 %v312_v19 }
  0x15   :  { %314 = vmatprep.subr.bf16.mxu0 %v344_v0 }
  0x18   :  { %316 = vmatpush3.bf16.msra.mxu0 %v315_v22 }
  0x19   :  { %317 = vmatprep.subr.bf16.mxu0 %v344_v0 }
  0x1c   :  { %319 = vmatpush3.bf16.msra.mxu0 %v318_v25 }
  0x1d   :  { %320 = vmatprep.subr.bf16.mxu0 %v344_v0 }
  0x20   :  { %322 = vmatpush3.bf16.msra.mxu0 %v321_v28 }
  0x23   :  { %278 = vmatmul.mubr.f32.vlgmr.msra.gmra.mrb[0].mxu0 %v20_v29 }
  0xf6   :  { %v110_v40 = vpop.f32.mrb[0].mxu0 }
  0xf7   :  { %v111_v41 = vadd.f32 %v215_v39, %v110_v40  ;;  %v279_v42 = vpop.f32.mrb[1].mxu0 }
  0xf9   :  { %338 = vtanh.f32 %v111_v41 }
 0x103   :  { %v339_v43 = vpop.eup %338 }
 0x104   :  { %297 = vmatmul.mubr.msk.f32.vlgmr.msra.gmra.mrb[0].mxu1 %vm130_vm1, %v339_v43 }
 0x1d7   :  { %v200_v45 = vpop.f32.mrb[0].mxu1 }
 0x1d8   :  { %v201_v46 = vadd.f32 %v216_v44, %v200_v45  ;;  %v298_v47 = vpop.f32.mrb[1].mxu1 }
 0x1da   :  { %v218_v48 = vmul.f32 -1.442695, %v201_v46 }
 0x1dc   :  { %340 = vpow2.f32 %v218_v48 }
 0x1e6   :  { %v341_v49 = vpop.eup %340 }
 0x1e7   :  { %v207_v50 = vadd.f32 1.0, %v341_v49 }
 0x1e9   :  { %342 = vrcp.f32 %v207_v50 }
 0x1f3   :  { %v343_v51 = vpop.eup %342 }
 0x1f4   :  { %210 = vst [vmem:[%s478_s5] sm:$0x3] %v343_v51 }

// kernel: bimpm_forward.2
= control target key start
LH: loop header
LB: loop body
LE: loop exit
PB: predicated region body
PF: predicated region fallthrough
CT: control target
= control target key end

     0   :  { %s3775_s13 = smov 0   ;;  %s4817_s0 = inlined_call_operand.vmem [shape: f32[2,8,32], index: 0, kind: input, shape index: {}, may-alias: {0,4}]   ;;  %s4818_s1 = inlined_call_operand.vmem [shape: f32[2,8,32], index: 1, kind: input, shape index: {}, may-alias: {1,5}]   ;;  %s4819_s2 = inlined_call_operand.vmem [shape: f32[2,8,32], index: 2, kind: input, shape index: {}, may-alias: {2,6}]   ;;  %s4820_s3 = inlined_call_operand.vmem [shape: f32[2,8,32], index: 3, kind: input, shape index: {}, may-alias: {3,7}]   ;;  %s4821_s4 = inlined_call_operand.vmem [shape: f32[2,8,32], index: 4, kind: input, shape index: {}, may-alias: {0,4}]   ;;  %s4822_s5 = inlined_call_operand.vmem [shape: f32[2,8,32], index: 5, kind: input, shape index: {}, may-alias: {1,5}]   ;;  %s4823_s6 = inlined_call_operand.vmem [shape: f32[2,8,32], index: 6, kind: input, shape index: {}, may-alias: {2,6}]   ;;  %s4824_s7 = inlined_call_operand.vmem [shape: f32[2,8,32], index: 7, kind: input, shape index: {}, may-alias: {3,7}]   ;;  %s4825_s8 = inlined_call_operand.vmem [shape: f32[32,640], index: 8, kind: input, shape index: {}]   ;;  %s4826_s9 = inlined_call_operand.vmem [shape: f32[2,8,8,128], index: 9, kind: output, shape index: {0}]   ;;  %s4827_s10 = inlined_call_operand.vmem [shape: f32[2,8,8,128], index: 10, kind: output, shape index: {1}]  }
   0x1 LB: > { %s3231_s14 = sadd.s32 4294967295, %s3715_s13   ;;  %p3235_p0 = scmp.ge.s32.totalorder %s3715_s13, 1  ;;  %s3715_s13 = sphi %s3775_s13, %s21_s13  }
   0x2   : > { %p341_p1 = scmp.lt.s32.totalorder %s3715_s13, 3 }
   0x4   : > { %p342_p2 = pnand %p3235_p0, %p341_p1 }
   0x5   : > { %p395_p3 = scmp.lt.s32.totalorder (!%p342_p2), %s3231_s14, 1  ;;  %v3717_v0 = vmov (!%p342_p2), 0.0   ;;  %vm3718_vm0 = vmmov (!%p342_p2), 0   ;;  %vm449_vm1 = vcmask (!%p342_p2), 261120   ;;  %v580_v31 = vlaneseq (!%p342_p2) }
   0x6   : > { %345 = sbr.rel (%p342_p2) target bundleno = 1458 (0x5b2), region = 56  ;;  %3416 = vmatprep.subr.mxu1 (!%p342_p2), %v3717_v0  ;;  %3418 = vmatprep.mubr.msk.f32.mxu1 (!%p342_p2), %vm3718_vm0, %v3717_v0  ;;  %vm790_vm10 = vcmask (!%p342_p2), 64512  }
   0x7   : > { %3426 = vmatprep.subr.mxu0 (!%p342_p2), %v3717_v0  ;;  %3428 = vmatprep.mubr.msk.f32.mxu0 (!%p342_p2), %vm3718_vm0, %v3717_v0  ;;  %v3857_v33 = vshrl.u32 (!%p342_p2), %v580_v31, 7  ;;  %v3902_v62 = vand.u32 (!%p342_p2), 127, %v580_v31 }
   0x9   : > { %v3860_v36 = vsub.s32 (!%p342_p2), 0, %v3857_v33 }
   0xd   : > { %s4829_s14 = smov (!%p395_p3, %s3231_s14), 1 }
   0xe   : > { %s3236_s15 = sshll.u32 %s4829_s14, 3 }
   0xf   : > { %s406_s18 = scalar_lea.vmem %s4819_s2, %s3236_s15  ;;  %s3798_s21 = scalar_lea.vmem %s4820_s3, %s3236_s15 }
  0x10   : > { %v3800_v1 = vld [vmem:[%s406_s18] sm:$0xff]  ;;  %s398_s24 = scalar_lea.vmem %s4817_s0, %s3236_s15  ;;  %s402_s27 = scalar_lea.vmem %s4818_s1, %s3236_s15 }
  0x11   : > { %v3803_v2 = vld [vmem:[%s3798_s21] sm:$0xff]  ;;  %v3813_v3 = vmul.f32 %v3800_v1, %v3800_v1  ;;  %3417 = vmatpush3.xpose.msk.msra.mxu1 %vm449_vm1, %v3800_v1  ;;  %3427 = vmatpush3.msra.mxu0 %v3800_v1 }
  0x12   : > { %v3817_v4 = vmul.f32 %v3803_v2, %v3803_v2  ;;  %v3821_v5 = vld [vmem:[%s398_s24] sm:$0xff]  ;;  %3421 = vmatprep.subr.mxu1 %v3717_v0  ;;  %3436 = vmatprep.subr.mxu0 %v3717_v0 }
  0x13   : > { %v3825_v6 = vld [vmem:[%s402_s27] sm:$0xff]  ;;  %v3829_v7 = vmul.f32 %v3821_v5, %v3821_v5  ;;  %v538_v8 = vsel %vm449_vm1, %v3813_v3, 0.0 }
  0x14   : > { %v3836_v9 = vmul.f32 %v3825_v6, %v3825_v6  ;;  %539 = vadd.xlane.f32.xlu0 %v538_v8  ;;  %3419 = vmatmul.mubr.msk.f32.vlgmr.msra.gmra.mrb[0].mxu1 %vm449_vm1, %v3821_v5  ;;  %v676_v11 = vsel %vm449_vm1, %v3817_v4, 0.0 }
  0x15   : > { %v527_v10 = vsel %vm449_vm1, %v3829_v7, 0.0  ;;  %3422 = vmatpush3.xpose.msk.msra.mxu1 %vm449_vm1, %v3803_v2  ;;  %3423 = vmatprep.mubr.msk.f32.mxu1 %vm3718_vm0, %v3717_v0 }
  0x16   : > { %528 = vadd.xlane.f32.xlu1 %v527_v10  ;;  %3431 = vmatprep.subr.mxu1 %v3717_v0  ;;  %v665_v12 = vsel %vm449_vm1, %v3836_v9, 0.0 }
  0x18   : > { %677 = vadd.xlane.f32.xlu0 %v676_v11  ;;  %3424 = vmatmul.mubr.msk.f32.vlgmr.msra.gmra.mrb[2].mxu1 %vm449_vm1, %v3825_v6 }
  0x19   : > { %3432 = vmatpush3.msra.mxu1 %v3821_v5  ;;  %3433 = vmatprep.mubr.msk.f32.mxu1 %vm3718_vm0, %v3717_v0 }
  0x1a   : > { %666 = vadd.xlane.f32.xlu1 %v665_v12  ;;  %3441 = vmatprep.subr.mxu1 %v3717_v0 }
  0xa1   : > { %v540_v13 = vpop.xlane.xlu0 %539 }
  0xa2   : > { %3600 = vrsqrt.f32 %v540_v13  ;;  %vm543_vm2 = vcmp.eq.f32.partialorder %v540_v13, inf  ;;  %v546_v17 = vand.u32 2147483648, %v540_v13  ;;  %vm545_vm3 = vcmp.eq.f32.partialorder %v540_v13, 0.0 }
  0xa3   : > { %v529_v29 = vpop.xlane.xlu1 %528 }
  0xa4   : > { %vm532_vm6 = vcmp.eq.f32.partialorder %v529_v29, inf  ;;  %v535_v37 = vand.u32 2147483648, %v529_v29  ;;  %vm534_vm7 = vcmp.eq.f32.partialorder %v529_v29, 0.0 }
  0xa5   : > { %v678_v14 = vpop.xlane.xlu0 %677 }
  0xa6   : > { %3602 = vrsqrt.f32 %v678_v14  ;;  %vm681_vm4 = vcmp.eq.f32.partialorder %v678_v14, inf  ;;  %v684_v22 = vand.u32 2147483648, %v678_v14  ;;  %vm683_vm5 = vcmp.eq.f32.partialorder %v678_v14, 0.0 }
  0xa7   : > { %3604 = vrsqrt.f32 %v529_v29  ;;  %v667_v30 = vpop.xlane.xlu1 %666 }
  0xa8   : > { %3606 = vrsqrt.f32 %v667_v30  ;;  %vm670_vm8 = vcmp.eq.f32.partialorder %v667_v30, inf  ;;  %v673_v43 = vand.u32 2147483648, %v667_v30  ;;  %vm672_vm9 = vcmp.eq.f32.partialorder %v667_v30, 0.0 }
  0xac   : > { %v3601_v15 = vpop.eup %3600 }
  0xad   : > { %v542_v16 = vmul.f32 %v3601_v15, %v540_v13 }
  0xaf   : > { %v544_v18 = vsel %vm543_vm2, %v540_v13, %v542_v16 }
  0xb0   : > { %v3603_v19 = vpop.eup %3602  ;;  %v547_v20 = vsel %vm545_vm3, %v546_v17, %v544_v18 }
  0xb1   : > { %548 = vxpose.xlu0.b32.start.end [1/1] (short) (narrow) %v547_v20, 8  ;;  %v680_v21 = vmul.f32 %v3603_v19, %v678_v14  ;;  %v3605_v32 = vpop.eup %3604 }
  0xb2   : > { %v531_v34 = vmul.f32 %v3605_v32, %v529_v29  ;;  %v3607_v35 = vpop.eup %3606 }
  0xb3   : > { %v682_v23 = vsel %vm681_vm4, %v678_v14, %v680_v21  ;;  %v669_v39 = vmul.f32 %v3607_v35, %v667_v30 }
  0xb4   : > { %v685_v24 = vsel %vm683_vm5, %v684_v22, %v682_v23  ;;  %v533_v38 = vsel %vm532_vm6, %v529_v29, %v531_v34 }
  0xb5   : > { %686 = vxpose.xlu1.b32.start.end [1/1] (short) (narrow) %v685_v24, 8  ;;  %v536_v42 = vsel %vm534_vm7, %v535_v37, %v533_v38  ;;  %v671_v45 = vsel %vm670_vm8, %v667_v30, %v669_v39 }
  0xb6   : > { %v674_v49 = vsel %vm672_vm9, %v673_v43, %v671_v45 }
  0xe7   : > { %v522_v25 = vpop.f32.mrb[0].mxu1 }
  0xe8   : > { %v3420_v26 = vpop.f32.mrb[1].mxu1 }
  0xeb   : > { %v660_v27 = vpop.f32.mrb[2].mxu1 }
  0xec   : > { %v3425_v28 = vpop.f32.mrb[3].mxu1 }
 0x131   : > { %v564_v40 = vpop.trf.xlu0 }
 0x132   : > { %v583_v41 = vrot.slane %v564_v40, %v3860_v36 }
 0x134   : > { %v584_v44 = vmul.f32 %v583_v41, %v536_v42 }
 0x135   : > { %v702_v46 = vpop.trf.xlu1 }
 0x136   : > { %v585_v47 = vmax.f32 %v584_v44, 1e-08  ;;  %v721_v48 = vrot.slane %v702_v46, %v3860_v36  ;;  %v427_v44 = vld [vmem:[%s4823_s6] sm:$0xff] }
 0x138   : > { %3608 = vrcp.f32 %v585_v47  ;;  %v722_v50 = vmul.f32 %v721_v48, %v674_v49 }
 0x13a   : > { %v723_v51 = vmax.f32 %v722_v50, 1e-08 }
 0x13c   : > { %3610 = vrcp.f32 %v723_v51 }
 0x142   : > { %v3609_v52 = vpop.eup %3608 }
 0x143   : > { %v3864_v53 = vmul.f32 %v3609_v52, %v522_v25 }
 0x145   : > { %726 = vxpose.xlu0.b32.start.end [1/1] (short) (narrow) %v3864_v53, 8  ;;  %3429 = vmatmul.mubr.msk.f32.vlgmr.msra.gmra.mrb[0].mxu0 %vm790_vm10, %v3864_v53  ;;  %v1109_v54 = vsel %vm790_vm10, %v3864_v53, -inf  ;;  %v791_v42 = vsel %vm790_vm10, %v3864_v53, 0.0 }
 0x146   : > { %v3611_v55 = vpop.eup %3610  ;;  %1110 = vmax.xlane.f32.xlu1 %v1109_v54  ;;  %3437 = vmatpush3.msra.mxu0 %v3803_v2 }
 0x147   : > { %v3872_v56 = vmul.f32 %v3611_v55, %v660_v27  ;;  %3438 = vmatprep.mubr.msk.f32.mxu0 %vm3718_vm0, %v3717_v0  ;;  %3446 = vmatprep.subr.mxu0 %v3717_v0 }
 0x149   : > { %758 = vxpose.xlu0.b32.start.end [1/1] (short) (narrow) %v3872_v56, 8  ;;  %3439 = vmatmul.mubr.msk.f32.vlgmr.msra.gmra.mrb[2].mxu0 %vm790_vm10, %v3872_v56  ;;  %v1301_v57 = vsel %vm790_vm10, %v3872_v56, -inf  ;;  %v949_v43 = vsel %vm790_vm10, %v3872_v56, 0.0 }
 0x14a   : > { %1302 = vmax.xlane.f32.xlu1 %v1301_v57  ;;  %3448 = vmatprep.mubr.msk.f32.mxu0 %vm3718_vm0, %v3717_v0 }
 0x14b   : > { %3447 = vmatpush3.msra.mxu0 %v427_v44 }
 0x14c   : > { %3456 = vmatprep.subr.mxu0 %v3717_v0 }
 0x1c5   : > { %v3884_v58 = vpop.trf.xlu0 }
 0x1c6   : > { %3434 = vmatmul.mubr.msk.f32.vlgmr.msra.gmra.mrb[4].mxu1 %vm790_vm10, %v3884_v58  ;;  %v1205_v59 = vsel %vm790_vm10, %v3884_v58, -inf  ;;  %v870_v57 = vsel %vm790_vm10, %v3884_v58, 0.0 }
 0x1c7   : > { %1206 = vmax.xlane.f32.xlu0 %v1205_v59  ;;  %3442 = vmatpush3.msra.mxu1 %v3825_v6 }
 0x1c8   : > { %3443 = vmatprep.mubr.msk.f32.mxu1 %vm3718_vm0, %v3717_v0  ;;  %3451 = vmatprep.subr.mxu1 %v3717_v0 }
 0x1c9   : > { %v3894_v60 = vpop.trf.xlu0 }
 0x1ca   : > { %v1397_v61 = vsel %vm790_vm10, %v3894_v60, -inf  ;;  %3444 = vmatmul.mubr.msk.f32.vlgmr.msra.gmra.mrb[6].mxu1 %vm790_vm10, %v3894_v60 }
 0x1cb   : > { %1398 = vmax.xlane.f32.xlu1 %v1397_v61  ;;  %3453 = vmatprep.mubr.msk.f32.mxu1 %vm3718_vm0, %v3717_v0  ;;  %v1028_v61 = vsel %vm790_vm10, %v3894_v60, 0.0 }
 0x1d3   : > { %v1111_v63 = vpop.xlane.xlu1 %1110 }
 0x1d4   : > { %vm1112_vm11 = vcmp.eq.f32.partialorder %v3864_v53, %v1111_v63 }
 0x1d5   : > { %v1113_v8 = vsel %vm1112_vm11, %v3902_v62, 8 }
 0x1d6   : > { %v1114_v10 = vsel %vm790_vm10, %v1113_v8, 2147483647 }
 0x1d7   : > { %v1303_v11 = vpop.xlane.xlu1 %1302  ;;  %v1116_v12 = vshra.s32 %v1114_v10, 16  ;;  %v1115_v32 = vand.u32 65535, %v1114_v10 }
 0x1d8   : > { %vm1304_vm12 = vcmp.eq.f32.partialorder %v3872_v56, %v1303_v11 }
 0x1d9   : > { %v1305_v13 = vsel %vm1304_vm12, %v3902_v62, 8  ;;  %v1118_v14 = vcvt.s32.f32 %v1116_v12  ;;  %v1117_v35 = vcvt.s32.f32 %v1115_v32  ;;  %v430_v12 = vld [vmem:[%s4825_s8 + $0x8] sm:$0xff]  ;;  %v439_v32 = vld [vmem:[%s4825_s8 + $0x50] sm:$0xff] }
 0x1da   : > { %v1306_v15 = vsel %vm790_vm10, %v1305_v13, 2147483647  ;;  %v435_v13 = vld [vmem:[%s4825_s8 + $0x30] sm:$0xff] }
 0x1db   : > { %1119 = vmin.xlane.f32.xlu0 %v1118_v14  ;;  %v1308_v16 = vshra.s32 %v1306_v15, 16  ;;  %v1307_v37 = vand.u32 65535, %v1306_v15 }
 0x1dd   : > { %v1310_v17 = vcvt.s32.f32 %v1308_v16  ;;  %v1309_v40 = vcvt.s32.f32 %v1307_v37 }
 0x1df   : > { %1311 = vmin.xlane.f32.xlu0 %v1310_v17 }
 0x218   : > { %v3910_v18 = vpop.f32.mrb[0].mxu0 }
 0x219   : > { %v3430_v19 = vpop.f32.mrb[1].mxu0 }
 0x21a   : > { %v429_v19 = vld [vmem:[%s4825_s8] sm:$0xff] }
 0x21c   : > { %v3912_v20 = vpop.f32.mrb[2].mxu0 }
 0x21d   : > { %v3440_v21 = vpop.f32.mrb[3].mxu0 }
 0x21e   : > { %v434_v21 = vld [vmem:[%s4825_s8 + $0x28] sm:$0xff] }
 0x254   : > { %v1207_v22 = vpop.xlane.xlu0 %1206 }
 0x255   : > { %vm1208_vm13 = vcmp.eq.f32.partialorder %v3884_v58, %v1207_v22 }
 0x256   : > { %v1209_v23 = vsel %vm1208_vm13, %v3902_v62, 8 }
 0x257   : > { %v1210_v24 = vsel %vm790_vm10, %v1209_v23, 2147483647  ;;  %v440_v23 = vld [vmem:[%s4825_s8 + $0x58] sm:$0xff] }
 0x258   : > { %v1399_v25 = vpop.xlane.xlu1 %1398  ;;  %v1212_v26 = vshra.s32 %v1210_v24, 16  ;;  %v1211_v49 = vand.u32 65535, %v1210_v24  ;;  %v445_v24 = vld [vmem:[%s4825_s8 + $0x80] sm:$0xff] }
 0x259   : > { %vm1400_vm14 = vcmp.eq.f32.partialorder %v3894_v60, %v1399_v25  ;;  %v428_v60 = vld [vmem:[%s4824_s7] sm:$0xff] }
 0x25a   : > { %v1401_v27 = vsel %vm1400_vm14, %v3902_v62, 8  ;;  %v1214_v28 = vcvt.s32.f32 %v1212_v26  ;;  %v1213_v51 = vcvt.s32.f32 %v1211_v49  ;;  %v3969_v26 = vsub.s32 7, %v3857_v33 }
 0x25b   : > { %v1402_v29 = vsel %vm790_vm10, %v1401_v27, 2147483647  ;;  %v425_v27 = vld [vmem:[%s4821_s4] sm:$0xff] }
 0x25c   : > { %1215 = vmin.xlane.f32.xlu1 %v1214_v28  ;;  %v1404_v30 = vshra.s32 %v1402_v29, 16  ;;  %v1403_v52 = vand.u32 65535, %v1402_v29  ;;  %v3549_v29 = vpack.c.bf16 %v434_v21, %v429_v19  ;;  %3452 = vmatpush3.msra.mxu1 %v425_v27  ;;  %v1496_v37 = vrot.slane %v3803_v2, %v3969_v26 }
 0x25d   : > { %3461 = vmatprep.subr.mxu1 %v3717_v0 }
 0x25e   : > { %v1406_v31 = vcvt.s32.f32 %v1404_v30  ;;  %v1405_v55 = vcvt.s32.f32 %v1403_v52 }
 0x260   : > { %1407 = vmin.xlane.f32.xlu1 %v1406_v31 }
 0x268   : > { %v1120_v34 = vpop.xlane.xlu0 %1119 }
 0x269   : > { %vm1121_vm15 = vcmp.eq.f32.partialorder %v1118_v14, %v1120_v34  ;;  %v1126_v59 = vcvt.f32.s32 %v1120_v34  ;;  %v444_v34 = vld [vmem:[%s4825_s8 + $0x78] sm:$0xff] }
 0x26a   : > { %v1122_v38 = vsel %vm1121_vm15, %v1117_v35, inf }
 0x26b   : > { %1123 = vmin.xlane.f32.xlu0 %v1122_v38  ;;  %v1127_v8 = vshll.u32 %v1126_v59, 16  ;;  %v3553_v38 = vpack.c.bf16 %v444_v34, %v439_v32 }
 0x26c   : > { %v1312_v39 = vpop.xlane.xlu0 %1311 }
 0x26d   : > { %vm1313_vm2 = vcmp.eq.f32.partialorder %v1310_v17, %v1312_v39  ;;  %v1318_v10 = vcvt.f32.s32 %v1312_v39  ;;  %v3952_v17 = vpack.c.bf16 %v435_v13, %v430_v12  ;;  %v3994_v39 = vmul.f32 %v1496_v37, %v3825_v6  ;;  %v436_v12 = vld [vmem:[%s4825_s8 + $0x38] sm:$0xff] }
 0x26e   : > { %v1314_v41 = vsel %vm1313_vm2, %v1309_v40, inf  ;;  %v1501_v40 = vrot.slane %v3825_v6, %v3969_v26 }
 0x26f   : > { %1315 = vmin.xlane.f32.xlu0 %v1314_v41  ;;  %v1319_v15 = vshll.u32 %v1318_v10, 16 }
 0x270   : > { %v4001_v41 = vmul.f32 %v1501_v40, %v3803_v2 }
 0x273   : > { %792 = vadd.xlane.f32.xlu0 %v791_v42 }
 0x277   : > { %950 = vadd.xlane.f32.xlu0 %v949_v43 }
 0x299   : > { %v3928_v45 = vpop.f32.mrb[4].mxu1 }
 0x29a   : > { %v3435_v46 = vpop.f32.mrb[5].mxu1 }
 0x29b   : > { %v433_v46 = vld [vmem:[%s4825_s8 + $0x20] sm:$0xff] }
 0x29d   : > { %v3930_v47 = vpop.f32.mrb[6].mxu1 }
 0x29e   : > { %v3445_v48 = vpop.f32.mrb[7].mxu1 }
 0x2e9   : > { %v3932_v50 = vpop.xlane.xlu1 %1215 }
 0x2ea   : > { %vm1217_vm3 = vcmp.eq.f32.partialorder %v1214_v28, %v3932_v50  ;;  %v1222_v49 = vcvt.f32.s32 %v3932_v50 }
 0x2eb   : > { %v1218_v53 = vsel %vm1217_vm3, %v1213_v51, inf }
 0x2ec   : > { %1219 = vmin.xlane.f32.xlu1 %v1218_v53  ;;  %v1223_v52 = vshll.u32 %v1222_v49, 16 }
 0x2ed   : > { %v3935_v54 = vpop.xlane.xlu1 %1407 }
 0x2ee   : > { %vm1409_vm4 = vcmp.eq.f32.partialorder %v1406_v31, %v3935_v54  ;;  %v3978_v31 = vpack.c.bf16 %v445_v24, %v440_v23  ;;  %v1414_v53 = vcvt.f32.s32 %v3935_v54  ;;  %v426_v54 = vld [vmem:[%s4822_s5] sm:$0xff]  ;;  %v446_v24 = vld [vmem:[%s4825_s8 + $0x88] sm:$0xff] }
 0x2ef   : > { %v1410_v56 = vsel %vm1409_vm4, %v1405_v55, inf  ;;  %v441_v23 = vld [vmem:[%s4825_s8 + $0x60] sm:$0xff] }
 0x2f0   : > { %1411 = vmin.xlane.f32.xlu1 %v1410_v56  ;;  %v432_v56 = vld [vmem:[%s4825_s8 + $0x18] sm:$0xff]  ;;  %v4063_v27 = vpack.c.bf16 %v446_v24, %v441_v23 }
 0x2f4   : > { %871 = vadd.xlane.f32.xlu1 %v870_v57  ;;  %v437_v57 = vld [vmem:[%s4825_s8 + $0x40] sm:$0xff] }
 0x2f5   : > { %v3555_v10 = vpack.c.bf16 %v437_v57, %v432_v56 }
 0x2f8   : > { %v1124_v63 = vpop.xlane.xlu0 %1123  ;;  %1029 = vadd.xlane.f32.xlu1 %v1028_v61 }
 0x2f9   : > { %v1125_v11 = vcvt.f32.s32 %v1124_v63 }
 0x2fb   : > { %v1128_v14 = vadd.s32 %v1127_v8, %v1125_v11  ;;  %v1415_v8 = vshll.u32 %v1414_v53, 16  ;;  %v431_v11 = vld [vmem:[%s4825_s8 + $0x10] sm:$0xff] }
 0x2fc   : > { %v1316_v58 = vpop.xlane.xlu0 %1315  ;;  %v4051_v19 = vpack.c.bf16 %v436_v12, %v431_v11 }
 0x2fd   : > { %vm1129_vm5 = vcmp.eq.s32.totalorder %v3902_v62, %v1128_v14  ;;  %v1317_v16 = vcvt.f32.s32 %v1316_v58  ;;  %v442_v58 = vld [vmem:[%s4825_s8 + $0x68] sm:$0xff] }
 0x2fe   : > { %v3252_v22 = vsel %vm1129_vm5, 1.0, %v3717_v0 }
 0x2ff   : > { %v1320_v25 = vadd.s32 %v1319_v15, %v1317_v16  ;;  %3449 = vmatmul.mubr.msk.f32.vlgmr.msra.gmra.mrb[4].mxu0 %vm790_vm10, %v3252_v22  ;;  %v447_v15 = vld [vmem:[%s4825_s8 + $0x90] sm:$0xff] }
 0x300   : > { %v793_v28 = vpop.xlane.xlu0 %792  ;;  %3457 = vmatpush3.msra.mxu0 %v428_v60  ;;  %3458 = vmatprep.mubr.msk.f32.mxu0 %vm3718_vm0, %v3717_v0  ;;  %v3559_v22 = vpack.c.bf16 %v447_v15, %v442_v58 }
 0x301   : > { %vm1321_vm6 = vcmp.eq.s32.totalorder %v3902_v62, %v1320_v25  ;;  %v794_v30 = vadd.f32 1e-08, %v793_v28  ;;  %3548 = vmatprep.subr.bf16.mxu0 %v3952_v17 }
 0x302   : > { %v3256_v35 = vsel %vm1321_vm6, 1.0, %v3717_v0 }
 0x303   : > { %3612 = vrcp.f32 %v794_v30  ;;  %3459 = vmatmul.mubr.msk.f32.vlgmr.msra.gmra.mrb[6].mxu0 %vm790_vm10, %v3256_v35 }
 0x304   : > { %3550 = vmatpush1.bf16.msra.mxu0 %v3549_v29  ;;  %1649 = vmatprep.mubr.f32.mxu0 %v3717_v0  ;;  %v951_v59 = vpop.xlane.xlu0 %950 }
 0x305   : > { %3552 = vmatprep.subr.bf16.mxu0 %v3978_v31  ;;  %v952_v13 = vadd.f32 1e-08, %v951_v59 }
 0x307   : > { %3614 = vrcp.f32 %v952_v13 }
 0x308   : > { %3554 = vmatpush1.bf16.msra.mxu0 %v3553_v38 }
 0x30b   : > { %3260 = vmatmul.mubr.msk.f32.vlgmr.msra.gmra.mrb[8].mxu0 %vm449_vm1, %v3994_v39 }
 0x30c   : > { %1654 = vmatprep.mubr.f32.mxu0 %v3717_v0 }
 0x30d   : > { %v3613_v42 = vpop.eup %3612 }
 0x30e   : > { %v4005_v43 = vmul.f32 %v3613_v42, %v3910_v18  ;;  %v438_v18 = vld [vmem:[%s4825_s8 + $0x48] sm:$0xff] }
 0x30f   : > { %3261 = vmatmul.mubr.msk.f32.gmra.mrb[10].mxu0 %vm449_vm1, %v4001_v41  ;;  %v3563_v48 = vpack.c.bf16 %v438_v18, %v433_v46 }
 0x310   : > { %1659 = vmatprep.mubr.f32.mxu0 %v3717_v0  ;;  %v4012_v44 = vmul.f32 %v4005_v43, %v3821_v5 }
 0x311   : > { %3564 = vmatprep.subr.bf16.mxu0 %v3563_v48  ;;  %v3615_v29 = vpop.eup %3614 }
 0x312   : > { %3566 = vmatpush3.bf16.msra.mxu0 %v3563_v48  ;;  %v4084_v35 = vmul.f32 %v3615_v29, %v3912_v20  ;;  %v4208_v29 = vmul.f32 %v4005_v43, %v4005_v43 }
 0x313   : > { %3262 = vmatmul.mubr.msk.f32.gmra.mrb[12].mxu0 %vm449_vm1, %v4012_v44 }
 0x314   : > { %1663 = vmatprep.mubr.f32.mxu0 %v3717_v0 }
 0x379   : > { %v1220_v51 = vpop.xlane.xlu1 %1219 }
 0x37a   : > { %v1221_v55 = vcvt.f32.s32 %v1220_v51  ;;  %v443_v51 = vld [vmem:[%s4825_s8 + $0x70] sm:$0xff] }
 0x37c   : > { %v1224_v61 = vadd.s32 %v1223_v52, %v1221_v55  ;;  %v448_v52 = vld [vmem:[%s4825_s8 + $0x98] sm:$0xff] }
 0x37d   : > { %v1412_v63 = vpop.xlane.xlu1 %1411  ;;  %v3567_v53 = vpack.c.bf16 %v448_v52, %v443_v51  ;;  %v2246_v52 = vcombine.high %v3821_v5, %v3821_v5 }
 0x37e   : > { %vm1225_vm7 = vcmp.eq.s32.totalorder %v3902_v62, %v1224_v61  ;;  %v1413_v50 = vcvt.f32.s32 %v1412_v63 }
 0x37f   : > { %v3254_v14 = vsel %vm1225_vm7, 1.0, %v3717_v0  ;;  %3568 = vmatprep.subr.bf16.mxu0 %v3567_v53 }
 0x380   : > { %v1416_v16 = vadd.s32 %v1415_v8, %v1413_v50  ;;  %3454 = vmatmul.mubr.msk.f32.vlgmr.msra.gmra.mrb[8].mxu1 %vm790_vm10, %v3254_v14  ;;  %3570 = vmatpush3.bf16.msra.mxu0 %v3567_v53 }
 0x381   : > { %v872_v60 = vpop.xlane.xlu1 %871  ;;  %3462 = vmatpush3.msra.mxu1 %v426_v54  ;;  %3463 = vmatprep.mubr.msk.f32.mxu1 %vm3718_vm0, %v3717_v0 }
 0x382   : > { %vm1417_vm8 = vcmp.eq.s32.totalorder %v3902_v62, %v1416_v16  ;;  %v873_v21 = vadd.f32 1e-08, %v872_v60  ;;  %3556 = vmatprep.subr.bf16.mxu1 %v3555_v10 }
 0x383   : > { %v3258_v25 = vsel %vm1417_vm8, 1.0, %v3717_v0 }
 0x384   : > { %3616 = vrcp.f32 %v873_v21  ;;  %3464 = vmatmul.mubr.msk.f32.vlgmr.msra.gmra.mrb[10].mxu1 %vm790_vm10, %v3258_v25 }
 0x385   : > { %3558 = vmatpush1.bf16.msra.mxu1 %v4051_v19  ;;  %v1030_v62 = vpop.xlane.xlu1 %1029  ;;  %1808 = vmatprep.mubr.f32.mxu1 %v3717_v0 }
 0x386   : > { %v1031_v28 = vadd.f32 1e-08, %v1030_v62  ;;  %3560 = vmatprep.subr.bf16.mxu1 %v3559_v22 }
 0x388   : > { %3618 = vrcp.f32 %v1031_v28 }
 0x389   : > { %3562 = vmatpush1.bf16.msra.mxu1 %v4063_v27 }
 0x38a   : > { %3572 = vmatprep.subr.bf16.mxu1 %v3952_v17 }
 0x38c   : > { %3282 = vmatmul.mubr.msk.f32.vlgmr.msra.gmra.mrb[12].mxu1 %vm449_vm1, %v3994_v39 }
 0x38d   : > { %1812 = vmatprep.mubr.f32.mxu1 %v3717_v0  ;;  %3574 = vmatpush3.bf16.msra.mxu1 %v3952_v17 }
 0x38e   : > { %v3617_v30 = vpop.eup %3616  ;;  %3576 = vmatprep.subr.bf16.mxu1 %v3978_v31 }
 0x38f   : > { %v4074_v32 = vmul.f32 %v3617_v30, %v3928_v45  ;;  %v4096_v45 = vmul.f32 %v4084_v35, %v3825_v6  ;;  %v3719_v30 = vmov 1966171168  }
 0x390   : > { %3283 = vmatmul.mubr.msk.f32.gmra.mrb[14].mxu1 %vm449_vm1, %v4001_v41 }
 0x391   : > { %1816 = vmatprep.mubr.f32.mxu1 %v3717_v0  ;;  %v4081_v34 = vmul.f32 %v4074_v32, %v3800_v1  ;;  %3578 = vmatpush3.bf16.msra.mxu1 %v3978_v31 }
 0x392   : > { %v3619_v17 = vpop.eup %3618  ;;  %3580 = vmatprep.subr.bf16.mxu1 %v4051_v19 }
 0x393   : > { %3263 = vmatmul.mubr.msk.f32.gmra.mrb[14].mxu0 %vm449_vm1, %v4081_v34  ;;  %v4099_v20 = vmul.f32 %v3619_v17, %v3930_v47  ;;  %v2248_v17 = vunpack.c.l.s4 %v3719_v30 }
 0x394   : > { %3284 = vmatmul.mubr.msk.f32.gmra.mrb[16].mxu1 %vm449_vm1, %v4012_v44  ;;  %1667 = vmatprep.mubr.f32.mxu0 %v3717_v0 }
 0x395   : > { %1821 = vmatprep.mubr.f32.mxu1 %v3717_v0  ;;  %v4109_v31 = vmul.f32 %v4099_v20, %v3803_v2  ;;  %v2249_v43 = vunpack.c.0.s8 %v2248_v17  ;;  %v4241_v51 = vmul.f32 %v4099_v20, %v4099_v20 }
 0x397   : > { %3264 = vmatmul.mubr.msk.f32.gmra.mrb[16].mxu0 %vm449_vm1, %v4096_v45 }
 0x398   : > { %3285 = vmatmul.mubr.msk.f32.gmra.mrb[18].mxu1 %vm449_vm1, %v4081_v34  ;;  %1671 = vmatprep.mubr.f32.mxu0 %v3717_v0 }
 0x399   : > { %1826 = vmatprep.mubr.f32.mxu1 %v3717_v0 }
 0x39b   : > { %3265 = vmatmul.mubr.msk.f32.gmra.mrb[18].mxu0 %vm449_vm1, %v4109_v31 }
 0x39c   : > { %3286 = vmatmul.mubr.msk.f32.gmra.mrb[20].mxu1 %vm449_vm1, %v4096_v45  ;;  %1675 = vmatprep.mubr.f32.mxu0 %v3717_v0 }
 0x39d   : > { %1830 = vmatprep.mubr.f32.mxu1 %v3717_v0 }
 0x3a0   : > { %3287 = vmatmul.mubr.msk.f32.gmra.mrb[22].mxu1 %vm449_vm1, %v4109_v31 }
 0x3a1   : > { %1834 = vmatprep.mubr.f32.mxu1 %v3717_v0 }
 0x3d2   : > { %v4120_v47 = vpop.f32.mrb[4].mxu0 }
 0x3d3   : > { %v4124_v37 = vmul.f32 %v4120_v47, %v3821_v5  ;;  %v3450_v38 = vpop.f32.mrb[5].mxu0 }
 0x3d5   : > { %3266 = vmatmul.mubr.msk.f32.gmra.mrb[20].mxu0 %vm449_vm1, %v4124_v37  ;;  %3288 = vmatmul.mubr.msk.f32.gmra.mrb[24].mxu1 %vm449_vm1, %v4124_v37 }
 0x3d6   : > { %v4130_v40 = vpop.f32.mrb[6].mxu0  ;;  %1679 = vmatprep.mubr.f32.mxu0 %v3717_v0  ;;  %1839 = vmatprep.mubr.f32.mxu1 %v3717_v0 }
 0x3d7   : > { %v3460_v42 = vpop.f32.mrb[7].mxu0  ;;  %v4160_v8 = vmul.f32 %v4130_v40, %v3825_v6 }
 0x3de   : > { %v4134_v46 = vpop.f32.mrb[8].mxu0 }
 0x3df   : > { %v1653_v18 = vpop.f32.mrb[9].mxu0 }
 0x3e0   : > { %v4218_v18 = vmul.f32 %v4074_v32, %v4074_v32  ;;  %v4235_v32 = vsub.s32 %v2249_v43, %v3857_v33  ;;  %v4253_v33 = vmul.f32 %v4120_v47, %v4120_v47 }
 0x3e2   : > { %v4136_v48 = vpop.f32.mrb[10].mxu0 }
 0x3e3   : > { %v1658_v49 = vpop.f32.mrb[11].mxu0 }
 0x3e4   : > { %v4228_v49 = vmul.f32 %v4084_v35, %v4084_v35  ;;  %v2253_v35 = vrot.slane %v3821_v5, %v4235_v32  ;;  %v2260_v5 = vrot.slane %v2246_v52, %v4235_v32 }
 0x3e6   : > { %v1661_v55 = vpop.f32.mrb[12].mxu0  ;;  %v2261_v20 = vcombine.high %v2253_v35, %v2253_v35  ;;  %v2269_v53 = vrot.slane %v2253_v35, %v4235_v32 }
 0x3e7   : > { %v1662_v56 = vpop.f32.mrb[13].mxu0 }
 0x3e8   : > { %v2283_v55 = vrot.slane %v2261_v20, %v4235_v32  ;;  %v2298_v56 = vrot.slane %v2269_v53, %v3860_v36 }
 0x453   : > { %v4144_v57 = vpop.f32.mrb[8].mxu1 }
 0x454   : > { %v4148_v59 = vmul.f32 %v4144_v57, %v3800_v1  ;;  %v3455_v61 = vpop.f32.mrb[9].mxu1  ;;  %v4266_v47 = vmul.f32 %v4144_v57, %v4144_v57  ;;  %v4279_v57 = vmul.f32 %v4130_v40, %v4130_v40  ;;  %v2276_v40 = vrot.slane %v2260_v5, %v4235_v32 }
 0x455   : > { %v2291_v61 = vcombine.high %v2269_v53, %v2269_v53 }
 0x456   : > { %3267 = vmatmul.mubr.msk.f32.gmra.mrb[22].mxu0 %vm449_vm1, %v4148_v59  ;;  %3289 = vmatmul.mubr.msk.f32.gmra.mrb[26].mxu1 %vm449_vm1, %v4148_v59 }
 0x457   : > { %v4154_v63 = vpop.f32.mrb[10].mxu1  ;;  %1683 = vmatprep.mubr.f32.mxu0 %v3717_v0  ;;  %1844 = vmatprep.mubr.f32.mxu1 %v3717_v0 }
 0x458   : > { %v3465_v50 = vpop.f32.mrb[11].mxu1  ;;  %v4170_v54 = vmul.f32 %v4154_v63, %v3803_v2 }
 0x459   : > { %v2293_v50 = vcombine.high %v2283_v55, %v2283_v55 }
 0x45a   : > { %3268 = vmatmul.mubr.msk.f32.gmra.mrb[24].mxu0 %vm449_vm1, %v4160_v8  ;;  %3290 = vmatmul.mubr.msk.f32.gmra.mrb[28].mxu1 %vm449_vm1, %v4160_v8 }
 0x45b   : > { %1687 = vmatprep.mubr.f32.mxu0 %v3717_v0  ;;  %1848 = vmatprep.mubr.f32.mxu1 %v3717_v0 }
 0x45e   : > { %3269 = vmatmul.mubr.msk.f32.gmra.mrb[26].mxu0 %vm449_vm1, %v4170_v54  ;;  %3291 = vmatmul.mubr.msk.f32.gmra.mrb[30].mxu1 %vm449_vm1, %v4170_v54 }
 0x45f   : > { %1691 = vmatprep.mubr.f32.mxu0 %v3717_v0  ;;  %1852 = vmatprep.mubr.f32.mxu1 %v3717_v0  ;;  %v1810_v10 = vpop.f32.mrb[12].mxu1 }
 0x460   : > { %v1811_v11 = vpop.f32.mrb[13].mxu1  ;;  %v2302_v10 = vrot.slane %v2283_v55, %v3860_v36 }
 0x461   : > { %v2262_v11 = vcombine.high %v2260_v5, %v2260_v5 }
 0x462   : > { %3270 = vmatmul.mubr.msk.f32.gmra.mrb[28].mxu0 %vm449_vm1, %v3829_v7  ;;  %3292 = vmatmul.mubr.msk.f32.gmra.mrb[32].mxu1 %vm449_vm1, %v3829_v7 }
 0x463   : > { %v1814_v12 = vpop.f32.mrb[14].mxu1  ;;  %1696 = vmatprep.mubr.f32.mxu0 %v3717_v0  ;;  %1857 = vmatprep.mubr.f32.mxu1 %v3717_v0 }
 0x464   : > { %v1815_v13 = vpop.f32.mrb[15].mxu1  ;;  %v2335_v12 = vmul.f32 %v2298_v56, %v3800_v1 }
 0x465   : > { %v2306_v13 = vrot.slane %v2291_v61, %v3860_v36 }
 0x466   : > { %v1665_v14 = vpop.f32.mrb[14].mxu0  ;;  %3271 = vmatmul.mubr.msk.f32.gmra.mrb[30].mxu0 %vm449_vm1, %v3813_v3  ;;  %3293 = vmatmul.mubr.msk.f32.gmra.mrb[34].mxu1 %vm449_vm1, %v3813_v3 }
 0x467   : > { %v1818_v58 = vpop.f32.mrb[16].mxu1  ;;  %v1666_v15 = vpop.f32.mrb[15].mxu0  ;;  %1701 = vmatprep.mubr.f32.mxu0 %v3717_v0  ;;  %1862 = vmatprep.mubr.f32.mxu1 %v3717_v0  ;;  %v4293_v14 = vmul.f32 %v4154_v63, %v4154_v63  ;;  %v2337_v63 = vmul.f32 %v2306_v13, %v3800_v1 }
 0x468   : > { %v4190_v16 = vpop.f32.mrb[17].mxu1  ;;  %v2310_v58 = vrot.slane %v2293_v50, %v3860_v36  ;;  %v2290_v15 = vrot.slane %v2262_v11, %v4235_v32 }
 0x46a   : > { %v1669_v60 = vpop.f32.mrb[16].mxu0  ;;  %3272 = vmatmul.mubr.msk.f32.gmra.mrb[32].mxu0 %vm449_vm1, %v3836_v9  ;;  %3294 = vmatmul.mubr.msk.f32.gmra.mrb[36].mxu1 %vm449_vm1, %v3836_v9 }
 0x46b   : > { %v1823_v21 = vpop.f32.mrb[18].mxu1  ;;  %v1670_v22 = vpop.f32.mrb[17].mxu0  ;;  %1706 = vmatprep.mubr.f32.mxu0 %v3717_v0  ;;  %1867 = vmatprep.mubr.f32.mxu1 %v3717_v0  ;;  %v2656_v60 = vrot.slane %v3825_v6, %v4235_v32 }
 0x46c   : > { %v4198_v23 = vpop.f32.mrb[19].mxu1  ;;  %v2314_v21 = vrot.slane %v2276_v40, %v3860_v36  ;;  %v2292_v22 = vcombine.high %v2276_v40, %v2276_v40 }
 0x46e   : > { %v1673_v24 = vpop.f32.mrb[18].mxu0  ;;  %3273 = vmatmul.mubr.msk.f32.gmra.mrb[34].mxu0 %vm449_vm1, %v3817_v4  ;;  %3295 = vmatmul.mubr.msk.f32.gmra.mrb[38].mxu1 %vm449_vm1, %v3817_v4  ;;  %v2339_v30 = vmul.f32 %v2314_v21, %v3800_v1  ;;  %v2322_v17 = vrot.slane %v2292_v22, %v3860_v36 }
 0x46f   : > { %v1828_v25 = vpop.f32.mrb[20].mxu1  ;;  %v1674_v62 = vpop.f32.mrb[19].mxu0  ;;  %1711 = vmatprep.mubr.f32.mxu0 %v3717_v0  ;;  %1872 = vmatprep.mubr.f32.mxu1 %v3717_v0  ;;  %v2338_v24 = vmul.f32 %v2310_v58, %v3800_v1 }
 0x470   : > { %v1829_v28 = vpop.f32.mrb[21].mxu1  ;;  %v2294_v25 = vcombine.high %v2290_v15, %v2290_v15  ;;  %v2318_v62 = vrot.slane %v2290_v15, %v3860_v36 }
 0x471   : > { %v2664_v28 = vcombine.high %v2656_v60, %v2656_v60 }
 0x472   : > { %3274 = vmatmul.mubr.msk.f32.gmra.mrb[36].mxu0 %vm449_vm1, %v4208_v29  ;;  %3296 = vmatmul.mubr.msk.f32.gmra.mrb[40].mxu1 %vm449_vm1, %v4208_v29 }
 0x473   : > { %v1832_v38 = vpop.f32.mrb[22].mxu1  ;;  %1715 = vmatprep.mubr.f32.mxu0 %v3717_v0  ;;  %1877 = vmatprep.mubr.f32.mxu1 %v3717_v0 }
 0x474   : > { %v1833_v42 = vpop.f32.mrb[23].mxu1  ;;  %v2672_v38 = vrot.slane %v2656_v60, %v4235_v32 }
 0x476   : > { %3275 = vmatmul.mubr.msk.f32.gmra.mrb[38].mxu0 %vm449_vm1, %v4218_v18  ;;  %3297 = vmatmul.mubr.msk.f32.gmra.mrb[42].mxu1 %vm449_vm1, %v4218_v18  ;;  %v2701_v43 = vrot.slane %v2672_v38, %v3860_v36  ;;  %v2694_v35 = vcombine.high %v2672_v38, %v2672_v38 }
 0x477   : > { %1719 = vmatprep.mubr.f32.mxu0 %v3717_v0  ;;  %1882 = vmatprep.mubr.f32.mxu1 %v3717_v0 }
 0x478   : > { %v2738_v53 = vmul.f32 %v2701_v43, %v3803_v2 }
 0x47a   : > { %3276 = vmatmul.mubr.msk.f32.gmra.mrb[40].mxu0 %vm449_vm1, %v4228_v49  ;;  %3298 = vmatmul.mubr.msk.f32.gmra.mrb[44].mxu1 %vm449_vm1, %v4228_v49 }
 0x47b   : > { %1723 = vmatprep.mubr.f32.mxu0 %v3717_v0  ;;  %1886 = vmatprep.mubr.f32.mxu1 %v3717_v0 }
 0x47e   : > { %3277 = vmatmul.mubr.msk.f32.gmra.mrb[42].mxu0 %vm449_vm1, %v4241_v51  ;;  %3299 = vmatmul.mubr.msk.f32.gmra.mrb[46].mxu1 %vm449_vm1, %v4241_v51 }
 0x47f   : > { %1727 = vmatprep.mubr.f32.mxu0 %v3717_v0  ;;  %1890 = vmatprep.mubr.f32.mxu1 %v3717_v0 }
 0x482   : > { %3278 = vmatmul.mubr.msk.f32.gmra.mrb[44].mxu0 %vm449_vm1, %v4253_v33  ;;  %3300 = vmatmul.mubr.msk.f32.gmra.mrb[48].mxu1 %vm449_vm1, %v4253_v33 }
 0x483   : > { %1731 = vmatprep.mubr.f32.mxu0 %v3717_v0  ;;  %1895 = vmatprep.mubr.f32.mxu1 %v3717_v0 }
 0x486   : > { %3279 = vmatmul.mubr.msk.f32.gmra.mrb[46].mxu0 %vm449_vm1, %v4266_v47  ;;  %3301 = vmatmul.mubr.msk.f32.gmra.mrb[50].mxu1 %vm449_vm1, %v4266_v47 }
 0x487   : > { %1735 = vmatprep.mubr.f32.mxu0 %v3717_v0  ;;  %1900 = vmatprep.mubr.f32.mxu1 %v3717_v0 }
 0x48a   : > { %3280 = vmatmul.mubr.msk.f32.gmra.mrb[48].mxu0 %vm449_vm1, %v4279_v57  ;;  %3302 = vmatmul.mubr.msk.f32.gmra.mrb[52].mxu1 %vm449_vm1, %v4279_v57 }
 0x48b   : > { %1739 = vmatprep.mubr.f32.mxu0 %v3717_v0  ;;  %1904 = vmatprep.mubr.f32.mxu1 %v3717_v0  ;;  %v2336_v0 = vmul.f32 %v2302_v10, %v3800_v1 }
 0x48e   : > { %3281 = vmatmul.mubr.msk.f32.gmra.mrb[50].mxu0 %vm449_vm1, %v4293_v14  ;;  %3303 = vmatmul.mubr.msk.f32.gmra.mrb[54].mxu1 %vm449_vm1, %v4293_v14 }
 0x48f   : > { %3474 = vmatprep.mubr.msk.f32.mxu0 %vm449_vm1, %v3994_v39  ;;  %3515 = vmatprep.mubr.msk.f32.mxu1 %vm449_vm1, %v2335_v12  ;;  %v2649_v39 = vcombine.high %v3825_v6, %v3825_v6  ;;  %v2340_v6 = vmul.f32 %v2318_v62, %v3800_v1 }
 0x491   : > { %v2663_v42 = vrot.slane %v2649_v39, %v4235_v32 }
 0x492   : > { %3475 = vmatmul.mubr.msk.f32.vlgmr.msra.gmra.mrb[52].mxu0 %vm449_vm1, %v4001_v41  ;;  %3516 = vmatmul.mubr.msk.f32.vlgmr.msra.gmra.mrb[56].mxu1 %vm449_vm1, %v2336_v0  ;;  %v2326_v41 = vrot.slane %v2294_v25, %v3860_v36 }
 0x493   : > { %3477 = vmatprep.mubr.msk.f32.mxu0 %vm449_vm1, %v4012_v44  ;;  %3518 = vmatprep.mubr.msk.f32.mxu1 %vm449_vm1, %v2337_v63  ;;  %v2686_v44 = vrot.slane %v2664_v28, %v4235_v32 }
 0x494   : > { %3582 = vmatpush3.bf16.msra.mxu1 %v4051_v19  ;;  %v2341_v19 = vmul.f32 %v2322_v17, %v3800_v1 }
 0x495   : > { %3584 = vmatprep.subr.bf16.mxu1 %v4063_v27  ;;  %v2705_v20 = vrot.slane %v2686_v44, %v3860_v36  ;;  %v2696_v52 = vcombine.high %v2686_v44, %v2686_v44 }
 0x496   : > { %3478 = vmatmul.mubr.msk.f32.gmra.mrb[54].mxu0 %vm449_vm1, %v4081_v34  ;;  %3519 = vmatmul.mubr.msk.f32.gmra.mrb[58].mxu1 %vm449_vm1, %v2338_v24  ;;  %v2342_v34 = vmul.f32 %v2326_v41, %v3800_v1  ;;  %v2679_v1 = vrot.slane %v2663_v42, %v4235_v32 }
 0x497   : > { %3480 = vmatprep.mubr.msk.f32.mxu0 %vm449_vm1, %v4096_v45  ;;  %3521 = vmatprep.mubr.msk.f32.mxu1 %vm449_vm1, %v2339_v30  ;;  %v2665_v45 = vcombine.high %v2663_v42, %v2663_v42  ;;  %v2713_v55 = vrot.slane %v2696_v52, %v3860_v36 }
 0x498   : > { %3586 = vmatpush3.bf16.msra.mxu1 %v4063_v27  ;;  %v2709_v27 = vrot.slane %v2694_v35, %v3860_v36  ;;  %v2717_v56 = vrot.slane %v2679_v1, %v3860_v36  ;;  %v2695_v61 = vcombine.high %v2679_v1, %v2679_v1 }
 0x49a   : > { %3481 = vmatmul.mubr.msk.f32.gmra.mrb[56].mxu0 %vm449_vm1, %v4109_v31  ;;  %3522 = vmatmul.mubr.msk.f32.gmra.mrb[60].mxu1 %vm449_vm1, %v2340_v6  ;;  %v2739_v31 = vmul.f32 %v2705_v20, %v3803_v2  ;;  %v2740_v5 = vmul.f32 %v2709_v27, %v3803_v2  ;;  %v2725_v12 = vrot.slane %v2695_v61, %v3860_v36 }
 0x49b   : > { %3483 = vmatprep.mubr.msk.f32.mxu0 %vm449_vm1, %v4124_v37  ;;  %3524 = vmatprep.mubr.msk.f32.mxu1 %vm449_vm1, %v2341_v19  ;;  %v2693_v37 = vrot.slane %v2665_v45, %v4235_v32 }
 0x49d   : > { %v2721_v50 = vrot.slane %v2693_v37, %v3860_v36  ;;  %v2697_v10 = vcombine.high %v2693_v37, %v2693_v37 }
 0x49e   : > { %3484 = vmatmul.mubr.msk.f32.gmra.mrb[58].mxu0 %vm449_vm1, %v4148_v59  ;;  %3525 = vmatmul.mubr.msk.f32.gmra.mrb[62].mxu1 %vm449_vm1, %v2342_v34  ;;  %v2741_v59 = vmul.f32 %v2713_v55, %v3803_v2 }
 0x49f   : > { %3486 = vmatprep.mubr.msk.f32.mxu0 %vm449_vm1, %v4160_v8  ;;  %3535 = vmatprep.mubr.msk.f32.mxu1 %vm449_vm1, %v2738_v53  ;;  %v3708_v8 = vld [vmem:[%s3798_s21] sm:$0xff]  ;;  %v2729_v2 = vrot.slane %v2697_v10, %v3860_v36  ;;  %s3344_s21 = sshll.u32 %s4829_s14, 6 }
 0x4a0   : > { %v2742_v11 = vmul.f32 %v3708_v8, %v2717_v56  ;;  %s4583_s27 = scalar_lea.vmem %s4827_s10, %s3344_s21  ;;  %s4596_s30 = scalar_lea.vmem %s4826_s9, %s3344_s21 }
 0x4a2   : > { %3487 = vmatmul.mubr.msk.f32.gmra.mrb[60].mxu0 %vm449_vm1, %v4170_v54  ;;  %3536 = vmatmul.mubr.msk.f32.vlgmr.msra.gmra.mrb[64].mxu1 %vm449_vm1, %v2739_v31  ;;  %v2743_v54 = vmul.f32 %v3708_v8, %v2721_v50 }
 0x4a3   : > { %3489 = vmatprep.mubr.msk.f32.mxu0 %vm449_vm1, %v3829_v7  ;;  %3538 = vmatprep.mubr.msk.f32.mxu1 %vm449_vm1, %v2740_v5  ;;  %v2744_v7 = vmul.f32 %v3708_v8, %v2725_v12 }
 0x4a6   : > { %3490 = vmatmul.mubr.msk.f32.gmra.mrb[62].mxu0 %vm449_vm1, %v3813_v3  ;;  %3539 = vmatmul.mubr.msk.f32.gmra.mrb[66].mxu1 %vm449_vm1, %v2741_v59  ;;  %v2745_v3 = vmul.f32 %v3708_v8, %v2729_v2 }
 0x4a7   : > { %3492 = vmatprep.mubr.msk.f32.mxu0 %vm449_vm1, %v3836_v9  ;;  %3541 = vmatprep.mubr.msk.f32.mxu1 %vm449_vm1, %v2742_v11 }
 0x4a8   : > { %v1677_v13 = vpop.f32.mrb[20].mxu0  ;;  %v1836_v40 = vpop.f32.mrb[24].mxu1 }
 0x4a9   : > { %v1678_v58 = vpop.f32.mrb[21].mxu0  ;;  %v4376_v0 = vpop.f32.mrb[25].mxu1 }
 0x4aa   : > { %3493 = vmatmul.mubr.msk.f32.gmra.mrb[64].mxu0 %vm449_vm1, %v3817_v4  ;;  %3542 = vmatmul.mubr.msk.f32.gmra.mrb[68].mxu1 %vm449_vm1, %v2743_v54 }
 0x4ab   : > { %3495 = vmatprep.mubr.msk.f32.mxu0 %vm449_vm1, %v4208_v29  ;;  %3544 = vmatprep.mubr.msk.f32.mxu1 %vm449_vm1, %v2744_v7 }
 0x4ae   : > { %3496 = vmatmul.mubr.msk.f32.gmra.mrb[66].mxu0 %vm449_vm1, %v4218_v18  ;;  %3545 = vmatmul.mubr.msk.f32.gmra.mrb[70].mxu1 %vm449_vm1, %v2745_v3 }
 0x4af   : > { %3498 = vmatprep.mubr.msk.f32.mxu0 %vm449_vm1, %v4228_v49 }
 0x4b2   : > { %3499 = vmatmul.mubr.msk.f32.gmra.mrb[68].mxu0 %vm449_vm1, %v4241_v51 }
 0x4b3   : > { %3501 = vmatprep.mubr.msk.f32.mxu0 %vm449_vm1, %v4253_v33 }
 0x4b6   : > { %3502 = vmatmul.mubr.msk.f32.gmra.mrb[70].mxu0 %vm449_vm1, %v4266_v47 }
 0x4b7   : > { %3504 = vmatprep.mubr.msk.f32.mxu0 %vm449_vm1, %v4279_v57 }
 0x4ba   : > { %3505 = vmatmul.mubr.msk.f32.gmra.mrb[72].mxu0 %vm449_vm1, %v4293_v14 }
 0x529   : > { %v1681_v4 = vpop.f32.mrb[22].mxu0  ;;  %v1841_v9 = vpop.f32.mrb[26].mxu1 }
 0x52a   : > { %v1682_v29 = vpop.f32.mrb[23].mxu0  ;;  %v4399_v18 = vpop.f32.mrb[27].mxu1 }
 0x52d   : > { %v1685_v49 = vpop.f32.mrb[24].mxu0  ;;  %v1846_v15 = vpop.f32.mrb[28].mxu1 }
 0x52e   : > { %v1686_v51 = vpop.f32.mrb[25].mxu0  ;;  %v1847_v60 = vpop.f32.mrb[29].mxu1 }
 0x531   : > { %v1689_v63 = vpop.f32.mrb[26].mxu0  ;;  %v1850_v33 = vpop.f32.mrb[30].mxu1 }
 0x532   : > { %v1690_v21 = vpop.f32.mrb[27].mxu0  ;;  %v1851_v22 = vpop.f32.mrb[31].mxu1 }
 0x535   : > { %v1693_v47 = vpop.f32.mrb[28].mxu0  ;;  %v1854_v24 = vpop.f32.mrb[32].mxu1 }
 0x536   : > { %v1694_v25 = vpop.f32.mrb[29].mxu0  ;;  %v4401_v57 = vpop.f32.mrb[33].mxu1 }
 0x537   : > { %3620 = vrsqrt.f32 %v1694_v25  ;;  %vm2074_vm0 = vcmp.eq.f32.partialorder %v1694_v25, inf  ;;  %vm2076_vm1 = vcmp.eq.f32.partialorder %v1694_v25, 0.0  ;;  %v2077_v44 = vand.u32 2147483648, %v1694_v25 }
 0x538   : > { %3622 = vrsqrt.f32 %v4401_v57  ;;  %vm2116_vm9 = vcmp.eq.f32.partialorder %v4401_v57, inf  ;;  %vm2118_vm10 = vcmp.eq.f32.partialorder %v4401_v57, 0.0  ;;  %v2119_v42 = vand.u32 2147483648, %v4401_v57 }
 0x539   : > { %v1698_v14 = vpop.f32.mrb[30].mxu0  ;;  %v1859_v62 = vpop.f32.mrb[34].mxu1 }
 0x53a   : > { %v4404_v28 = vpop.f32.mrb[31].mxu0  ;;  %v4406_v39 = vpop.f32.mrb[35].mxu1 }
 0x53b   : > { %3624 = vrsqrt.f32 %v4404_v28  ;;  %vm2081_vm11 = vcmp.eq.f32.partialorder %v4404_v28, inf  ;;  %v2084_v20 = vand.u32 2147483648, %v4404_v28  ;;  %vm2083_vm12 = vcmp.eq.f32.partialorder %v4404_v28, 0.0 }
 0x53c   : > { %3626 = vrsqrt.f32 %v4406_v39  ;;  %vm2123_vm13 = vcmp.eq.f32.partialorder %v4406_v39, inf  ;;  %vm2125_vm14 = vcmp.eq.f32.partialorder %v4406_v39, 0.0  ;;  %v2126_v27 = vand.u32 2147483648, %v4406_v39 }
 0x53d   : > { %v4410_v30 = vpop.f32.mrb[32].mxu0  ;;  %v4412_v17 = vpop.f32.mrb[36].mxu1 }
 0x53e   : > { %3628 = vrsqrt.f32 %v4410_v30  ;;  %v1705_v38 = vpop.f32.mrb[33].mxu0  ;;  %v1866_v41 = vpop.f32.mrb[37].mxu1  ;;  %vm2102_vm15 = vcmp.eq.f32.partialorder %v4410_v30, inf  ;;  %vm2104_vm2 = vcmp.eq.f32.partialorder %v4410_v30, 0.0  ;;  %v2105_v37 = vand.u32 2147483648, %v4410_v30 }
 0x53f   : > { %3630 = vrsqrt.f32 %v4412_v17  ;;  %vm2088_vm3 = vcmp.eq.f32.partialorder %v4412_v17, inf  ;;  %vm2090_vm4 = vcmp.eq.f32.partialorder %v4412_v17, 0.0  ;;  %v2091_v2 = vand.u32 2147483648, %v4412_v17 }
 0x541   : > { %v3621_v6 = vpop.eup %3620  ;;  %v4419_v19 = vpop.f32.mrb[34].mxu0 }
 0x542   : > { %v4421_v43 = vpop.f32.mrb[38].mxu1  ;;  %v3623_v35 = vpop.eup %3622  ;;  %v2073_v34 = vmul.f32 %v3621_v6, %v1694_v25  ;;  %3632 = vrsqrt.f32 %v4419_v19  ;;  %vm2109_vm5 = vcmp.eq.f32.partialorder %v4419_v19, inf  ;;  %vm2111_vm6 = vcmp.eq.f32.partialorder %v4419_v19, 0.0 }
 0x543   : > { %v1710_v52 = vpop.f32.mrb[35].mxu0  ;;  %v1871_v45 = vpop.f32.mrb[39].mxu1  ;;  %v2115_v53 = vmul.f32 %v3623_v35, %v4401_v57  ;;  %3634 = vrsqrt.f32 %v4421_v43  ;;  %v2112_v40 = vand.u32 2147483648, %v4419_v19  ;;  %v2098_v58 = vand.u32 2147483648, %v4421_v43 }
 0x544   : > { %v2075_v1 = vsel %vm2074_vm0, %v1694_v25, %v2073_v34  ;;  %vm2095_vm8 = vcmp.eq.f32.partialorder %v4421_v43, inf }
 0x545   : > { %v3625_v31 = vpop.eup %3624  ;;  %v2078_v55 = vsel %vm2076_vm1, %v2077_v44, %v2075_v1  ;;  %v1713_v5 = vpop.f32.mrb[36].mxu0  ;;  %v2117_v8 = vsel %vm2116_vm9, %v4401_v57, %v2115_v53  ;;  %vm2097_vm1 = vcmp.eq.f32.partialorder %v4421_v43, 0.0 }
 0x546   : > { %v1874_v56 = vpop.f32.mrb[40].mxu1  ;;  %v3627_v61 = vpop.eup %3626  ;;  %v2473_v59 = vcombine.high %v2078_v55, %v2078_v55  ;;  %v2480_v50 = vrot.slane %v2078_v55, %v4235_v32  ;;  %v2080_v10 = vmul.f32 %v3625_v31, %v4404_v28  ;;  %v4459_v29 = vsel %vm2118_vm10, %v2119_v42, %v2117_v8 }
 0x547   : > { %v1714_v11 = vpop.f32.mrb[37].mxu0  ;;  %v4444_v12 = vpop.f32.mrb[41].mxu1  ;;  %v2122_v54 = vmul.f32 %v3627_v61, %v4406_v39 }
 0x548   : > { %3636 = vrsqrt.f32 %v4444_v12  ;;  %v3629_v7 = vpop.eup %3628  ;;  %v2488_v13 = vcombine.high %v2480_v50, %v2480_v50  ;;  %v2082_v4 = vsel %vm2081_vm11, %v4404_v28, %v2080_v10  ;;  %v2496_v51 = vrot.slane %v2480_v50, %v4235_v32 }
 0x549   : > { %v3631_v3 = vpop.eup %3630  ;;  %v2101_v9 = vmul.f32 %v3629_v7, %v4410_v30  ;;  %v1717_v49 = vpop.f32.mrb[38].mxu0  ;;  %v4463_v60 = vrot.slane %v2473_v59, %v4235_v32  ;;  %v2124_v63 = vsel %vm2123_vm13, %v4406_v39, %v2122_v54  ;;  %vm2160_vm7 = vcmp.eq.f32.partialorder %v4444_v12, inf }
 0x54a   : > { %v1879_v15 = vpop.f32.mrb[42].mxu1  ;;  %v2087_v33 = vmul.f32 %v3631_v3, %v4412_v17  ;;  %v1718_v21 = vpop.f32.mrb[39].mxu0  ;;  %v2510_v47 = vrot.slane %v2488_v13, %v4235_v32  ;;  %v2163_v25 = vand.u32 2147483648, %v4444_v12  ;;  %v4480_v14 = vsel %vm2083_vm12, %v2084_v20, %v2082_v4 }
 0x54b   : > { %v4469_v22 = vpop.f32.mrb[43].mxu1  ;;  %v2103_v24 = vsel %vm2102_vm15, %v4410_v30, %v2101_v9  ;;  %vm2162_vm0 = vcmp.eq.f32.partialorder %v4444_v12, 0.0  ;;  %v4492_v6 = vsel %vm2125_vm14, %v2126_v27, %v2124_v63  ;;  %v2525_v35 = vrot.slane %v2496_v51, %v3860_v36 }
 0x54c   : > { %3638 = vrsqrt.f32 %v4469_v22  ;;  %v3633_v57 = vpop.eup %3632  ;;  %v2106_v62 = vsel %vm2104_vm2, %v2105_v37, %v2103_v24  ;;  %v2089_v38 = vsel %vm2088_vm3, %v4412_v17, %v2087_v33  ;;  %v2529_v41 = vrot.slane %v2510_v47, %v3860_v36 }
 0x54d   : > { %v2108_v28 = vmul.f32 %v3633_v57, %v4419_v19  ;;  %v4497_v30 = vsel %vm2090_vm4, %v2091_v2, %v2089_v38  ;;  %v1721_v44 = vpop.f32.mrb[40].mxu0  ;;  %v1884_v42 = vpop.f32.mrb[44].mxu1  ;;  %v2153_v20 = vrot.slane %v2106_v62, %v3969_v26  ;;  %v2489_v17 = vcombine.high %v4463_v60, %v4463_v60 }
 0x54e   : > { %v3635_v34 = vpop.eup %3634  ;;  %v4503_v52 = vrot.slane %v4497_v30, %v4235_v32  ;;  %v1722_v39 = vpop.f32.mrb[41].mxu0  ;;  %v2563_v53 = vmul.f32 %v2529_v41, %v4480_v14  ;;  %v2562_v1 = vmul.f32 %v2525_v35, %v4480_v14  ;;  %v2520_v31 = vcombine.high %v2510_v47, %v2510_v47 }
 0x54f   : > { %v1885_v45 = vpop.f32.mrb[45].mxu1  ;;  %v2110_v27 = vsel %vm2109_vm5, %v4419_v19, %v2108_v28  ;;  %v2518_v55 = vcombine.high %v2496_v51, %v2496_v51  ;;  %vm2171_vm9 = vcmp.eq.f32.partialorder %v4469_v22, inf  ;;  %vm2173_vm10 = vcmp.eq.f32.partialorder %v4469_v22, 0.0 }
 0x550   : > { %v2113_v37 = vsel %vm2111_vm6, %v2112_v40, %v2110_v27  ;;  %v2174_v5 = vand.u32 2147483648, %v4469_v22  ;;  %v2094_v50 = vmul.f32 %v3635_v34, %v4421_v43  ;;  %v2571_v11 = vmax.f32 %v2563_v53, 1e-08 }
 0x551   : > { %v2145_v61 = vrot.slane %v2113_v37, %v3969_v26  ;;  %v2154_v59 = vmul.f32 %v2153_v20, %v2113_v37  ;;  %v1725_v10 = vpop.f32.mrb[42].mxu0  ;;  %v1888_v8 = vpop.f32.mrb[46].mxu1  ;;  %v2570_v7 = vmax.f32 %v2562_v1, 1e-08  ;;  %v2537_v13 = vrot.slane %v2520_v31, %v3860_v36 }
 0x552   : > { %v3637_v56 = vpop.eup %3636  ;;  %v1726_v54 = vpop.f32.mrb[43].mxu0  ;;  %v2533_v40 = vrot.slane %v2518_v55, %v3860_v36  ;;  %v2891_v26 = vcombine.high %v4503_v52, %v4503_v52  ;;  %v2517_v9 = vrot.slane %v2489_v17, %v4235_v32  ;;  %3640 = vrcp.f32 %v2571_v11 }
 0x553   : > { %v2159_v19 = vmul.f32 %v3637_v56, %v4444_v12  ;;  %v1889_v2 = vpop.f32.mrb[47].mxu1  ;;  %v2146_v3 = vmul.f32 %v2145_v61, %v2106_v62  ;;  %v2155_v4 = vmax.f32 %v2154_v59, 1e-08  ;;  %v2565_v15 = vmul.f32 %v2537_v13, %v4480_v14 }
 0x554   : > { %v2564_v51 = vmul.f32 %v2533_v40, %v4480_v14  ;;  %v2545_v57 = vrot.slane %v2517_v9, %v3860_v36  ;;  %v2876_v42 = vcombine.high %v4497_v30, %v4497_v30  ;;  %v2503_v30 = vrot.slane %v4463_v60, %v4235_v32 }
 0x555   : > { %v2161_v49 = vsel %vm2160_vm7, %v4444_v12, %v2159_v19  ;;  %v2147_v33 = vmax.f32 %v2146_v3, 1e-08  ;;  %3642 = vrcp.f32 %v2155_v4  ;;  %v1729_v47 = vpop.f32.mrb[44].mxu0  ;;  %v1892_v24 = vpop.f32.mrb[48].mxu1  ;;  %v2573_v44 = vmax.f32 %v2565_v15, 1e-08 }
 0x556   : > { %v3639_v63 = vpop.eup %3638  ;;  %v2164_v21 = vsel %vm2162_vm0, %v2163_v25, %v2161_v49  ;;  %v1730_v41 = vpop.f32.mrb[45].mxu0  ;;  %3644 = vrcp.f32 %v2570_v7  ;;  %v2096_v12 = vsel %vm2095_vm8, %v4421_v43, %v2094_v50  ;;  %v2572_v25 = vmax.f32 %v2564_v51, 1e-08 }
 0x557   : > { %v2165_v62 = vmul.f32 %v2164_v21, %v4459_v29  ;;  %v2170_v38 = vmul.f32 %v3639_v63, %v4469_v22  ;;  %v4536_v28 = vpop.f32.mrb[49].mxu1  ;;  %3646 = vrcp.f32 %v2147_v33  ;;  %v2567_v20 = vmul.f32 %v2545_v57, %v4480_v14 }
 0x558   : > { %3648 = vrsqrt.f32 %v4536_v28  ;;  %v2521_v17 = vcombine.high %v2517_v9, %v2517_v9  ;;  %v2913_v37 = vrot.slane %v2891_v26, %v4235_v32  ;;  %v2207_v60 = vand.u32 2147483648, %v4536_v28 }
 0x559   : > { %v2166_v35 = vmax.f32 %v2165_v62, 1e-08  ;;  %v2172_v34 = vsel %vm2171_vm9, %v4469_v22, %v2170_v38  ;;  %v1733_v45 = vpop.f32.mrb[46].mxu0  ;;  %v1897_v53 = vpop.f32.mrb[50].mxu1  ;;  %3650 = vrcp.f32 %v2573_v44  ;;  %v2575_v55 = vmax.f32 %v2567_v20, 1e-08 }
 0x55a   : > { %v2175_v39 = vsel %vm2173_vm10, %v2174_v5, %v2172_v34  ;;  %v1734_v1 = vpop.f32.mrb[47].mxu0  ;;  %v4553_v31 = vpop.f32.mrb[51].mxu1  ;;  %v4557_v22 = vrot.slane %v2876_v42, %v4235_v32  ;;  %v4563_v5 = vsel %vm2097_vm1, %v2098_v58, %v2096_v12  ;;  %vm2204_vm11 = vcmp.eq.f32.partialorder %v4536_v28, inf }
 0x55b   : > { %3652 = vrcp.f32 %v2166_v35  ;;  %v2176_v27 = vmul.f32 %v2175_v39, %v4492_v6  ;;  %v2541_v61 = vrot.slane %v2503_v30, %v3860_v36  ;;  %v2553_v59 = vrot.slane %v2521_v17, %v3860_v36 }
 0x55c   : > { %3654 = vrsqrt.f32 %v4553_v31  ;;  %vm2206_vm12 = vcmp.eq.f32.partialorder %v4536_v28, 0.0  ;;  %v2519_v58 = vcombine.high %v2503_v30, %v2503_v30  ;;  %v2932_v10 = vrot.slane %v2913_v37, %v3860_v36  ;;  %v3641_v11 = vpop.eup %3640 }
 0x55d   : > { %v2177_v56 = vmax.f32 %v2176_v27, 1e-08  ;;  %3656 = vrcp.f32 %v2572_v25  ;;  %v1737_v50 = vpop.f32.mrb[48].mxu0  ;;  %v1902_v43 = vpop.f32.mrb[52].mxu1  ;;  %v2899_v8 = vrot.slane %v4503_v52, %v4235_v32  ;;  %v2566_v2 = vmul.f32 %v2541_v61, %v4480_v14 }
 0x55e   : > { %3658 = vrcp.f32 %v2575_v55  ;;  %v1738_v19 = vpop.f32.mrb[49].mxu0  ;;  %v1903_v54 = vpop.f32.mrb[53].mxu1  ;;  %v2569_v7 = vmul.f32 %v2553_v59, %v4480_v14  ;;  %v2923_v13 = vcombine.high %v2913_v37, %v2913_v37  ;;  %vm2215_vm13 = vcmp.eq.f32.partialorder %v4553_v31, inf }
 0x55f   : > { %3660 = vrcp.f32 %v2177_v56  ;;  %v3643_v40 = vpop.eup %3642  ;;  %v2549_v52 = vrot.slane %v2519_v58, %v3860_v36  ;;  %v2966_v3 = vmul.f32 %v2932_v10, %v4563_v5  ;;  %v2928_v4 = vrot.slane %v2899_v8, %v3860_v36 }
 0x560   : > { %v2921_v26 = vcombine.high %v2899_v8, %v2899_v8  ;;  %v3645_v9 = vpop.eup %3644  ;;  %v2157_v49 = vmul.f32 %v3643_v40, %v4136_v48  ;;  %vm2217_vm14 = vcmp.eq.f32.partialorder %v4553_v31, 0.0  ;;  %v2574_v15 = vmax.f32 %v2566_v2, 1e-08 }
 0x561   : > { %v2577_v51 = vmax.f32 %v2569_v7, 1e-08  ;;  %v2940_v63 = vrot.slane %v2923_v13, %v3860_v36  ;;  %v3647_v33 = vpop.eup %3646  ;;  %v1741_v21 = vpop.f32.mrb[50].mxu0  ;;  %v2568_v24 = vmul.f32 %v2549_v52, %v4480_v14  ;;  %v2974_v48 = vmax.f32 %v2966_v3, 1e-08 }
 0x562   : > { %v1906_v47 = vpop.f32.mrb[54].mxu1  ;;  %v2965_v57 = vmul.f32 %v2928_v4, %v4563_v5  ;;  %v2936_v62 = vrot.slane %v2921_v26, %v3860_v36  ;;  %v3649_v38 = vpop.eup %3648  ;;  %v2149_v41 = vmul.f32 %v3647_v33, %v4134_v46  ;;  %3662 = vrcp.f32 %v2574_v15  ;;  %3099 = vst [vmem:[%s4583_s27] sm:$0xff] %v2157_v49  ;;  %3100 = vst [vmem:[%s4583_s27 + $0x8] sm:$0xff] %v2157_v49 }
 0x563   : > { %v1742_v44 = vpop.f32.mrb[51].mxu0  ;;  %v1907_v42 = vpop.f32.mrb[55].mxu1  ;;  %v2968_v12 = vmul.f32 %v2940_v63, %v4563_v5  ;;  %v2892_v14 = vcombine.high %v4557_v22, %v4557_v22  ;;  %v2203_v35 = vmul.f32 %v3649_v38, %v4536_v28  ;;  %3664 = vrcp.f32 %v2577_v51 }
 0x564   : > { %v3651_v25 = vpop.eup %3650  ;;  %v2576_v34 = vmax.f32 %v2568_v24, 1e-08  ;;  %v2973_v20 = vmax.f32 %v2965_v57, 1e-08  ;;  %v2218_v46 = vand.u32 2147483648, %v4553_v31  ;;  %3091 = vst [vmem:[%s4596_s30] sm:$0xff] %v2149_v41  ;;  %3092 = vst [vmem:[%s4596_s30 + $0x8] sm:$0xff] %v2149_v41  ;;  %3666 = vrcp.f32 %v2974_v48 }
 0x565   : > { %v3653_v39 = vpop.eup %3652  ;;  %v2976_v45 = vmax.f32 %v2968_v12, 1e-08  ;;  %v2967_v53 = vmul.f32 %v2936_v62, %v4563_v5  ;;  %v2205_v27 = vsel %vm2204_vm11, %v4536_v28, %v2203_v35  ;;  %v3476_v1 = vpop.f32.mrb[52].mxu0  ;;  %v4617_v37 = vrot.slane %v2892_v14, %v4235_v32 }
 0x566   : > { %v3655_v30 = vpop.eup %3654  ;;  %v2168_v17 = vmul.f32 %v3653_v39, %v4190_v16  ;;  %v3517_v55 = vpop.f32.mrb[56].mxu1  ;;  %3668 = vrcp.f32 %v2576_v34  ;;  %v2208_v61 = vsel %vm2206_vm12, %v2207_v60, %v2205_v27  ;;  %v4628_v58 = vrot.slane %v4557_v22, %v4235_v32 }
 0x567   : > { %v3657_v56 = vpop.eup %3656  ;;  %v2214_v59 = vmul.f32 %v3655_v30, %v4553_v31  ;;  %v4624_v16 = vmul.f32 %v3641_v11, %v3517_v55  ;;  %v1975_v50 = vpop.f32.mrb[53].mxu0  ;;  %v2209_v8 = vmul.f32 %v2208_v61, %v4459_v29  ;;  %3670 = vrcp.f32 %v2973_v20 }
 0x568   : > { %v2433_v43 = vpop.f32.mrb[57].mxu1  ;;  %v3659_v10 = vpop.eup %3658  ;;  %3095 = vst [vmem:[%s4596_s30 + $0x20] sm:$0xff] %v2168_v17  ;;  %v2975_v54 = vmax.f32 %v2967_v53, 1e-08  ;;  %v2948_v2 = vrot.slane %v4617_v37, %v3860_v36  ;;  %v2944_v32 = vrot.slane %v4628_v58, %v3860_v36  ;;  %vm3060_vm15 = vcmask 1041409  }
 0x569   : > { %v4631_v19 = vmul.f32 %v3645_v9, %v2433_v43  ;;  %v3661_v28 = vpop.eup %3660  ;;  %v2216_v60 = vsel %vm2215_vm13, %v4553_v31, %v2214_v59  ;;  %v2600_v11 = vrot.slane %v4624_v16, 4  ;;  %v2210_v22 = vmax.f32 %v2209_v8, 1e-08  ;;  %v3479_v40 = vpop.f32.mrb[54].mxu0 }
 0x56a   : > { %v2179_v29 = vmul.f32 %v3661_v28, %v4198_v23  ;;  %v2219_v7 = vsel %vm2217_vm14, %v2218_v46, %v2216_v60  ;;  %v3520_v52 = vpop.f32.mrb[58].mxu1  ;;  %v1983_v9 = vpop.f32.mrb[55].mxu0  ;;  %3672 = vrcp.f32 %v2976_v45  ;;  %v2970_v31 = vmul.f32 %v2948_v2, %v4563_v5 }
 0x56b   : > { %v2594_v13 = vrot.slane %v4631_v19, 4  ;;  %v2220_v3 = vmul.f32 %v2219_v7, %v4492_v6  ;;  %v2601_v4 = vmax.f32 %v4624_v16, %v2600_v11  ;;  %v4648_v26 = vmul.f32 %v3651_v25, %v3520_v52  ;;  %v2443_v49 = vpop.f32.mrb[59].mxu1 }
 0x56c   : > { %3674 = vrcp.f32 %v2210_v22  ;;  %v4651_v15 = vmul.f32 %v3657_v56, %v2443_v49  ;;  %3103 = vst [vmem:[%s4583_s27 + $0x20] sm:$0xff] %v2179_v29  ;;  %v3663_v51 = vpop.eup %3662  ;;  %v4657_v21 = vmul.f32 %v2944_v32, %v4563_v5  ;;  %v2978_v38 = vmax.f32 %v2970_v31, 1e-08 }
 0x56d   : > { %v2595_v23 = vmax.f32 %v4631_v19, %v2594_v13  ;;  %v2221_v63 = vmax.f32 %v2220_v3, 1e-08  ;;  %v2602_v33 = vrot.slane %v2601_v4, 2  ;;  %v2612_v6 = vrot.slane %v4648_v26, 4  ;;  %v3665_v47 = vpop.eup %3664  ;;  %v4660_v57 = vpop.f32.mrb[56].mxu0 }
 0x56e   : > { %v2606_v48 = vrot.slane %v4651_v15, 4  ;;  %v3523_v62 = vpop.f32.mrb[60].mxu1  ;;  %3676 = vrcp.f32 %v2975_v54  ;;  %v4662_v41 = vpop.eup %3666  ;;  %vm3062_vm2 = vcmask 1042434   ;;  %vm3064_vm3 = vcmask 1043459  }
 0x56f   : > { %v2596_v24 = vrot.slane %v2595_v23, 2  ;;  %3678 = vrcp.f32 %v2221_v63  ;;  %v2603_v44 = vmax.f32 %v2601_v4, %v2602_v33  ;;  %v2613_v42 = vmax.f32 %v4648_v26, %v2612_v6  ;;  %v4665_v14 = vpop.f32.mrb[57].mxu0  ;;  %v2453_v25 = vpop.f32.mrb[61].mxu1 }
 0x570   : > { %v2591_v12 = vmul.f32 %v3659_v10, %v3523_v62  ;;  %v3669_v35 = vpop.eup %3668  ;;  %v2607_v20 = vmax.f32 %v4651_v15, %v2606_v48  ;;  %v2590_v39 = vmul.f32 %v3663_v51, %v2453_v25  ;;  %3680 = vrcp.f32 %v2978_v38 }
 0x571   : > { %v2597_v34 = vmax.f32 %v2595_v23, %v2596_v24  ;;  %v2604_v46 = vrot.slane %v2603_v44, 1  ;;  %v2614_v45 = vrot.slane %v2613_v42, 2  ;;  %v3671_v17 = vpop.eup %3670  ;;  %v3485_v61 = vpop.f32.mrb[58].mxu0  ;;  %vm3066_vm4 = vcmask 1044484  }
 0x572   : > { %v2624_v53 = vrot.slane %v2591_v12, 4  ;;  %v2643_v30 = vmax.f32 %v4624_v16, %v2591_v12  ;;  %v2608_v1 = vrot.slane %v2607_v20, 2  ;;  %v2618_v55 = vrot.slane %v2590_v39, 4  ;;  %v3526_v59 = vpop.f32.mrb[62].mxu1  ;;  %v2001_v54 = vpop.f32.mrb[59].mxu0 }
 0x573   : > { %v2598_v27 = vrot.slane %v2597_v34, 1  ;;  %v2642_v56 = vmax.f32 %v4631_v19, %v2590_v39  ;;  %v2605_v50 = vmax.f32 %v2603_v44, %v2604_v46  ;;  %v2615_v43 = vmax.f32 %v2613_v42, %v2614_v45  ;;  %v2463_v28 = vpop.f32.mrb[63].mxu1 }
 0x574   : > { %v2625_v10 = vmax.f32 %v2591_v12, %v2624_v53  ;;  %v2593_v8 = vmul.f32 %v3665_v47, %v3526_v59  ;;  %v2609_v11 = vmax.f32 %v2607_v20, %v2608_v1  ;;  %v2619_v2 = vmax.f32 %v2590_v39, %v2618_v55  ;;  %v3673_v16 = vpop.eup %3672 }
 0x575   : > { %v2599_v60 = vmax.f32 %v2597_v34, %v2598_v27  ;;  %v2646_v32 = vmax.f32 %v2642_v56, %v2643_v30  ;;  %v2616_v29 = vrot.slane %v2615_v43, 1  ;;  %v2592_v4 = vmul.f32 %v3669_v35, %v2463_v28  ;;  %v4672_v9 = vpop.f32.mrb[60].mxu0  ;;  %v3537_v49 = vpop.f32.mrb[64].mxu1 }
 0x576   : > { %v2626_v22 = vrot.slane %v2625_v10, 2  ;;  %v2636_v7 = vrot.slane %v2593_v8, 4  ;;  %v2645_v13 = vmax.f32 %v4648_v26, %v2593_v8  ;;  %v3675_v19 = vpop.eup %3674  ;;  %v2610_v52 = vrot.slane %v2609_v11, 1  ;;  %v4675_v33 = vpop.f32.mrb[61].mxu0 }
 0x577   : > { %v3061_v40 = vsel %vm3060_vm15, %v2605_v50, %v2599_v60  ;;  %v2620_v3 = vrot.slane %v2619_v2, 2  ;;  %v2212_v23 = vmul.f32 %v3675_v19, %v4376_v0  ;;  %v2617_v31 = vmax.f32 %v2615_v43, %v2616_v29  ;;  %v2836_v6 = vpop.f32.mrb[65].mxu1 }
 0x578   : > { %v2627_v51 = vmax.f32 %v2625_v10, %v2626_v22  ;;  %v2637_v63 = vmax.f32 %v2593_v8, %v2636_v7  ;;  %v3677_v47 = vpop.eup %3676  ;;  %v2611_v26 = vmax.f32 %v2609_v11, %v2610_v52  ;;  %v2630_v48 = vrot.slane %v2592_v4, 4 }
 0x579   : > { %v2621_v24 = vmax.f32 %v2619_v2, %v2620_v3  ;;  %v2644_v62 = vmax.f32 %v4651_v15, %v2592_v4  ;;  %v3679_v38 = vpop.eup %3678  ;;  %3097 = vst [vmem:[%s4596_s30 + $0x30] sm:$0xff] %v2212_v23  ;;  %v4680_v12 = vmul.f32 %v4662_v41, %v3537_v49  ;;  %v4682_v0 = vmul.f32 %v3671_v17, %v2836_v6  ;;  %v3491_v46 = vpop.f32.mrb[62].mxu0 }
 0x57a   : > { %v2628_v44 = vrot.slane %v2627_v51, 1  ;;  %v2638_v42 = vrot.slane %v2637_v63, 2  ;;  %v3681_v25 = vpop.eup %3680  ;;  %v2223_v35 = vmul.f32 %v3679_v38, %v4399_v18  ;;  %v3063_v34 = vsel %vm3062_vm2, %v2611_v26, %v3061_v40  ;;  %v3540_v45 = vpop.f32.mrb[66].mxu1 }
 0x57b   : > { %v2622_v20 = vrot.slane %v2621_v24, 1  ;;  %v2631_v39 = vmax.f32 %v2592_v4, %v2630_v48  ;;  %v3065_v15 = vsel %vm3064_vm3, %v2617_v31, %v3063_v34  ;;  %v2647_v30 = vmax.f32 %v2644_v62, %v2645_v13  ;;  %v2019_v27 = vpop.f32.mrb[63].mxu0  ;;  %v2846_v41 = vpop.f32.mrb[67].mxu1 }
 0x57c   : > { %v2639_v53 = vmax.f32 %v2637_v63, %v2638_v42  ;;  %vm3068_vm5 = vcmask 1045509   ;;  %3105 = vst [vmem:[%s4583_s27 + $0x30] sm:$0xff] %v2223_v35  ;;  %v3003_v55 = vrot.slane %v4680_v12, 4  ;;  %v2997_v18 = vrot.slane %v4682_v0, 4 }
 0x57d   : > { %v2623_v1 = vmax.f32 %v2621_v24, %v2622_v20  ;;  %v2632_v17 = vrot.slane %v2631_v39, 2  ;;  %v2629_v56 = vmax.f32 %v2627_v51, %v2628_v44  ;;  %v2648_v61 = vmax.f32 %v2646_v32, %v2647_v30  ;;  %v4697_v28 = vpop.f32.mrb[64].mxu0  ;;  %v3543_v60 = vpop.f32.mrb[68].mxu1 }
 0x57e   : > { %v4690_v59 = vmul.f32 %v3673_v16, %v3540_v45  ;;  %v4692_v50 = vmul.f32 %v3677_v47, %v2846_v41  ;;  %v3004_v8 = vmax.f32 %v4680_v12, %v3003_v55  ;;  %v2998_v54 = vmax.f32 %v4682_v0, %v2997_v18  ;;  %v4703_v29 = vpop.f32.mrb[65].mxu0  ;;  %v4705_v22 = vpop.f32.mrb[69].mxu1 }
 0x57f   : > { %v3067_v43 = vsel %vm3066_vm4, %v2623_v1, %v3065_v15  ;;  %v2633_v10 = vmax.f32 %v2631_v39, %v2632_v17  ;;  %v2640_v11 = vrot.slane %v2639_v53, 1  ;;  %3101 = vst [vmem:[%s4583_s27 + $0x10] sm:$0xff] %v2648_v61  ;;  %vm3070_vm6 = vcmask 1046534  }
 0x580   : > { %v3069_v2 = vsel %vm3068_vm5, %v2629_v56, %v3067_v43  ;;  %v3015_v32 = vrot.slane %v4690_v59, 4  ;;  %v3009_v16 = vrot.slane %v4692_v50, 4  ;;  %v3005_v13 = vrot.slane %v3004_v8, 2 }
 0x581   : > { %v2634_v7 = vrot.slane %v2633_v10, 1  ;;  %v2999_v19 = vrot.slane %v2998_v54, 2  ;;  %vm3072_vm7 = vcmask 1047559   ;;  %3682 = vrsqrt.f32 %v4697_v28  ;;  %v3497_v23 = vpop.f32.mrb[66].mxu0  ;;  %v4710_v31 = vpop.f32.mrb[70].mxu1 }
 0x582   : > { %v3016_v40 = vmax.f32 %v4690_v59, %v3015_v32  ;;  %v3010_v52 = vmax.f32 %v4692_v50, %v3009_v16  ;;  %v3006_v4 = vmax.f32 %v3004_v8, %v3005_v13  ;;  %v2924_v51 = vcombine.high %v4617_v37, %v4617_v37  ;;  %v2037_v24 = vpop.f32.mrb[67].mxu0  ;;  %v4716_v48 = vpop.f32.mrb[71].mxu1 }
 0x583   : > { %v2635_v3 = vmax.f32 %v2633_v10, %v2634_v7  ;;  %v3000_v49 = vmax.f32 %v2998_v54, %v2999_v19  ;;  %v2641_v63 = vmax.f32 %v2639_v53, %v2640_v11  ;;  %v4714_v26 = vmul.f32 %v3681_v25, %v3543_v60 }
 0x584   : > { %v3017_v6 = vrot.slane %v3016_v40, 2  ;;  %v3011_v47 = vrot.slane %v3010_v52, 2  ;;  %v3007_v38 = vrot.slane %v3006_v4, 1  ;;  %3684 = vrsqrt.f32 %v4703_v29 }
 0x585   : > { %v3071_v62 = vsel %vm3070_vm6, %v2635_v3, %v3069_v2  ;;  %v3001_v44 = vrot.slane %v3000_v49, 1  ;;  %v3027_v37 = vrot.slane %v4714_v26, 4  ;;  %v3046_v25 = vmax.f32 %v4680_v12, %v4714_v26  ;;  %v3500_v46 = vpop.f32.mrb[68].mxu0 }
 0x586   : > { %v3073_v42 = vsel %vm3072_vm7, %v2641_v63, %v3071_v62  ;;  %v3018_v35 = vmax.f32 %v3016_v40, %v3017_v6  ;;  %v3012_v34 = vmax.f32 %v3010_v52, %v3011_v47  ;;  %v3008_v20 = vmax.f32 %v3006_v4, %v3007_v38  ;;  %v4726_v30 = vpop.f32.mrb[69].mxu0 }
 0x587   : > { %3093 = vst [vmem:[%s4596_s30 + $0x10] sm:$0xff] %v3073_v42  ;;  %v3002_v39 = vmax.f32 %v3000_v49, %v3001_v44  ;;  %v3028_v53 = vmax.f32 %v4714_v26, %v3027_v37  ;;  %v2977_v41 = vmax.f32 %v4657_v21, 1e-08  ;;  %v2956_v1 = vrot.slane %v2924_v51, %v3860_v36 }
 0x588   : > { %v3019_v45 = vrot.slane %v3018_v35, 1  ;;  %v3013_v15 = vrot.slane %v3012_v34, 1  ;;  %v2922_v17 = vcombine.high %v4628_v58, %v4628_v58  ;;  %3686 = vrsqrt.f32 %v3500_v46 }
 0x589   : > { %v3083_v27 = vsel %vm3060_vm15, %v3008_v20, %v3002_v39  ;;  %3688 = vrcp.f32 %v2977_v41  ;;  %v2972_v56 = vmul.f32 %v2956_v1, %v4563_v5  ;;  %v3503_v43 = vpop.f32.mrb[70].mxu0  ;;  %v3029_v60 = vrot.slane %v3028_v53, 2 }
 0x58a   : > { %v3014_v55 = vmax.f32 %v3012_v34, %v3013_v15  ;;  %v3020_v18 = vmax.f32 %v3018_v35, %v3019_v45  ;;  %v2952_v61 = vrot.slane %v2922_v17, %v3860_v36  ;;  %v2055_v54 = vpop.f32.mrb[71].mxu0  ;;  %3690 = vrsqrt.f32 %v4726_v30 }
 0x58b   : > { %v3683_v10 = vpop.eup %3682  ;;  %v2980_v11 = vmax.f32 %v2972_v56, 1e-08  ;;  %v4747_v13 = vmax.f32 %v3028_v53, %v3029_v60  ;;  %vm2137_vm8 = vcmp.eq.f32.partialorder %v4697_v28, inf  ;;  %vm2139_vm0 = vcmp.eq.f32.partialorder %v4697_v28, 0.0 }
 0x58c   : > { %v3084_v8 = vsel %vm3062_vm2, %v3014_v55, %v3083_v27  ;;  %v2971_v58 = vmul.f32 %v2952_v61, %v4563_v5  ;;  %v2136_v32 = vmul.f32 %v3683_v10, %v4697_v28  ;;  %v2140_v40 = vand.u32 2147483648, %v4697_v28 }
 0x58d   : > { %v4737_v21 = vsel %vm3064_vm3, %v3020_v18, %v3084_v8  ;;  %3692 = vrcp.f32 %v2980_v11  ;;  %v4742_v36 = vpop.f32.mrb[72].mxu0  ;;  %vm2130_vm1 = vcmp.eq.f32.partialorder %v4703_v29, inf  ;;  %vm2132_vm9 = vcmp.eq.f32.partialorder %v4703_v29, 0.0 }
 0x58e   : > { %v3685_v2 = vpop.eup %3684  ;;  %v2979_v16 = vmax.f32 %v2971_v58, 1e-08  ;;  %3694 = vrsqrt.f32 %v4742_v36  ;;  %v4745_v7 = vpop.f32.mrb[73].mxu0  ;;  %v2138_v19 = vsel %vm2137_vm8, %v4697_v28, %v2136_v32  ;;  %v2133_v3 = vand.u32 2147483648, %v4703_v29 }
 0x58f   : > { %v2129_v5 = vmul.f32 %v3685_v2, %v4703_v29  ;;  %vm2193_vm10 = vcmp.eq.f32.partialorder %v3500_v46, inf  ;;  %v3031_v49 = vrot.slane %v4747_v13, 1  ;;  %vm2195_vm11 = vcmp.eq.f32.partialorder %v3500_v46, 0.0 }
 0x590   : > { %3696 = vrcp.f32 %v2979_v16  ;;  %v2196_v51 = vand.u32 2147483648, %v3500_v46  ;;  %v2141_v63 = vsel %vm2139_vm0, %v2140_v40, %v2138_v19  ;;  %vm2182_vm12 = vcmp.eq.f32.partialorder %v4726_v30, inf }
 0x591   : > { %3698 = vrsqrt.f32 %v4745_v7  ;;  %v2131_v6 = vsel %vm2130_vm1, %v4703_v29, %v2129_v5  ;;  %vm2184_vm13 = vcmp.eq.f32.partialorder %v4726_v30, 0.0  ;;  %v2185_v24 = vand.u32 2147483648, %v4726_v30 }
 0x592   : > { %v3687_v52 = vpop.eup %3686  ;;  %vm2237_vm14 = vcmp.eq.f32.partialorder %v4742_v36, inf  ;;  %vm2239_vm15 = vcmp.eq.f32.partialorder %v4742_v36, 0.0  ;;  %v2240_v37 = vand.u32 2147483648, %v4742_v36  ;;  %v2134_v20 = vsel %vm2132_vm9, %v2133_v3, %v2131_v6 }
 0x593   : > { %v3689_v4 = vpop.eup %3688  ;;  %v2192_v23 = vmul.f32 %v3687_v52, %v3500_v46  ;;  %vm2226_vm2 = vcmp.eq.f32.partialorder %v4745_v7, inf  ;;  %vm2228_vm3 = vcmp.eq.f32.partialorder %v4745_v7, 0.0  ;;  %v3032_v19 = vmax.f32 %v4747_v13, %v3031_v49 }
 0x594   : > { %v2993_v47 = vmul.f32 %v3689_v4, %v4705_v22  ;;  %v3691_v62 = vpop.eup %3690 }
 0x595   : > { %v2194_v28 = vsel %vm2193_vm10, %v3500_v46, %v2192_v23  ;;  %v2181_v22 = vmul.f32 %v3691_v62, %v4726_v30 }
 0x596   : > { %v3021_v38 = vrot.slane %v2993_v47, 4  ;;  %v3045_v44 = vmax.f32 %v4682_v0, %v2993_v47  ;;  %v2197_v42 = vsel %vm2195_vm11, %v2196_v51, %v2194_v28 }
 0x597   : > { %v3693_v35 = vpop.eup %3692  ;;  %v2198_v34 = vmul.f32 %v2197_v42, %v2141_v63  ;;  %v2183_v27 = vsel %vm2182_vm12, %v4726_v30, %v2181_v22  ;;  %v2229_v30 = vand.u32 2147483648, %v4745_v7 }
 0x598   : > { %v3695_v39 = vpop.eup %3694  ;;  %v3022_v46 = vmax.f32 %v2993_v47, %v3021_v38  ;;  %v3049_v45 = vmax.f32 %v3045_v44, %v3046_v25  ;;  %v2996_v0 = vmul.f32 %v3693_v35, %v4710_v31  ;;  %v2186_v31 = vsel %vm2184_vm13, %v2185_v24, %v2183_v27 }
 0x599   : > { %v2199_v53 = vmax.f32 %v2198_v34, 1e-08  ;;  %v2236_v41 = vmul.f32 %v3695_v39, %v4742_v36  ;;  %v2187_v10 = vmul.f32 %v2186_v31, %v2134_v20 }
 0x59a   : > { %v3697_v15 = vpop.eup %3696  ;;  %v3023_v1 = vrot.slane %v3022_v46, 2  ;;  %v3039_v17 = vrot.slane %v2996_v0, 4  ;;  %v3048_v12 = vmax.f32 %v4690_v59, %v2996_v0 }
 0x59b   : > { %v3699_v29 = vpop.eup %3698  ;;  %v2995_v26 = vmul.f32 %v3697_v15, %v4716_v48  ;;  %3700 = vrcp.f32 %v2199_v53  ;;  %v2238_v25 = vsel %vm2237_vm14, %v4742_v36, %v2236_v41  ;;  %v2188_v2 = vmax.f32 %v2187_v10, 1e-08 }
 0x59c   : > { %v2225_v55 = vmul.f32 %v3699_v29, %v4745_v7  ;;  %v3024_v18 = vmax.f32 %v3022_v46, %v3023_v1  ;;  %v3040_v56 = vmax.f32 %v2996_v0, %v3039_v17  ;;  %v2241_v59 = vsel %vm2239_vm15, %v2240_v37, %v2238_v25 }
 0x59d   : > { %v3033_v61 = vrot.slane %v2995_v26, 4  ;;  %v3047_v43 = vmax.f32 %v4692_v50, %v2995_v26  ;;  %v2242_v58 = vmul.f32 %v2241_v59, %v2141_v63  ;;  %3702 = vrcp.f32 %v2188_v2 }
 0x59e   : > { %v2227_v48 = vsel %vm2226_vm2, %v4745_v7, %v2225_v55  ;;  %v3025_v8 = vrot.slane %v3024_v18, 1  ;;  %v3041_v54 = vrot.slane %v3040_v56, 2 }
 0x59f   : > { %v3034_v60 = vmax.f32 %v2995_v26, %v3033_v61  ;;  %v3050_v11 = vmax.f32 %v3047_v43, %v3048_v12  ;;  %v2230_v50 = vsel %vm2228_vm3, %v2229_v30, %v2227_v48  ;;  %v2243_v40 = vmax.f32 %v2242_v58, 1e-08 }
 0x5a0   : > { %v3026_v32 = vmax.f32 %v3024_v18, %v3025_v8  ;;  %v3042_v16 = vmax.f32 %v3040_v56, %v3041_v54  ;;  %v2231_v52 = vmul.f32 %v2230_v50, %v2134_v20 }
 0x5a1   : > { %v3035_v36 = vrot.slane %v3034_v60, 2  ;;  %v3051_v5 = vmax.f32 %v3049_v45, %v3050_v11  ;;  %3704 = vrcp.f32 %v2243_v40 }
 0x5a2   : > { %v3086_v3 = vsel %vm3066_vm4, %v3026_v32, %v4737_v21  ;;  %v3043_v23 = vrot.slane %v3042_v16, 1  ;;  %v2232_v51 = vmax.f32 %v2231_v52, 1e-08 }
 0x5a3   : > { %v3036_v4 = vmax.f32 %v3034_v60, %v3035_v36  ;;  %3102 = vst [vmem:[%s4583_s27 + $0x18] sm:$0xff] %v3051_v5  ;;  %v3087_v7 = vsel %vm3068_vm5, %v3032_v19, %v3086_v3 }
 0x5a4   : > { %3706 = vrcp.f32 %v2232_v51  ;;  %v3044_v47 = vmax.f32 %v3042_v16, %v3043_v23 }
 0x5a5   : > { %v3037_v63 = vrot.slane %v3036_v4, 1  ;;  %v3701_v6 = vpop.eup %3700 }
 0x5a6   : > { %v2201_v49 = vmul.f32 %v3701_v6, %v4660_v57 }
 0x5a7   : > { %v3038_v13 = vmax.f32 %v3036_v4, %v3037_v63  ;;  %v3703_v24 = vpop.eup %3702 }
 0x5a8   : > { %3104 = vst [vmem:[%s4583_s27 + $0x28] sm:$0xff] %v2201_v49  ;;  %v2190_v62 = vmul.f32 %v3703_v24, %v4665_v14 }
 0x5a9   : > { %v3088_v21 = vsel %vm3070_vm6, %v3038_v13, %v3087_v7 }
 0x5aa   : > { %v3089_v28 = vsel %vm3072_vm7, %v3044_v47, %v3088_v21  ;;  %3096 = vst [vmem:[%s4596_s30 + $0x28] sm:$0xff] %v2190_v62 }
 0x5ab   : > { %3094 = vst [vmem:[%s4596_s30 + $0x18] sm:$0xff] %v3089_v28  ;;  %v3705_v38 = vpop.eup %3704 }
 0x5ac   : > { %v2245_v44 = vmul.f32 %v3705_v38, %v4672_v9 }
 0x5ae   : > { %v3707_v42 = vpop.eup %3706  ;;  %3106 = vst [vmem:[%s4583_s27 + $0x38] sm:$0xff] %v2245_v44 }
 0x5af   : > { %v2234_v35 = vmul.f32 %v3707_v42, %v4675_v33 }
 0x5b1   : > { %3098 = vst [vmem:[%s4596_s30 + $0x38] sm:$0xff] %v2234_v35 }
 0x5b2 PF: > { %s21_s13 = sadd.s32 1, %s3715_s13  }
 0x5b3   : > { %p18_p4 = scmp.ge.s32.totalorder %s21_s13, 4  }
 0x5b5   :  { %20 = sbr.rel (!%p18_p4) target bundleno = 1 (0x1), region = 107 }

</bundles_post_ra>
